<compile_context>
chip_gen: v7x
topology: tpu7x:2x2x1
jax: 0.10.0
libtpu: 0.0.40
codegen_flags: <defaults>
</compile_context>

<pallas_src>
import jax
import jax.numpy as jnp
from jax.experimental import pallas as pl
from jax.experimental.pallas import tpu as pltpu


def _round_up(a, b):
    return (a + b - 1) // b * b


def _make_bottleneck_kernel(H, W, W_pad, width):
    R = (H + 2) * W_pad      # input slab rows (one zero halo row above/below)
    M = H * W_pad            # output rows (image rows only, padded row stride)

    def kernel(x_ref, mask_ref, w1_ref, b1_ref, w2_ref, b2_ref,
               w3_ref, b3_ref, out_ref):
        # x_ref block: (1, R, C_in) f32; halo rows / pad columns are zero.
        x = x_ref[0]                                   # (R, C_in)
        xr = jnp.maximum(x, 0.0)                       # relu(x) == identity

        # ---- conv1 (1x1, BN scale folded into w1) + bias + relu ----
        h1 = jnp.dot(xr, w1_ref[...], preferred_element_type=jnp.float32)
        h1 = jnp.maximum(h1 + b1_ref[...], 0.0)        # (R, width)
        # Re-zero halo rows / pad columns (bias + relu made them nonzero) so
        # conv2 taps read exact zeros outside the image.
        h1 = h1 * mask_ref[...]

        # ---- conv2 (3x3, pad=1, stride=1): 9 accumulated matmuls ----
        # dx = -1 / 0 / +1 shifted copies are the only relayout copies; the
        # dy taps are then sublane-aligned static slices (W_pad % 8 == 0).
        zrow = jnp.zeros((1, width), jnp.float32)
        cols = (
            jnp.concatenate([zrow, h1[:R - 1]], axis=0),   # value at x-1
            h1,                                            # value at x
            jnp.concatenate([h1[1:], zrow], axis=0),       # value at x+1
        )
        acc = jnp.zeros((M, width), jnp.float32)
        for j in range(3):                     # dy = j - 1
            start = j * W_pad                  # static, multiple of 8
            for i in range(3):                 # dx = i - 1
                tap = cols[i][start:start + M]             # (M, width) view
                acc = acc + jnp.dot(tap, w2_ref[3 * j + i],
                                    preferred_element_type=jnp.float32)
        h2 = jnp.maximum(acc + b2_ref[...], 0.0)       # (M, width)

        # ---- conv3 (1x1) + bias + residual add (no final relu) ----
        h3 = jnp.dot(h2, w3_ref[...], preferred_element_type=jnp.float32)
        out_ref[0] = (h3 + b3_ref[...] + xr[W_pad:W_pad + M]).astype(out_ref.dtype)

    return kernel


def bottleneck_forward(x, params):
    """x: (N, H, W, C_in) NHWC float32. Returns (out, out) like the PyTorch module."""
    N, H, W, C_in = x.shape
    w1, s1, b1, w2, s2, b2, w3, s3, b3 = params
    width = w1.shape[1]
    C_out = w3.shape[1]
    # stride=1 / downsample=None path only (the module's default arguments).
    assert C_in == C_out, "residual add requires inplanes == planes * expansion"
    assert H >= 1 and W >= 1

    # Padded row stride: 1 zero column on the left, >=1 on the right, rounded
    # to a multiple of 8 so dy shifts are sublane-aligned and dx = +/-1 never
    # wraps across image rows.  Pixel (y, x) -> slab row (y+1)*W_pad + (x+1).
    W_pad = _round_up(W + 2, 8)
    R = (H + 2) * W_pad
    M = H * W_pad

    # Fold BN scales into conv weights (inference form); keep true channel widths.
    w1e = (w1 * s1).astype(jnp.float32)                               # (C_in, width)
    w2e = (w2 * s2[None, None]).reshape(9, width, width).astype(jnp.float32)
    w3e = (w3 * s3).astype(jnp.float32)                               # (width, C_out)

    # Spatially padded activation slab, true channel width (lane dim = C_in).
    xs = jnp.pad(x, ((0, 0), (1, 1), (1, W_pad - W - 1), (0, 0)))
    xs = xs.reshape(N, R, C_in)

    # 1.0 on real pixels, 0.0 on halo rows / pad columns.
    mask = jnp.zeros((H + 2, W_pad), jnp.float32)
    mask = mask.at[1:H + 1, 1:W + 1].set(1.0).reshape(R, 1)

    kernel = _make_bottleneck_kernel(H, W, W_pad, width)

    def const_spec(a):  # whole array, same block every grid step (DMA'd once)
        return pl.BlockSpec(a.shape, lambda n: (0,) * a.ndim)

    grid_spec = pltpu.PrefetchScalarGridSpec(
        num_scalar_prefetch=0,
        grid=(N,),
        in_specs=[
            pl.BlockSpec((1, R, C_in), lambda n: (n, 0, 0)),          # x slab
            const_spec(mask),
            const_spec(w1e), const_spec(b1),
            const_spec(w2e), const_spec(b2),
            const_spec(w3e), const_spec(b3),
        ],
        out_specs=pl.BlockSpec((1, M, C_out), lambda n: (n, 0, 0)),
    )

    out_slab = pl.pallas_call(
        kernel,
        grid_spec=grid_spec,
        out_shape=jax.ShapeDtypeStruct((N, M, C_out), x.dtype),
        compiler_params=pltpu.CompilerParams(
            dimension_semantics=("parallel",)),
    )(xs, mask, w1e, b1, w2e, b2, w3e, b3)

    # Drop the per-row pad columns (halo rows were never written).
    out = out_slab.reshape(N, H, W_pad, C_out)[:, :, 1:W + 1, :]
    return out, out                      # duplicate at JAX level (single store)


def bottleneck_reference(x, params):
    """Pure-JAX (f32) NHWC reference for validation."""
    w1, s1, b1, w2, s2, b2, w3, s3, b3 = params
    dn = ("NHWC", "HWIO", "NHWC")
    xr = jnp.maximum(x, 0.0)
    h = jax.lax.conv_general_dilated(xr, w1[None, None], (1, 1), "VALID",
                                     dimension_numbers=dn)
    h = jnp.maximum(h * s1 + b1, 0.0)
    h = jax.lax.conv_general_dilated(h, w2, (1, 1), "SAME",
                                     dimension_numbers=dn)
    h = jnp.maximum(h * s2 + b2, 0.0)
    h = jax.lax.conv_general_dilated(h, w3[None, None], (1, 1), "VALID",
                                     dimension_numbers=dn)
    h = h * s3 + b3
    out = h + xr
    return out, out


def init_params(key, inplanes, planes, base_width=64, groups=1, eps=1e-5):
    width = int(planes * (base_width / 64.0)) * groups
    c_out = planes * 4  # Bottleneck.expansion = 4
    ks = jax.random.split(key, 12)

    def bn(kg, kb, km, kv, c):
        gamma = 1.0 + 0.1 * jax.random.normal(kg, (c,), jnp.float32)
        beta = 0.1 * jax.random.normal(kb, (c,), jnp.float32)
        mean = 0.1 * jax.random.normal(km, (c,), jnp.float32)
        var = jnp.abs(jax.random.normal(kv, (c,), jnp.float32)) + 0.5
        scale = gamma / jnp.sqrt(var + eps)
        bias = beta - mean * scale
        return scale[None, :], bias[None, :]

    w1 = 0.1 * jax.random.normal(ks[0], (inplanes, width), jnp.float32)
    s1, b1 = bn(ks[1], ks[2], ks[3], ks[4], width)
    w2 = 0.1 * jax.random.normal(ks[5], (3, 3, width, width), jnp.float32)
    s2, b2 = bn(ks[6], ks[7], ks[8], ks[9], width)
    w3 = 0.1 * jax.random.normal(ks[10], (width, c_out), jnp.float32)
    s3, b3 = bn(ks[11], ks[1], ks[3], ks[5], c_out)
    return (w1, s1, b1, w2, s2, b2, w3, s3, b3)


if __name__ == "__main__":
    key = jax.random.PRNGKey(0)
    kx, kp = jax.random.split(key)

    # Bottleneck(inplanes=16, planes=4): width = 4, out channels = 4*4 = 16.
    N, H, W, inplanes, planes = 2, 16, 16, 16, 4
    x = jax.random.normal(kx, (N, H, W, inplanes), jnp.float32)
    params = init_params(kp, inplanes, planes)

    out1, out2 = bottleneck_forward(x, params)
    jax.block_until_ready((out1, out2))

    ref1, _ = bottleneck_reference(x, params)
    assert jnp.allclose(out1, ref1, atol=2e-2, rtol=2e-2), "mismatch vs reference"
    assert jnp.allclose(out1, out2), "the two returned outputs must be identical"

    print("KERNEL_OK")
</pallas_src>

<mosaic_0001>
module attributes {stable_mosaic.version = 11 : i64} {
  func.func @kernel(%arg0: i32, %arg1: memref<1x432x16xf32, #tpu.memory_space<vmem>>, %arg2: memref<432x1xf32, #tpu.memory_space<vmem>>, %arg3: memref<16x4xf32, #tpu.memory_space<vmem>>, %arg4: memref<1x4xf32, #tpu.memory_space<vmem>>, %arg5: memref<9x4x4xf32, #tpu.memory_space<vmem>>, %arg6: memref<1x4xf32, #tpu.memory_space<vmem>>, %arg7: memref<4x16xf32, #tpu.memory_space<vmem>>, %arg8: memref<1x16xf32, #tpu.memory_space<vmem>>, %arg9: memref<1x384x16xf32, #tpu.memory_space<vmem>>) attributes {dimension_semantics = [#tpu.dimension_semantics<parallel>], iteration_bounds = array<i64: 2>, scalar_prefetch = 0 : i64, scratch_operands = 0 : i64, tpu.core_type = #tpu.core_type<tc>, window_params = [{transform_indices = @transform_0, window_bounds = array<i64: 1, 432, 16>}, {pipeline_mode = #tpu.pipeline_mode<synchronous>, transform_indices = @transform_1, window_bounds = array<i64: 432, 1>}, {pipeline_mode = #tpu.pipeline_mode<synchronous>, transform_indices = @transform_2, window_bounds = array<i64: 16, 4>}, {pipeline_mode = #tpu.pipeline_mode<synchronous>, transform_indices = @transform_3, window_bounds = array<i64: 1, 4>}, {pipeline_mode = #tpu.pipeline_mode<synchronous>, transform_indices = @transform_4, window_bounds = array<i64: 9, 4, 4>}, {pipeline_mode = #tpu.pipeline_mode<synchronous>, transform_indices = @transform_5, window_bounds = array<i64: 1, 4>}, {pipeline_mode = #tpu.pipeline_mode<synchronous>, transform_indices = @transform_6, window_bounds = array<i64: 4, 16>}, {pipeline_mode = #tpu.pipeline_mode<synchronous>, transform_indices = @transform_7, window_bounds = array<i64: 1, 16>}, {transform_indices = @transform_8, window_bounds = array<i64: 1, 384, 16>}]} {
    %c0 = arith.constant 0 : index
    %c0_0 = arith.constant 0 : index
    %c0_1 = arith.constant 0 : index
    %0 = vector.load %arg1[%c0, %c0_0, %c0_1] : memref<1x432x16xf32, #tpu.memory_space<vmem>>, vector<1x432x16xf32>
    %1 = vector.shape_cast %0 : vector<1x432x16xf32> to vector<432x16xf32>
    %cst = arith.constant 0.000000e+00 : f32
    %2 = vector.broadcast %cst : f32 to vector<432x16xf32>
    %3 = arith.maximumf %1, %2 : vector<432x16xf32>
    %c0_2 = arith.constant 0 : index
    %c0_3 = arith.constant 0 : index
    %4 = vector.load %arg3[%c0_2, %c0_3] : memref<16x4xf32, #tpu.memory_space<vmem>>, vector<16x4xf32>
    %cst_4 = arith.constant dense<0.000000e+00> : vector<432x4xf32>
    %5 = tpu.matmul %3, %4, %cst_4 {dimension_numbers = #tpu.dot_dimension_numbers<[1], [0], [0], [1], [0, 0, 1, 1], [], []>} : vector<432x16xf32>, vector<16x4xf32>, vector<432x4xf32> -> vector<432x4xf32>
    %c0_5 = arith.constant 0 : index
    %c0_6 = arith.constant 0 : index
    %6 = vector.load %arg4[%c0_5, %c0_6] : memref<1x4xf32, #tpu.memory_space<vmem>>, vector<1x4xf32>
    %7 = vector.broadcast %6 : vector<1x4xf32> to vector<432x4xf32>
    %8 = arith.addf %5, %7 : vector<432x4xf32>
    %cst_7 = arith.constant 0.000000e+00 : f32
    %9 = vector.broadcast %cst_7 : f32 to vector<432x4xf32>
    %10 = arith.maximumf %8, %9 : vector<432x4xf32>
    %c0_8 = arith.constant 0 : index
    %c0_9 = arith.constant 0 : index
    %11 = vector.load %arg2[%c0_8, %c0_9] : memref<432x1xf32, #tpu.memory_space<vmem>>, vector<432x1xf32>
    %12 = vector.broadcast %11 : vector<432x1xf32> to vector<432x4xf32>
    %13 = arith.mulf %10, %12 : vector<432x4xf32>
    %cst_10 = arith.constant 0.000000e+00 : f32
    %14 = vector.broadcast %cst_10 : f32 to vector<1x4xf32>
    %15 = vector.extract_strided_slice %13 {offsets = [0, 0], sizes = [431, 4], strides = [1, 1]} : vector<432x4xf32> to vector<431x4xf32>
    %16 = tpu.concatenate %14, %15 in 0 : vector<1x4xf32>, vector<431x4xf32> -> vector<432x4xf32>
    %17 = vector.extract_strided_slice %13 {offsets = [1, 0], sizes = [431, 4], strides = [1, 1]} : vector<432x4xf32> to vector<431x4xf32>
    %18 = tpu.concatenate %17, %14 in 0 : vector<431x4xf32>, vector<1x4xf32> -> vector<432x4xf32>
    %cst_11 = arith.constant 0.000000e+00 : f32
    %19 = vector.broadcast %cst_11 : f32 to vector<384x4xf32>
    %20 = vector.extract_strided_slice %16 {offsets = [0, 0], sizes = [384, 4], strides = [1, 1]} : vector<432x4xf32> to vector<384x4xf32>
    %c0_12 = arith.constant 0 : index
    %c0_13 = arith.constant 0 : index
    %c0_14 = arith.constant 0 : index
    %21 = vector.load %arg5[%c0_12, %c0_13, %c0_14] : memref<9x4x4xf32, #tpu.memory_space<vmem>>, vector<1x4x4xf32>
    %22 = vector.shape_cast %21 : vector<1x4x4xf32> to vector<4x4xf32>
    %cst_15 = arith.constant dense<0.000000e+00> : vector<384x4xf32>
    %23 = tpu.matmul %20, %22, %cst_15 {dimension_numbers = #tpu.dot_dimension_numbers<[1], [0], [0], [1], [0, 0, 1, 1], [], []>} : vector<384x4xf32>, vector<4x4xf32>, vector<384x4xf32> -> vector<384x4xf32>
    %24 = arith.addf %19, %23 : vector<384x4xf32>
    %25 = vector.extract_strided_slice %13 {offsets = [0, 0], sizes = [384, 4], strides = [1, 1]} : vector<432x4xf32> to vector<384x4xf32>
    %c1 = arith.constant 1 : index
    %c0_16 = arith.constant 0 : index
    %c0_17 = arith.constant 0 : index
    %26 = vector.load %arg5[%c1, %c0_16, %c0_17] : memref<9x4x4xf32, #tpu.memory_space<vmem>>, vector<1x4x4xf32>
    %27 = vector.shape_cast %26 : vector<1x4x4xf32> to vector<4x4xf32>
    %cst_18 = arith.constant dense<0.000000e+00> : vector<384x4xf32>
    %28 = tpu.matmul %25, %27, %cst_18 {dimension_numbers = #tpu.dot_dimension_numbers<[1], [0], [0], [1], [0, 0, 1, 1], [], []>} : vector<384x4xf32>, vector<4x4xf32>, vector<384x4xf32> -> vector<384x4xf32>
    %29 = arith.addf %24, %28 : vector<384x4xf32>
    %30 = vector.extract_strided_slice %18 {offsets = [0, 0], sizes = [384, 4], strides = [1, 1]} : vector<432x4xf32> to vector<384x4xf32>
    %c2 = arith.constant 2 : index
    %c0_19 = arith.constant 0 : index
    %c0_20 = arith.constant 0 : index
    %31 = vector.load %arg5[%c2, %c0_19, %c0_20] : memref<9x4x4xf32, #tpu.memory_space<vmem>>, vector<1x4x4xf32>
    %32 = vector.shape_cast %31 : vector<1x4x4xf32> to vector<4x4xf32>
    %cst_21 = arith.constant dense<0.000000e+00> : vector<384x4xf32>
    %33 = tpu.matmul %30, %32, %cst_21 {dimension_numbers = #tpu.dot_dimension_numbers<[1], [0], [0], [1], [0, 0, 1, 1], [], []>} : vector<384x4xf32>, vector<4x4xf32>, vector<384x4xf32> -> vector<384x4xf32>
    %34 = arith.addf %29, %33 : vector<384x4xf32>
    %35 = vector.extract_strided_slice %16 {offsets = [24, 0], sizes = [384, 4], strides = [1, 1]} : vector<432x4xf32> to vector<384x4xf32>
    %c3 = arith.constant 3 : index
    %c0_22 = arith.constant 0 : index
    %c0_23 = arith.constant 0 : index
    %36 = vector.load %arg5[%c3, %c0_22, %c0_23] : memref<9x4x4xf32, #tpu.memory_space<vmem>>, vector<1x4x4xf32>
    %37 = vector.shape_cast %36 : vector<1x4x4xf32> to vector<4x4xf32>
    %cst_24 = arith.constant dense<0.000000e+00> : vector<384x4xf32>
    %38 = tpu.matmul %35, %37, %cst_24 {dimension_numbers = #tpu.dot_dimension_numbers<[1], [0], [0], [1], [0, 0, 1, 1], [], []>} : vector<384x4xf32>, vector<4x4xf32>, vector<384x4xf32> -> vector<384x4xf32>
    %39 = arith.addf %34, %38 : vector<384x4xf32>
    %40 = vector.extract_strided_slice %13 {offsets = [24, 0], sizes = [384, 4], strides = [1, 1]} : vector<432x4xf32> to vector<384x4xf32>
    %c4 = arith.constant 4 : index
    %c0_25 = arith.constant 0 : index
    %c0_26 = arith.constant 0 : index
    %41 = vector.load %arg5[%c4, %c0_25, %c0_26] : memref<9x4x4xf32, #tpu.memory_space<vmem>>, vector<1x4x4xf32>
    %42 = vector.shape_cast %41 : vector<1x4x4xf32> to vector<4x4xf32>
    %cst_27 = arith.constant dense<0.000000e+00> : vector<384x4xf32>
    %43 = tpu.matmul %40, %42, %cst_27 {dimension_numbers = #tpu.dot_dimension_numbers<[1], [0], [0], [1], [0, 0, 1, 1], [], []>} : vector<384x4xf32>, vector<4x4xf32>, vector<384x4xf32> -> vector<384x4xf32>
    %44 = arith.addf %39, %43 : vector<384x4xf32>
    %45 = vector.extract_strided_slice %18 {offsets = [24, 0], sizes = [384, 4], strides = [1, 1]} : vector<432x4xf32> to vector<384x4xf32>
    %c5 = arith.constant 5 : index
    %c0_28 = arith.constant 0 : index
    %c0_29 = arith.constant 0 : index
    %46 = vector.load %arg5[%c5, %c0_28, %c0_29] : memref<9x4x4xf32, #tpu.memory_space<vmem>>, vector<1x4x4xf32>
    %47 = vector.shape_cast %46 : vector<1x4x4xf32> to vector<4x4xf32>
    %cst_30 = arith.constant dense<0.000000e+00> : vector<384x4xf32>
    %48 = tpu.matmul %45, %47, %cst_30 {dimension_numbers = #tpu.dot_dimension_numbers<[1], [0], [0], [1], [0, 0, 1, 1], [], []>} : vector<384x4xf32>, vector<4x4xf32>, vector<384x4xf32> -> vector<384x4xf32>
    %49 = arith.addf %44, %48 : vector<384x4xf32>
    %50 = vector.extract_strided_slice %16 {offsets = [48, 0], sizes = [384, 4], strides = [1, 1]} : vector<432x4xf32> to vector<384x4xf32>
    %c6 = arith.constant 6 : index
    %c0_31 = arith.constant 0 : index
    %c0_32 = arith.constant 0 : index
    %51 = vector.load %arg5[%c6, %c0_31, %c0_32] : memref<9x4x4xf32, #tpu.memory_space<vmem>>, vector<1x4x4xf32>
    %52 = vector.shape_cast %51 : vector<1x4x4xf32> to vector<4x4xf32>
    %cst_33 = arith.constant dense<0.000000e+00> : vector<384x4xf32>
    %53 = tpu.matmul %50, %52, %cst_33 {dimension_numbers = #tpu.dot_dimension_numbers<[1], [0], [0], [1], [0, 0, 1, 1], [], []>} : vector<384x4xf32>, vector<4x4xf32>, vector<384x4xf32> -> vector<384x4xf32>
    %54 = arith.addf %49, %53 : vector<384x4xf32>
    %55 = vector.extract_strided_slice %13 {offsets = [48, 0], sizes = [384, 4], strides = [1, 1]} : vector<432x4xf32> to vector<384x4xf32>
    %c7 = arith.constant 7 : index
    %c0_34 = arith.constant 0 : index
    %c0_35 = arith.constant 0 : index
    %56 = vector.load %arg5[%c7, %c0_34, %c0_35] : memref<9x4x4xf32, #tpu.memory_space<vmem>>, vector<1x4x4xf32>
    %57 = vector.shape_cast %56 : vector<1x4x4xf32> to vector<4x4xf32>
    %cst_36 = arith.constant dense<0.000000e+00> : vector<384x4xf32>
    %58 = tpu.matmul %55, %57, %cst_36 {dimension_numbers = #tpu.dot_dimension_numbers<[1], [0], [0], [1], [0, 0, 1, 1], [], []>} : vector<384x4xf32>, vector<4x4xf32>, vector<384x4xf32> -> vector<384x4xf32>
    %59 = arith.addf %54, %58 : vector<384x4xf32>
    %60 = vector.extract_strided_slice %18 {offsets = [48, 0], sizes = [384, 4], strides = [1, 1]} : vector<432x4xf32> to vector<384x4xf32>
    %c8 = arith.constant 8 : index
    %c0_37 = arith.constant 0 : index
    %c0_38 = arith.constant 0 : index
    %61 = vector.load %arg5[%c8, %c0_37, %c0_38] : memref<9x4x4xf32, #tpu.memory_space<vmem>>, vector<1x4x4xf32>
    %62 = vector.shape_cast %61 : vector<1x4x4xf32> to vector<4x4xf32>
    %cst_39 = arith.constant dense<0.000000e+00> : vector<384x4xf32>
    %63 = tpu.matmul %60, %62, %cst_39 {dimension_numbers = #tpu.dot_dimension_numbers<[1], [0], [0], [1], [0, 0, 1, 1], [], []>} : vector<384x4xf32>, vector<4x4xf32>, vector<384x4xf32> -> vector<384x4xf32>
    %64 = arith.addf %59, %63 : vector<384x4xf32>
    %c0_40 = arith.constant 0 : index
    %c0_41 = arith.constant 0 : index
    %65 = vector.load %arg6[%c0_40, %c0_41] : memref<1x4xf32, #tpu.memory_space<vmem>>, vector<1x4xf32>
    %66 = vector.broadcast %65 : vector<1x4xf32> to vector<384x4xf32>
    %67 = arith.addf %64, %66 : vector<384x4xf32>
    %cst_42 = arith.constant 0.000000e+00 : f32
    %68 = vector.broadcast %cst_42 : f32 to vector<384x4xf32>
    %69 = arith.maximumf %67, %68 : vector<384x4xf32>
    %c0_43 = arith.constant 0 : index
    %c0_44 = arith.constant 0 : index
    %70 = vector.load %arg7[%c0_43, %c0_44] : memref<4x16xf32, #tpu.memory_space<vmem>>, vector<4x16xf32>
    %cst_45 = arith.constant dense<0.000000e+00> : vector<384x16xf32>
    %71 = tpu.matmul %69, %70, %cst_45 {dimension_numbers = #tpu.dot_dimension_numbers<[1], [0], [0], [1], [0, 0, 1, 1], [], []>} : vector<384x4xf32>, vector<4x16xf32>, vector<384x16xf32> -> vector<384x16xf32>
    %c0_46 = arith.constant 0 : index
    %c0_47 = arith.constant 0 : index
    %72 = vector.load %arg8[%c0_46, %c0_47] : memref<1x16xf32, #tpu.memory_space<vmem>>, vector<1x16xf32>
    %73 = vector.broadcast %72 : vector<1x16xf32> to vector<384x16xf32>
    %74 = arith.addf %71, %73 : vector<384x16xf32>
    %75 = vector.extract_strided_slice %3 {offsets = [24, 0], sizes = [384, 16], strides = [1, 1]} : vector<432x16xf32> to vector<384x16xf32>
    %76 = arith.addf %74, %75 : vector<384x16xf32>
    %c0_48 = arith.constant 0 : index
    %c0_49 = arith.constant 0 : index
    %c0_50 = arith.constant 0 : index
    %77 = vector.load %arg9[%c0_48, %c0_49, %c0_50] : memref<1x384x16xf32, #tpu.memory_space<vmem>>, vector<1x384x16xf32>
    %78 = vector.shape_cast %77 : vector<1x384x16xf32> to vector<384x16xf32>
    %79 = vector.shape_cast %76 : vector<384x16xf32> to vector<1x384x16xf32>
    tpu.vector_store %arg9[%c0_48, %c0_49, %c0_50], %79 {strides = array<i32>} : memref<1x384x16xf32, #tpu.memory_space<vmem>>, vector<1x384x16xf32>,
    return
  }
  func.func @transform_0(%arg0: i32) -> (i32, i32, i32) {
    %c0_i32 = arith.constant 0 : i32
    %c0_i32_0 = arith.constant 0 : i32
    %c0_i32_1 = arith.constant 0 : i32
    return %arg0, %c0_i32, %c0_i32_0 : i32, i32, i32
  }
  func.func @transform_1(%arg0: i32) -> (i32, i32) {
    %c0_i32 = arith.constant 0 : i32
    %c0_i32_0 = arith.constant 0 : i32
    %c0_i32_1 = arith.constant 0 : i32
    return %c0_i32, %c0_i32_0 : i32, i32
  }
  func.func @transform_2(%arg0: i32) -> (i32, i32) {
    %c0_i32 = arith.constant 0 : i32
    %c0_i32_0 = arith.constant 0 : i32
    %c0_i32_1 = arith.constant 0 : i32
    return %c0_i32, %c0_i32_0 : i32, i32
  }
  func.func @transform_3(%arg0: i32) -> (i32, i32) {
    %c0_i32 = arith.constant 0 : i32
    %c0_i32_0 = arith.constant 0 : i32
    %c0_i32_1 = arith.constant 0 : i32
    return %c0_i32, %c0_i32_0 : i32, i32
  }
  func.func @transform_4(%arg0: i32) -> (i32, i32, i32) {
    %c0_i32 = arith.constant 0 : i32
    %c0_i32_0 = arith.constant 0 : i32
    %c0_i32_1 = arith.constant 0 : i32
    %c0_i32_2 = arith.constant 0 : i32
    return %c0_i32, %c0_i32_0, %c0_i32_1 : i32, i32, i32
  }
  func.func @transform_5(%arg0: i32) -> (i32, i32) {
    %c0_i32 = arith.constant 0 : i32
    %c0_i32_0 = arith.constant 0 : i32
    %c0_i32_1 = arith.constant 0 : i32
    return %c0_i32, %c0_i32_0 : i32, i32
  }
  func.func @transform_6(%arg0: i32) -> (i32, i32) {
    %c0_i32 = arith.constant 0 : i32
    %c0_i32_0 = arith.constant 0 : i32
    %c0_i32_1 = arith.constant 0 : i32
    return %c0_i32, %c0_i32_0 : i32, i32
  }
  func.func @transform_7(%arg0: i32) -> (i32, i32) {
    %c0_i32 = arith.constant 0 : i32
    %c0_i32_0 = arith.constant 0 : i32
    %c0_i32_1 = arith.constant 0 : i32
    return %c0_i32, %c0_i32_0 : i32, i32
  }
  func.func @transform_8(%arg0: i32) -> (i32, i32, i32) {
    %c0_i32 = arith.constant 0 : i32
    %c0_i32_0 = arith.constant 0 : i32
    %c0_i32_1 = arith.constant 0 : i32
    return %arg0, %c0_i32, %c0_i32_0 : i32, i32, i32
  }
}

</mosaic_0001>

<bundles_post_ra>
// kernel: tpu_custom_call.1
= control target key start
LH: loop header
LB: loop body
LE: loop exit
PB: predicated region body
PF: predicated region fallthrough
CT: control target
= control target key end

     0   :  { %s8188_s27 = smov 0   ;;  %s10904_s0 = inlined_call_operand.vmem [shape: f32[2,432,16], index: 0, kind: input, shape index: {}]   ;;  %s10905_s1 = inlined_call_operand.vmem [shape: f32[432,1], index: 1, kind: input, shape index: {}]   ;;  %s10906_s2 = inlined_call_operand.vmem [shape: f32[16,4], index: 2, kind: input, shape index: {}]   ;;  %s10907_s3 = inlined_call_operand.vmem [shape: f32[1,4], index: 3, kind: input, shape index: {}]   ;;  %s10908_s4 = inlined_call_operand.vmem [shape: f32[9,4,4], index: 4, kind: input, shape index: {}]   ;;  %s10909_s5 = inlined_call_operand.vmem [shape: f32[1,4], index: 5, kind: input, shape index: {}]   ;;  %s10910_s6 = inlined_call_operand.vmem [shape: f32[4,16], index: 6, kind: input, shape index: {}]   ;;  %s10911_s7 = inlined_call_operand.vmem [shape: f32[1,16], index: 7, kind: input, shape index: {}]   ;;  %s10912_s8 = inlined_call_operand.vmem [shape: f32[2,384,16], index: 8, kind: output, shape index: {}]  }
   0x1 LB: > { %s5794_s28 = sadd.s32 4294967295, %s8140_s27   ;;  %p5798_p0 = scmp.ge.s32.totalorder %s8140_s27, 1  ;;  %s8140_s27 = sphi %s8188_s27, %s18_s27  }
   0x2   : > { %p262_p1 = scmp.lt.s32.totalorder %s8140_s27, 3 }
   0x4   : > { %p263_p2 = pnand %p5798_p0, %p262_p1 }
   0x6   : > { %266 = sbr.rel (%p263_p2) target bundleno = 1263 (0x4ef), region = 52 }
   0xd   : > { %v999_v0 = vld [vmem:[%s10905_s1 + $0xc0] sm:$0xff]  ;;  %v997_v1 = vld [vmem:[%s10905_s1 + $0xb0] sm:$0xff]  ;;  %p296_p3 = scmp.lt.s32.totalorder %s5794_s28, 1  ;;  %v8142_v2 = vmov 0   ;;  %v415_v4 = vld [vmem:[%s10906_s2 + $0x8] sm:$0xff]  ;;  %vm423_vm0 = vcmask 130048  }
   0xe   : > { %8131 = vset.pattern.permute.xlu1 %v8142_v2  ;;  %8130 = vset.pattern.permute.xlu0 %v8142_v2  ;;  %v414_v3 = vld [vmem:[%s10906_s2] sm:$0xff]  ;;  %v1000_v6 = vld [vmem:[%s10905_s1 + $0xc8] sm:$0xff]  ;;  %v998_v7 = vld [vmem:[%s10905_s1 + $0xb8] sm:$0xff]  ;;  %vm1727_vm1 = vcmask 1043456   ;;  %vm1630_vm2 = vcmask 31744   ;;  %vm1407_vm3 = vcmask 1040384  }
   0xf   : > { %1151 = vperm.xlu1 %8131, %v999_v0   ;;  %1141 = vperm.xlu0 %8130, %v997_v1   ;;  %v7729_v5 = vpack.c.bf16 %v415_v4, %v414_v3  ;;  %s11538_s28 = smov (!%p296_p3, %s5794_s28), 1  ;;  %v1002_v8 = vld [vmem:[%s10905_s1 + $0xd8] sm:$0xff]  ;;  %v1001_v14 = vld [vmem:[%s10905_s1 + $0xd0] sm:$0xff]  ;;  %v1004_v18 = vld [vmem:[%s10905_s1 + $0xe8] sm:$0xff]  ;;  %vm1517_vm4 = vcmask 1046528  }
  0x10   : > { %s8119_s19 = smul.u32 432, %s11538_s28  ;;  %v1003_v20 = vld [vmem:[%s10905_s1 + $0xe0] sm:$0xff]  ;;  %v1006_v24 = vld [vmem:[%s10905_s1 + $0xf8] sm:$0xff]  ;;  %v1005_v26 = vld [vmem:[%s10905_s1 + $0xf0] sm:$0xff] }
  0x11   : > { %7730 = vmatprep.subr.bf16.mxu0 %v7729_v5  ;;  %v1008_v30 = vld [vmem:[%s10905_s1 + $0x108] sm:$0xff]  ;;  %v1007_v32 = vld [vmem:[%s10905_s1 + $0x100] sm:$0xff]  ;;  %v1010_v36 = vld [vmem:[%s10905_s1 + $0x118] sm:$0xff]  ;;  %s8120_s15 = smul.u32 384, %s11538_s28 }
  0x12   : > { %7732 = vmatpush3.bf16.msra.mxu0 %v7729_v5  ;;  %s8220_s22 = scalar_lea.vmem %s10904_s0, %s8119_s19  ;;  %v1009_v38 = vld [vmem:[%s10905_s1 + $0x110] sm:$0xff]  ;;  %v1012_v42 = vld [vmem:[%s10905_s1 + $0x128] sm:$0xff]  ;;  %v1011_v44 = vld [vmem:[%s10905_s1 + $0x120] sm:$0xff] }
  0x13   : > { %1156 = vperm.xlu1 %8131, %v1000_v6   ;;  %1146 = vperm.xlu0 %8130, %v998_v7   ;;  %v306_v9 = vld [vmem:[%s8220_s22] sm:$0xff]  ;;  %v307_v10 = vld [vmem:[%s8220_s22 + $0x8] sm:$0xff]  ;;  %v308_v11 = vld [vmem:[%s8220_s22 + $0x10] sm:$0xff]  ;;  %s10660_s20 = scalar_lea.vmem %s10912_s8, %s8120_s15 }
  0x14   : > { %v360_v12 = vmax.f32 %v306_v9, 0.0  ;;  %v361_v13 = vmax.f32 %v307_v10, 0.0  ;;  %v362_v15 = vmax.f32 %v308_v11, 0.0  ;;  %v8232_v16 = vld [vmem:[%s8220_s22 + $0x18] sm:$0xff]  ;;  %v8235_v17 = vld [vmem:[%s8220_s22 + $0x20] sm:$0xff]  ;;  %v8249_v22 = vld [vmem:[%s8220_s22 + $0x28] sm:$0xff] }
  0x15   : > { %11155 = vst [vmem:[#allocation2_spill] sm:$0xff] %v8232_v16  ;;  %11156 = vst [vmem:[#allocation3_spill] sm:$0xff] %v8235_v17  ;;  %v10959_v19 = vmax.f32 %v8232_v16, 0.0  ;;  %v10960_v21 = vmax.f32 %v8235_v17, 0.0  ;;  %v8252_v23 = vld [vmem:[%s8220_s22 + $0x30] sm:$0xff]  ;;  %v10957_v25 = vmax.f32 %v8249_v22, 0.0 }
  0x16   : > { %6908 = vmatprep.mubr.msk.f32.mxu0 %vm423_vm0, %v360_v12  ;;  %11157 = vst [vmem:[#allocation4_spill] sm:$0xff] %v8249_v22  ;;  %11158 = vst [vmem:[#allocation5_spill] sm:$0xff] %v8252_v23  ;;  %v10958_v27 = vmax.f32 %v8252_v23, 0.0  ;;  %v8269_v28 = vld [vmem:[%s8220_s22 + $0x38] sm:$0xff]  ;;  %v8272_v29 = vld [vmem:[%s8220_s22 + $0x40] sm:$0xff] }
  0x17   : > { %1166 = vperm.xlu1 %8131, %v1002_v8   ;;  %6909 = vmatmul.mubr.msk.f32.vlgmr.msra.gmra.mrb[0].mxu0 %vm423_vm0, %v361_v13  ;;  %11159 = vst [vmem:[#allocation6_spill] sm:$0xff] %v8269_v28  ;;  %11160 = vst [vmem:[#allocation7_spill] sm:$0xff] %v8272_v29  ;;  %v10953_v31 = vmax.f32 %v8269_v28, 0.0  ;;  %v10956_v33 = vmax.f32 %v8272_v29, 0.0  ;;  %v8289_v34 = vld [vmem:[%s8220_s22 + $0x48] sm:$0xff]  ;;  %v8292_v35 = vld [vmem:[%s8220_s22 + $0x50] sm:$0xff] }
  0x18   : > { %1161 = vperm.xlu0 %8130, %v1001_v14   ;;  %6911 = vmatprep.mubr.msk.f32.mxu0 %vm423_vm0, %v362_v15  ;;  %11161 = vst [vmem:[#allocation8_spill] sm:$0xff] %v8289_v34  ;;  %11162 = vst [vmem:[#allocation9_spill] sm:$0xff] %v8292_v35  ;;  %v10949_v37 = vmax.f32 %v8289_v34, 0.0  ;;  %v10952_v39 = vmax.f32 %v8292_v35, 0.0  ;;  %v8309_v40 = vld [vmem:[%s8220_s22 + $0x58] sm:$0xff]  ;;  %v8312_v41 = vld [vmem:[%s8220_s22 + $0x60] sm:$0xff] }
  0x19   : > { %11163 = vst [vmem:[#allocation10_spill] sm:$0xff] %v8309_v40  ;;  %11164 = vst [vmem:[#allocation11_spill] sm:$0xff] %v8312_v41  ;;  %v10947_v43 = vmax.f32 %v8309_v40, 0.0  ;;  %v10948_v45 = vmax.f32 %v8312_v41, 0.0  ;;  %v8329_v46 = vld [vmem:[%s8220_s22 + $0x68] sm:$0xff]  ;;  %v8332_v47 = vld [vmem:[%s8220_s22 + $0x70] sm:$0xff] }
  0x1a   : > { %11165 = vst [vmem:[#allocation12_spill] sm:$0xff] %v8329_v46  ;;  %11166 = vst [vmem:[#allocation13_spill] sm:$0xff] %v8332_v47  ;;  %v1014_v48 = vld [vmem:[%s10905_s1 + $0x138] sm:$0xff]  ;;  %v10943_v49 = vmax.f32 %v8329_v46, 0.0  ;;  %v1013_v50 = vld [vmem:[%s10905_s1 + $0x130] sm:$0xff]  ;;  %v10945_v51 = vmax.f32 %v8332_v47, 0.0 }
  0x1b   : > { %1176 = vperm.xlu1 %8131, %v1004_v18   ;;  %6912 = vmatmul.mubr.msk.f32.gmra.mrb[2].mxu0 %vm423_vm0, %v10959_v19  ;;  %v8349_v52 = vld [vmem:[%s8220_s22 + $0x78] sm:$0xff]  ;;  %v8352_v53 = vld [vmem:[%s8220_s22 + $0x80] sm:$0xff]  ;;  %v1016_v54 = vld [vmem:[%s10905_s1 + $0x148] sm:$0xff] }
  0x1c   : > { %1171 = vperm.xlu0 %8130, %v1003_v20   ;;  %6914 = vmatprep.mubr.msk.f32.mxu0 %vm423_vm0, %v10960_v21  ;;  %11167 = vst [vmem:[#allocation14_spill] sm:$0xff] %v8349_v52  ;;  %11168 = vst [vmem:[#allocation15_spill] sm:$0xff] %v8352_v53  ;;  %v10939_v55 = vmax.f32 %v8349_v52, 0.0  ;;  %v1015_v56 = vld [vmem:[%s10905_s1 + $0x140] sm:$0xff]  ;;  %v10941_v57 = vmax.f32 %v8352_v53, 0.0  ;;  %v8369_v58 = vld [vmem:[%s8220_s22 + $0x88] sm:$0xff] }
  0x1d   : > { %11169 = vst [vmem:[#allocation16_spill] sm:$0xff] %v8369_v58  ;;  %v8372_v59 = vld [vmem:[%s8220_s22 + $0x90] sm:$0xff]  ;;  %v1018_v60 = vld [vmem:[%s10905_s1 + $0x158] sm:$0xff]  ;;  %v10935_v61 = vmax.f32 %v8369_v58, 0.0  ;;  %v8392_v1 = vld [vmem:[%s8220_s22 + $0xa0] sm:$0xff] }
  0x1e   : > { %11170 = vst [vmem:[#allocation17_spill] sm:$0xff] %v8372_v59  ;;  %v1017_v62 = vld [vmem:[%s10905_s1 + $0x150] sm:$0xff]  ;;  %v10938_v63 = vmax.f32 %v8372_v59, 0.0  ;;  %v8389_v0 = vld [vmem:[%s8220_s22 + $0x98] sm:$0xff]  ;;  %11172 = vst [vmem:[#allocation19_spill] sm:$0xff] %v8392_v1  ;;  %v10934_v5 = vmax.f32 %v8392_v1, 0.0 }
  0x1f   : > { %1186 = vperm.xlu1 %8131, %v1006_v24   ;;  %6915 = vmatmul.mubr.msk.f32.gmra.mrb[4].mxu0 %vm423_vm0, %v10957_v25  ;;  %11171 = vst [vmem:[#allocation18_spill] sm:$0xff] %v8389_v0  ;;  %v1020_v2 = vld [vmem:[%s10905_s1 + $0x168] sm:$0xff]  ;;  %v10931_v3 = vmax.f32 %v8389_v0, 0.0  ;;  %v1019_v4 = vld [vmem:[%s10905_s1 + $0x160] sm:$0xff]  ;;  %v8412_v7 = vld [vmem:[%s8220_s22 + $0xb0] sm:$0xff] }
  0x20   : > { %1181 = vperm.xlu0 %8130, %v1005_v26   ;;  %6917 = vmatprep.mubr.msk.f32.mxu0 %vm423_vm0, %v10958_v27  ;;  %v8409_v6 = vld [vmem:[%s8220_s22 + $0xa8] sm:$0xff]  ;;  %11174 = vst [vmem:[#allocation21_spill] sm:$0xff] %v8412_v7  ;;  %v1022_v8 = vld [vmem:[%s10905_s1 + $0x178] sm:$0xff]  ;;  %v1021_v10 = vld [vmem:[%s10905_s1 + $0x170] sm:$0xff]  ;;  %v10930_v11 = vmax.f32 %v8412_v7, 0.0 }
  0x21   : > { %11173 = vst [vmem:[#allocation20_spill] sm:$0xff] %v8409_v6  ;;  %v10927_v9 = vmax.f32 %v8409_v6, 0.0  ;;  %v8429_v12 = vld [vmem:[%s8220_s22 + $0xb8] sm:$0xff]  ;;  %v8432_v13 = vld [vmem:[%s8220_s22 + $0xc0] sm:$0xff]  ;;  %v1024_v14 = vld [vmem:[%s10905_s1 + $0x188] sm:$0xff] }
  0x22   : > { %11175 = vst [vmem:[#allocation22_spill] sm:$0xff] %v8429_v12  ;;  %11176 = vst [vmem:[#allocation23_spill] sm:$0xff] %v8432_v13  ;;  %v10923_v15 = vmax.f32 %v8429_v12, 0.0  ;;  %v1023_v18 = vld [vmem:[%s10905_s1 + $0x180] sm:$0xff]  ;;  %v10926_v20 = vmax.f32 %v8432_v13, 0.0  ;;  %v8449_v24 = vld [vmem:[%s8220_s22 + $0xc8] sm:$0xff] }
  0x23   : > { %1196 = vperm.xlu1 %8131, %v1008_v30   ;;  %6918 = vmatmul.mubr.msk.f32.gmra.mrb[6].mxu0 %vm423_vm0, %v10953_v31  ;;  %11177 = vst [vmem:[#allocation24_spill] sm:$0xff] %v8449_v24  ;;  %v8452_v26 = vld [vmem:[%s8220_s22 + $0xd0] sm:$0xff]  ;;  %v978_v30 = vld [vmem:[%s10905_s1 + $0x18] sm:$0xff]  ;;  %v8752_v25 = vld [vmem:[%s10908_s4 + $0xc] sm:$0xf] }
  0x24   : > { %1191 = vperm.xlu0 %8130, %v1007_v32   ;;  %6920 = vmatprep.mubr.msk.f32.mxu0 %vm423_vm0, %v10956_v33  ;;  %11178 = vst [vmem:[#allocation25_spill] sm:$0xff] %v8452_v26  ;;  %v10919_v32 = vmax.f32 %v8449_v24, 0.0  ;;  %11203 = vst [vmem:[#allocation50_spill] sm:$0xff] %v8752_v25  ;;  %v8765_v21 = vld [vmem:[%s10908_s4 + $0x10] sm:$0xf] }
  0x25   : > { %7733 = vmatprep.subr.msk.mxu1 %vm1727_vm1, %v8752_v25  ;;  %v8838_v59 = vld [vmem:[%s10907_s3] ss:$0 sm:$0xff] }
  0x26   : > { %7734 = vmatpush3.msk.msra.mxu1 %vm1727_vm1, %v8752_v25 }
  0x27   : > { %1206 = vperm.xlu1 %8131, %v1010_v36   ;;  %6921 = vmatmul.mubr.msk.f32.gmra.mrb[8].mxu0 %vm423_vm0, %v10949_v37  ;;  %v1025_v36 = vld [vmem:[%s10905_s1 + $0x190] sm:$0xff]  ;;  %v358_v37 = vld [vmem:[%s8220_s22 + $0x1a0] sm:$0xff] }
  0x28   : > { %1201 = vperm.xlu0 %8130, %v1009_v38   ;;  %6923 = vmatprep.mubr.msk.f32.mxu0 %vm423_vm0, %v10952_v39  ;;  %v10922_v38 = vmax.f32 %v8452_v26, 0.0 }
  0x29   : > { %7285 = vmatprep.subr.msk.mxu1 %vm1727_vm1, %v8765_v21 }
  0x2b   : > { %1216 = vperm.xlu1 %8131, %v1012_v42   ;;  %6924 = vmatmul.mubr.msk.f32.gmra.mrb[10].mxu0 %vm423_vm0, %v10947_v43  ;;  %v8469_v42 = vld [vmem:[%s8220_s22 + $0xd8] sm:$0xff]  ;;  %v1028_v43 = vld [vmem:[%s10905_s1 + $0x1a8] sm:$0xff] }
  0x2c   : > { %1211 = vperm.xlu0 %8130, %v1011_v44   ;;  %6926 = vmatprep.mubr.msk.f32.mxu0 %vm423_vm0, %v10948_v45  ;;  %11179 = vst [vmem:[#allocation26_spill] sm:$0xff] %v8469_v42  ;;  %v8472_v44 = vld [vmem:[%s8220_s22 + $0xe0] sm:$0xff]  ;;  %v357_v45 = vld [vmem:[%s8220_s22 + $0x198] sm:$0xff] }
  0x2d   : > { %11180 = vst [vmem:[#allocation27_spill] sm:$0xff] %v8472_v44 }
  0x2f   : > { %1226 = vperm.xlu1 %8131, %v1014_v48   ;;  %6927 = vmatmul.mubr.msk.f32.gmra.mrb[12].mxu0 %vm423_vm0, %v10943_v49  ;;  %v980_v48 = vld [vmem:[%s10905_s1 + $0x28] sm:$0xff] }
  0x30   : > { %1221 = vperm.xlu0 %8130, %v1013_v50   ;;  %6929 = vmatprep.mubr.msk.f32.mxu0 %vm423_vm0, %v10945_v51  ;;  %v10915_v50 = vmax.f32 %v8469_v42, 0.0  ;;  %v8695_v51 = vld [vmem:[%s8220_s22 + $0x190] sm:$0xff] }
  0x31   : > { %11202 = vst [vmem:[#allocation49_spill] sm:$0xff] %v8695_v51 }
  0x33   : > { %1236 = vperm.xlu1 %8131, %v1016_v54   ;;  %6930 = vmatmul.mubr.msk.f32.gmra.mrb[14].mxu0 %vm423_vm0, %v10939_v55  ;;  %v979_v54 = vld [vmem:[%s10905_s1 + $0x20] sm:$0xff] }
  0x34   : > { %1231 = vperm.xlu0 %8130, %v1015_v56   ;;  %6932 = vmatprep.mubr.msk.f32.mxu0 %vm423_vm0, %v10941_v57  ;;  %v10918_v56 = vmax.f32 %v8472_v44, 0.0 }
  0x37   : > { %1246 = vperm.xlu1 %8131, %v1018_v60   ;;  %6933 = vmatmul.mubr.msk.f32.gmra.mrb[16].mxu0 %vm423_vm0, %v10935_v61  ;;  %v8489_v60 = vld [vmem:[%s8220_s22 + $0xe8] sm:$0xff] }
  0x38   : > { %1241 = vperm.xlu0 %8130, %v1017_v62   ;;  %6935 = vmatprep.mubr.msk.f32.mxu0 %vm423_vm0, %v10938_v63  ;;  %11181 = vst [vmem:[#allocation28_spill] sm:$0xff] %v8489_v60  ;;  %v8492_v62 = vld [vmem:[%s8220_s22 + $0xf0] sm:$0xff] }
  0x39   : > { %11182 = vst [vmem:[#allocation29_spill] sm:$0xff] %v8492_v62 }
  0x3b   : > { %1256 = vperm.xlu1 %8131, %v1020_v2   ;;  %6936 = vmatmul.mubr.msk.f32.gmra.mrb[18].mxu0 %vm423_vm0, %v10931_v3  ;;  %v982_v2 = vld [vmem:[%s10905_s1 + $0x38] sm:$0xff] }
  0x3c   : > { %1251 = vperm.xlu0 %8130, %v1019_v4   ;;  %6938 = vmatprep.mubr.msk.f32.mxu0 %vm423_vm0, %v10934_v5  ;;  %v10913_v4 = vmax.f32 %v8489_v60, 0.0 }
  0x3f   : > { %1266 = vperm.xlu1 %8131, %v1022_v8   ;;  %6939 = vmatmul.mubr.msk.f32.gmra.mrb[20].mxu0 %vm423_vm0, %v10927_v9  ;;  %v981_v8 = vld [vmem:[%s10905_s1 + $0x30] sm:$0xff] }
  0x40   : > { %1261 = vperm.xlu0 %8130, %v1021_v10   ;;  %6941 = vmatprep.mubr.msk.f32.mxu0 %vm423_vm0, %v10930_v11  ;;  %v10914_v10 = vmax.f32 %v8492_v62, 0.0  ;;  %v1627_v62 = vld [vmem:[%s10908_s4] sm:$0xf] }
  0x43   : > { %1276 = vperm.xlu1 %8131, %v1024_v14   ;;  %6942 = vmatmul.mubr.msk.f32.gmra.mrb[22].mxu0 %vm423_vm0, %v10923_v15  ;;  %v8509_v14 = vld [vmem:[%s8220_s22 + $0xf8] sm:$0xff] }
  0x44   : > { %1271 = vperm.xlu0 %8130, %v1023_v18   ;;  %6944 = vmatprep.mubr.msk.f32.mxu0 %vm423_vm0, %v10926_v20  ;;  %11183 = vst [vmem:[#allocation30_spill] sm:$0xff] %v8509_v14  ;;  %v8512_v18 = vld [vmem:[%s8220_s22 + $0x100] sm:$0xff] }
  0x45   : > { %11184 = vst [vmem:[#allocation31_spill] sm:$0xff] %v8512_v18 }
  0x47   : > { %1046 = vperm.xlu1 %8131, %v978_v30   ;;  %6945 = vmatmul.mubr.msk.f32.gmra.mrb[24].mxu0 %vm423_vm0, %v10919_v32  ;;  %v984_v30 = vld [vmem:[%s10905_s1 + $0x48] sm:$0xff] }
  0x48   : > { %1281 = vperm.xlu0 %8130, %v1025_v36   ;;  %6947 = vmatprep.mubr.msk.f32.mxu0 %vm423_vm0, %v10922_v38  ;;  %v10916_v36 = vmax.f32 %v8509_v14, 0.0 }
  0x4b   : > { %1056 = vperm.xlu1 %8131, %v980_v48   ;;  %6948 = vmatmul.mubr.msk.f32.gmra.mrb[26].mxu0 %vm423_vm0, %v10915_v50  ;;  %v983_v48 = vld [vmem:[%s10905_s1 + $0x40] sm:$0xff] }
  0x4c   : > { %1051 = vperm.xlu0 %8130, %v979_v54   ;;  %6950 = vmatprep.mubr.msk.f32.mxu0 %vm423_vm0, %v10918_v56  ;;  %v10917_v54 = vmax.f32 %v8512_v18, 0.0 }
  0x4f   : > { %1066 = vperm.xlu1 %8131, %v982_v2   ;;  %6951 = vmatmul.mubr.msk.f32.gmra.mrb[28].mxu0 %vm423_vm0, %v10913_v4  ;;  %v8529_v2 = vld [vmem:[%s8220_s22 + $0x108] sm:$0xff]  ;;  %v986_v4 = vld [vmem:[%s10905_s1 + $0x58] sm:$0xff] }
  0x50   : > { %1061 = vperm.xlu0 %8130, %v981_v8   ;;  %6953 = vmatprep.mubr.msk.f32.mxu0 %vm423_vm0, %v10914_v10  ;;  %11185 = vst [vmem:[#allocation32_spill] sm:$0xff] %v8529_v2  ;;  %v8532_v8 = vld [vmem:[%s8220_s22 + $0x110] sm:$0xff]  ;;  %v10920_v10 = vmax.f32 %v8529_v2, 0.0 }
  0x51   : > { %11186 = vst [vmem:[#allocation33_spill] sm:$0xff] %v8532_v8  ;;  %v10921_v50 = vmax.f32 %v8532_v8, 0.0 }
  0x53   : > { %1076 = vperm.xlu1 %8131, %v984_v30   ;;  %6954 = vmatmul.mubr.msk.f32.gmra.mrb[30].mxu0 %vm423_vm0, %v10916_v36  ;;  %v985_v30 = vld [vmem:[%s10905_s1 + $0x50] sm:$0xff]  ;;  %v8549_v36 = vld [vmem:[%s8220_s22 + $0x118] sm:$0xff] }
  0x54   : > { %1071 = vperm.xlu0 %8130, %v983_v48   ;;  %6956 = vmatprep.mubr.msk.f32.mxu0 %vm423_vm0, %v10917_v54  ;;  %11187 = vst [vmem:[#allocation34_spill] sm:$0xff] %v8549_v36  ;;  %v8552_v48 = vld [vmem:[%s8220_s22 + $0x120] sm:$0xff]  ;;  %v988_v54 = vld [vmem:[%s10905_s1 + $0x68] sm:$0xff]  ;;  %v10924_v56 = vmax.f32 %v8549_v36, 0.0 }
  0x55   : > { %11188 = vst [vmem:[#allocation35_spill] sm:$0xff] %v8552_v48  ;;  %v10925_v32 = vmax.f32 %v8552_v48, 0.0 }
  0x57   : > { %1086 = vperm.xlu1 %8131, %v986_v4   ;;  %6957 = vmatmul.mubr.msk.f32.gmra.mrb[32].mxu0 %vm423_vm0, %v10920_v10  ;;  %v987_v4 = vld [vmem:[%s10905_s1 + $0x60] sm:$0xff]  ;;  %v8569_v10 = vld [vmem:[%s8220_s22 + $0x128] sm:$0xff] }
  0x58   : > { %1081 = vperm.xlu0 %8130, %v985_v30   ;;  %6959 = vmatprep.mubr.msk.f32.mxu0 %vm423_vm0, %v10921_v50  ;;  %11189 = vst [vmem:[#allocation36_spill] sm:$0xff] %v8569_v10  ;;  %v8572_v30 = vld [vmem:[%s8220_s22 + $0x130] sm:$0xff]  ;;  %v990_v50 = vld [vmem:[%s10905_s1 + $0x78] sm:$0xff]  ;;  %v10928_v38 = vmax.f32 %v8569_v10, 0.0 }
  0x59   : > { %11190 = vst [vmem:[#allocation37_spill] sm:$0xff] %v8572_v30  ;;  %v10929_v15 = vmax.f32 %v8572_v30, 0.0 }
  0x5b   : > { %1096 = vperm.xlu1 %8131, %v988_v54   ;;  %6960 = vmatmul.mubr.msk.f32.gmra.mrb[34].mxu0 %vm423_vm0, %v10924_v56  ;;  %v989_v54 = vld [vmem:[%s10905_s1 + $0x70] sm:$0xff]  ;;  %v8589_v56 = vld [vmem:[%s8220_s22 + $0x138] sm:$0xff] }
  0x5c   : > { %1091 = vperm.xlu0 %8130, %v987_v4   ;;  %6962 = vmatprep.mubr.msk.f32.mxu0 %vm423_vm0, %v10925_v32  ;;  %11191 = vst [vmem:[#allocation38_spill] sm:$0xff] %v8589_v56  ;;  %v8592_v4 = vld [vmem:[%s8220_s22 + $0x140] sm:$0xff]  ;;  %v992_v32 = vld [vmem:[%s10905_s1 + $0x88] sm:$0xff]  ;;  %v10932_v20 = vmax.f32 %v8589_v56, 0.0 }
  0x5d   : > { %11192 = vst [vmem:[#allocation39_spill] sm:$0xff] %v8592_v4  ;;  %v10933_v9 = vmax.f32 %v8592_v4, 0.0 }
  0x5f   : > { %1106 = vperm.xlu1 %8131, %v990_v50   ;;  %6963 = vmatmul.mubr.msk.f32.gmra.mrb[36].mxu0 %vm423_vm0, %v10928_v38  ;;  %v991_v50 = vld [vmem:[%s10905_s1 + $0x80] sm:$0xff]  ;;  %v8609_v38 = vld [vmem:[%s8220_s22 + $0x148] sm:$0xff] }
  0x60   : > { %1101 = vperm.xlu0 %8130, %v989_v54   ;;  %6965 = vmatprep.mubr.msk.f32.mxu0 %vm423_vm0, %v10929_v15  ;;  %11193 = vst [vmem:[#allocation40_spill] sm:$0xff] %v8609_v38  ;;  %v8612_v54 = vld [vmem:[%s8220_s22 + $0x150] sm:$0xff]  ;;  %v994_v15 = vld [vmem:[%s10905_s1 + $0x98] sm:$0xff]  ;;  %v10936_v11 = vmax.f32 %v8609_v38, 0.0 }
  0x61   : > { %11194 = vst [vmem:[#allocation41_spill] sm:$0xff] %v8612_v54  ;;  %v10937_v3 = vmax.f32 %v8612_v54, 0.0 }
  0x63   : > { %1116 = vperm.xlu1 %8131, %v992_v32   ;;  %6966 = vmatmul.mubr.msk.f32.gmra.mrb[38].mxu0 %vm423_vm0, %v10932_v20  ;;  %v993_v32 = vld [vmem:[%s10905_s1 + $0x90] sm:$0xff]  ;;  %v8629_v20 = vld [vmem:[%s8220_s22 + $0x158] sm:$0xff] }
  0x64   : > { %1111 = vperm.xlu0 %8130, %v991_v50   ;;  %6968 = vmatprep.mubr.msk.f32.mxu0 %vm423_vm0, %v10933_v9  ;;  %11195 = vst [vmem:[#allocation42_spill] sm:$0xff] %v8629_v20  ;;  %v8632_v50 = vld [vmem:[%s8220_s22 + $0x160] sm:$0xff]  ;;  %v996_v9 = vld [vmem:[%s10905_s1 + $0xa8] sm:$0xff]  ;;  %v10940_v5 = vmax.f32 %v8629_v20, 0.0 }
  0x65   : > { %11196 = vst [vmem:[#allocation43_spill] sm:$0xff] %v8632_v50  ;;  %v10942_v61 = vmax.f32 %v8632_v50, 0.0 }
  0x67   : > { %1126 = vperm.xlu1 %8131, %v994_v15   ;;  %6969 = vmatmul.mubr.msk.f32.gmra.mrb[40].mxu0 %vm423_vm0, %v10936_v11  ;;  %v995_v15 = vld [vmem:[%s10905_s1 + $0xa0] sm:$0xff]  ;;  %v8649_v11 = vld [vmem:[%s8220_s22 + $0x168] sm:$0xff] }
  0x68   : > { %1121 = vperm.xlu0 %8130, %v993_v32   ;;  %6971 = vmatprep.mubr.msk.f32.mxu0 %vm423_vm0, %v10937_v3  ;;  %11197 = vst [vmem:[#allocation44_spill] sm:$0xff] %v8649_v11  ;;  %v8652_v32 = vld [vmem:[%s8220_s22 + $0x170] sm:$0xff]  ;;  %v976_v3 = vld [vmem:[%s10905_s1 + $0x8] sm:$0xff]  ;;  %v10944_v63 = vmax.f32 %v8649_v11, 0.0 }
  0x69   : > { %11198 = vst [vmem:[#allocation45_spill] sm:$0xff] %v8652_v32  ;;  %v10946_v55 = vmax.f32 %v8652_v32, 0.0 }
  0x6b   : > { %1136 = vperm.xlu1 %8131, %v996_v9   ;;  %6972 = vmatmul.mubr.msk.f32.gmra.mrb[42].mxu0 %vm423_vm0, %v10940_v5  ;;  %v975_v9 = vld [vmem:[%s10905_s1] sm:$0xff]  ;;  %v8669_v5 = vld [vmem:[%s8220_s22 + $0x178] sm:$0xff] }
  0x6c   : > { %1131 = vperm.xlu0 %8130, %v995_v15   ;;  %6974 = vmatprep.mubr.msk.f32.mxu0 %vm423_vm0, %v10942_v61  ;;  %11199 = vst [vmem:[#allocation46_spill] sm:$0xff] %v8669_v5  ;;  %v8672_v15 = vld [vmem:[%s8220_s22 + $0x180] sm:$0xff]  ;;  %v10950_v57 = vmax.f32 %v8669_v5, 0.0  ;;  %v1026_v61 = vld [vmem:[%s10905_s1 + $0x198] sm:$0xff] }
  0x6d   : > { %11200 = vst [vmem:[#allocation47_spill] sm:$0xff] %v8672_v15  ;;  %v10951_v49 = vmax.f32 %v8672_v15, 0.0 }
  0x6f   : > { %1036 = vperm.xlu1 %8131, %v976_v3   ;;  %6975 = vmatmul.mubr.msk.f32.gmra.mrb[44].mxu0 %vm423_vm0, %v10944_v63  ;;  %v977_v3 = vld [vmem:[%s10905_s1 + $0x10] sm:$0xff]  ;;  %v8689_v63 = vld [vmem:[%s8220_s22 + $0x188] sm:$0xff] }
  0x70   : > { %1031 = vperm.xlu0 %8130, %v975_v9   ;;  %6977 = vmatprep.mubr.msk.f32.mxu0 %vm423_vm0, %v10946_v55  ;;  %11201 = vst [vmem:[#allocation48_spill] sm:$0xff] %v8689_v63  ;;  %v5856_v9 = vld [vmem:[%s10908_s4 + $0x4] sm:$0xf]  ;;  %v10954_v55 = vmax.f32 %v8689_v63, 0.0 }
  0x71   : > { %6989 = vmatprep.subr.msk.mxu0 %vm1727_vm1, %v5856_v9 }
  0x72   : > { %6990 = vmatpush3.msk.msra.mxu0 %vm1727_vm1, %v5856_v9  ;;  %v1027_v9 = vld [vmem:[%s10905_s1 + $0x1a0] sm:$0xff] }
  0x73   : > { %1286 = vperm.xlu1 %8131, %v1026_v61   ;;  %6978 = vmatmul.mubr.msk.f32.gmra.mrb[46].mxu0 %vm423_vm0, %v10950_v57  ;;  %v10955_v61 = vmax.f32 %v8695_v51, 0.0  ;;  %v412_v57 = vmax.f32 %v358_v37, 0.0 }
  0x74   : > { %1041 = vperm.xlu0 %8130, %v977_v3   ;;  %6980 = vmatprep.mubr.msk.f32.mxu0 %vm423_vm0, %v10951_v49  ;;  %v411_v3 = vmax.f32 %v357_v45, 0.0  ;;  %v359_v49 = vld [vmem:[%s8220_s22 + $0x1a8] sm:$0xff] }
  0x75   : > { %v413_v39 = vmax.f32 %v359_v49, 0.0  ;;  %7063 = vmatprep.subr.msk.mxu0 %vm1727_vm1, %v1627_v62 }
  0x77   : > { %1296 = vperm.xlu1 %8131, %v1028_v43   ;;  %6981 = vmatmul.mubr.msk.f32.gmra.mrb[48].mxu0 %vm423_vm0, %v10954_v55 }
  0x78   : > { %1291 = vperm.xlu0 %8130, %v1027_v9   ;;  %6983 = vmatprep.mubr.msk.f32.mxu0 %vm423_vm0, %v10955_v61 }
  0x7b   : > { %6984 = vmatmul.mubr.msk.f32.gmra.mrb[50].mxu0 %vm423_vm0, %v411_v3 }
  0x7c   : > { %6986 = vmatprep.mubr.msk.f32.mxu0 %vm423_vm0, %v412_v57 }
  0x7f   : > { %6987 = vmatmul.mubr.msk.f32.gmra.mrb[52].mxu0 %vm423_vm0, %v413_v39 }
  0x8e   : > { %v8725_v43 = vpop.permute.xlu1 %1151  ;;  %v8727_v31 = vpop.permute.xlu0 %1141 }
  0x92   : > { %v8729_v55 = vpop.permute.xlu1 %1156  ;;  %v8731_v45 = vpop.permute.xlu0 %1146 }
  0x96   : > { %v8733_v9 = vpop.permute.xlu1 %1166 }
  0x97   : > { %v8735_v61 = vpop.permute.xlu0 %1161 }
  0x9a   : > { %v8737_v37 = vpop.permute.xlu1 %1176 }
  0x9b   : > { %v8739_v3 = vpop.permute.xlu0 %1171 }
  0x9e   : > { %v8741_v49 = vpop.permute.xlu1 %1186 }
  0x9f   : > { %v8743_v57 = vpop.permute.xlu0 %1181 }
  0xa2   : > { %v8745_v39 = vpop.permute.xlu1 %1196 }
  0xa3   : > { %v8747_v33 = vpop.permute.xlu0 %1191 }
  0xa6   : > { %v8758_v27 = vpop.permute.xlu1 %1206 }
  0xa7   : > { %v8760_v19 = vpop.permute.xlu0 %1201 }
  0xaa   : > { %v8767_v63 = vpop.permute.xlu1 %1216 }
  0xab   : > { %v8771_v51 = vpop.permute.xlu0 %1211 }
  0xae   : > { %v8773_v5 = vpop.permute.xlu1 %1226 }
  0xaf   : > { %v8775_v15 = vpop.permute.xlu0 %1221 }
  0xb2   : > { %v8777_v11 = vpop.permute.xlu1 %1236 }
  0xb3   : > { %v8779_v32 = vpop.permute.xlu0 %1231 }
  0xb6   : > { %v8781_v20 = vpop.permute.xlu1 %1246 }
  0xb7   : > { %v8783_v50 = vpop.permute.xlu0 %1241 }
  0xba   : > { %v8785_v38 = vpop.permute.xlu1 %1256 }
  0xbb   : > { %v8787_v54 = vpop.permute.xlu0 %1251 }
  0xbe   : > { %v8789_v56 = vpop.permute.xlu1 %1266 }
  0xbf   : > { %11204 = vst [vmem:[#allocation51_spill] sm:$0xff] %v8789_v56  ;;  %v8791_v4 = vpop.permute.xlu0 %1261 }
  0xc0   : > { %11205 = vst [vmem:[#allocation52_spill] sm:$0xff] %v8791_v4 }
  0xc2   : > { %v8793_v10 = vpop.permute.xlu1 %1276 }
  0xc3   : > { %11206 = vst [vmem:[#allocation53_spill] sm:$0xff] %v8793_v10  ;;  %v8795_v30 = vpop.permute.xlu0 %1271 }
  0xc4   : > { %11207 = vst [vmem:[#allocation54_spill] sm:$0xff] %v8795_v30 }
  0xc6   : > { %v1047_v36 = vpop.permute.xlu1 %1046 }
  0xc7   : > { %v8797_v48 = vpop.permute.xlu0 %1281 }
  0xc8   : > { %11208 = vst [vmem:[#allocation55_spill] sm:$0xff] %v8797_v48 }
  0xca   : > { %v8799_v2 = vpop.permute.xlu1 %1056 }
  0xcb   : > { %v8801_v8 = vpop.permute.xlu0 %1051 }
  0xce   : > { %v8803_v14 = vpop.permute.xlu1 %1066 }
  0xcf   : > { %v8805_v18 = vpop.permute.xlu0 %1061 }
  0xd2   : > { %v8807_v60 = vpop.permute.xlu1 %1076 }
  0xd3   : > { %v8812_v42 = vpop.permute.xlu0 %1071 }
  0xd6   : > { %v8815_v44 = vpop.permute.xlu1 %1086 }
  0xd7   : > { %v8817_v24 = vpop.permute.xlu0 %1081 }
  0xda   : > { %v8819_v26 = vpop.permute.xlu1 %1096 }
  0xdb   : > { %v8821_v12 = vpop.permute.xlu0 %1091 }
  0xde   : > { %v8823_v13 = vpop.permute.xlu1 %1106 }
  0xdf   : > { %v8825_v6 = vpop.permute.xlu0 %1101 }
  0xe2   : > { %v8827_v7 = vpop.permute.xlu1 %1116 }
  0xe3   : > { %v8829_v0 = vpop.permute.xlu0 %1111 }
  0xe6   : > { %v8831_v1 = vpop.permute.xlu1 %1126 }
  0xe7   : > { %v8833_v58 = vpop.permute.xlu0 %1121 }
  0xea   : > { %v8840_v52 = vpop.permute.xlu1 %1136  ;;  %v6910_v53 = vpop.f32.mrb[0].mxu0 }
  0xeb   : > { %v8842_v46 = vpop.permute.xlu0 %1131  ;;  %v658_v47 = vadd.f32 %v6910_v53, %v8838_v59  ;;  %v652_v40 = vpop.f32.mrb[1].mxu0 }
  0xec   : > { %v653_v41 = vadd.f32 %v8838_v59, %v652_v40 }
  0xed   : > { %v922_v34 = vmax.f32 %v658_v47, 0.0 }
  0xee   : > { %v1037_v35 = vpop.permute.xlu1 %1036  ;;  %v921_v28 = vmax.f32 %v653_v41, 0.0  ;;  %v6913_v29 = vpop.f32.mrb[2].mxu0 }
  0xef   : > { %v1032_v22 = vpop.permute.xlu0 %1031  ;;  %v1300_v23 = vmul.f32 %v1037_v35, %v922_v34  ;;  %v668_v16 = vadd.f32 %v6913_v29, %v8838_v59  ;;  %v662_v17 = vpop.f32.mrb[3].mxu0 }
  0xf0   : > { %v8847_v25 = vmul.f32 %v1032_v22, %v921_v28  ;;  %v663_v48 = vadd.f32 %v8838_v59, %v662_v17 }
  0xf1   : > { %v1409_v30 = vrot.slane %v1300_v23, 7  ;;  %v1519_v10 = vrot.slane %v1300_v23, 1  ;;  %v924_v53 = vmax.f32 %v668_v16, 0.0 }
  0xf2   : > { %v11010_v40 = vrot.slane %v8847_v25, 7  ;;  %v1518_v47 = vrot.slane %v8847_v25, 1  ;;  %v923_v41 = vmax.f32 %v663_v48, 0.0  ;;  %v6916_v4 = vpop.f32.mrb[4].mxu0  ;;  %6991 = vmatprep.mubr.msk.f32.mxu0 %vm1630_vm2, %v8847_v25 }
  0xf3   : > { %v1042_v29 = vpop.permute.xlu0 %1041  ;;  %v678_v22 = vadd.f32 %v6916_v4, %v8838_v59  ;;  %v672_v28 = vpop.f32.mrb[5].mxu0  ;;  %6992 = vmatmul.mubr.msk.f32.vlgmr.msra.gmra.mrb[54].mxu0 %vm1630_vm2, %v1300_v23  ;;  %v8865_v35 = vmul.f32 %v1047_v36, %v924_v53 }
  0xf4   : > { %v8856_v17 = vmul.f32 %v1042_v29, %v923_v41  ;;  %v673_v16 = vadd.f32 %v8838_v59, %v672_v28  ;;  %7064 = vmatpush3.msk.msra.mxu0 %vm1727_vm1, %v1627_v62  ;;  %v8863_v34 = vsel %vm1407_vm3, %v11010_v40, %v1409_v30  ;;  %v8868_v56 = vsel %vm1517_vm4, %v1518_v47, %v1519_v10 }
  0xf5   : > { %v926_v48 = vmax.f32 %v678_v22, 0.0  ;;  %11209 = vst [vmem:[#allocation56_spill] sm:$0xff] %v8868_v56 }
  0xf6   : > { %v11013_v4 = vrot.slane %v8856_v17, 7  ;;  %v11011_v23 = vrot.slane %v8856_v17, 1  ;;  %v925_v41 = vmax.f32 %v673_v16, 0.0  ;;  %v6919_v29 = vpop.f32.mrb[6].mxu0  ;;  %6994 = vmatprep.mubr.msk.f32.mxu0 %vm1630_vm2, %v8856_v17 }
  0xf7   : > { %v688_v62 = vadd.f32 %v6919_v29, %v8838_v59  ;;  %v682_v28 = vpop.f32.mrb[7].mxu0  ;;  %6995 = vmatmul.mubr.msk.f32.gmra.mrb[56].mxu0 %vm1630_vm2, %v8865_v35  ;;  %v8887_v22 = vmul.f32 %v8799_v2, %v926_v48 }
  0xf8   : > { %v8878_v36 = vmul.f32 %v8801_v8, %v925_v41  ;;  %v683_v53 = vadd.f32 %v8838_v59, %v682_v28  ;;  %v8884_v47 = vsel %vm1407_vm3, %v1409_v30, %v11013_v4  ;;  %v8892_v29 = vsel %vm1517_vm4, %v1519_v10, %v11011_v23 }
  0xf9   : > { %v928_v16 = vmax.f32 %v688_v62, 0.0  ;;  %11210 = vst [vmem:[#allocation57_spill] sm:$0xff] %v8892_v29 }
  0xfa   : > { %v927_v40 = vmax.f32 %v683_v53, 0.0  ;;  %v6922_v56 = vpop.f32.mrb[8].mxu0  ;;  %6997 = vmatprep.mubr.msk.f32.mxu0 %vm1630_vm2, %v8878_v36 }
  0xfb   : > { %v698_v8 = vadd.f32 %v6922_v56, %v8838_v59  ;;  %v692_v41 = vpop.f32.mrb[9].mxu0  ;;  %6998 = vmatmul.mubr.msk.f32.gmra.mrb[58].mxu0 %vm1630_vm2, %v8887_v22  ;;  %v8904_v48 = vmul.f32 %v8803_v14, %v928_v16 }
  0xfc   : > { %v8900_v2 = vmul.f32 %v8805_v18, %v927_v40  ;;  %v693_v30 = vadd.f32 %v8838_v59, %v692_v41 }
  0xfd   : > { %v930_v10 = vmax.f32 %v698_v8, 0.0 }
  0xfe   : > { %v929_v62 = vmax.f32 %v693_v30, 0.0  ;;  %v6925_v28 = vpop.f32.mrb[10].mxu0  ;;  %7000 = vmatprep.mubr.msk.f32.mxu0 %vm1630_vm2, %v8900_v2 }
  0xff   : > { %v708_v56 = vadd.f32 %v6925_v28, %v8838_v59  ;;  %v702_v53 = vpop.f32.mrb[11].mxu0  ;;  %7001 = vmatmul.mubr.msk.f32.gmra.mrb[60].mxu0 %vm1630_vm2, %v8904_v48  ;;  %v8916_v14 = vmul.f32 %v8807_v60, %v930_v10 }
 0x100   : > { %v8912_v18 = vmul.f32 %v8812_v42, %v929_v62  ;;  %v703_v40 = vadd.f32 %v8838_v59, %v702_v53 }
 0x101   : > { %11211 = vst [vmem:[#allocation58_spill] sm:$0xff] %v8916_v14  ;;  %v932_v16 = vmax.f32 %v708_v56, 0.0 }
 0x102   : > { %v931_v8 = vmax.f32 %v703_v40, 0.0  ;;  %v6928_v41 = vpop.f32.mrb[12].mxu0  ;;  %7003 = vmatprep.mubr.msk.f32.mxu0 %vm1630_vm2, %v8912_v18 }
 0x103   : > { %v718_v30 = vadd.f32 %v6928_v41, %v8838_v59  ;;  %v712_v28 = vpop.f32.mrb[13].mxu0  ;;  %7004 = vmatmul.mubr.msk.f32.gmra.mrb[62].mxu0 %vm1630_vm2, %v8916_v14  ;;  %v8928_v60 = vmul.f32 %v8815_v44, %v932_v16 }
 0x104   : > { %v8924_v42 = vmul.f32 %v8817_v24, %v931_v8  ;;  %v713_v62 = vadd.f32 %v8838_v59, %v712_v28 }
 0x105   : > { %v934_v10 = vmax.f32 %v718_v30, 0.0 }
 0x106   : > { %v933_v56 = vmax.f32 %v713_v62, 0.0  ;;  %v6931_v53 = vpop.f32.mrb[14].mxu0  ;;  %7006 = vmatprep.mubr.msk.f32.mxu0 %vm1630_vm2, %v8924_v42 }
 0x107   : > { %v728_v40 = vadd.f32 %v6931_v53, %v8838_v59  ;;  %v722_v41 = vpop.f32.mrb[15].mxu0  ;;  %7007 = vmatmul.mubr.msk.f32.gmra.mrb[64].mxu0 %vm1630_vm2, %v8928_v60  ;;  %v8940_v44 = vmul.f32 %v8819_v26, %v934_v10 }
 0x108   : > { %v8936_v24 = vmul.f32 %v8821_v12, %v933_v56  ;;  %v723_v8 = vadd.f32 %v8838_v59, %v722_v41 }
 0x109   : > { %v936_v16 = vmax.f32 %v728_v40, 0.0 }
 0x10a   : > { %v935_v30 = vmax.f32 %v723_v8, 0.0  ;;  %v6934_v28 = vpop.f32.mrb[16].mxu0  ;;  %7009 = vmatprep.mubr.msk.f32.mxu0 %vm1630_vm2, %v8936_v24 }
 0x10b   : > { %v738_v62 = vadd.f32 %v6934_v28, %v8838_v59  ;;  %v732_v53 = vpop.f32.mrb[17].mxu0  ;;  %7010 = vmatmul.mubr.msk.f32.gmra.mrb[66].mxu0 %vm1630_vm2, %v8940_v44  ;;  %v8952_v26 = vmul.f32 %v8823_v13, %v936_v16 }
 0x10c   : > { %v8948_v12 = vmul.f32 %v8825_v6, %v935_v30  ;;  %v733_v56 = vadd.f32 %v8838_v59, %v732_v53 }
 0x10d   : > { %v938_v10 = vmax.f32 %v738_v62, 0.0 }
 0x10e   : > { %v937_v40 = vmax.f32 %v733_v56, 0.0  ;;  %v6937_v41 = vpop.f32.mrb[18].mxu0  ;;  %7012 = vmatprep.mubr.msk.f32.mxu0 %vm1630_vm2, %v8948_v12 }
 0x10f   : > { %v748_v8 = vadd.f32 %v6937_v41, %v8838_v59  ;;  %v742_v28 = vpop.f32.mrb[19].mxu0  ;;  %7013 = vmatmul.mubr.msk.f32.gmra.mrb[68].mxu0 %vm1630_vm2, %v8952_v26  ;;  %v8964_v13 = vmul.f32 %v8827_v7, %v938_v10 }
 0x110   : > { %v8960_v6 = vmul.f32 %v8829_v0, %v937_v40  ;;  %v743_v30 = vadd.f32 %v8838_v59, %v742_v28 }
 0x111   : > { %v940_v16 = vmax.f32 %v748_v8, 0.0 }
 0x112   : > { %v939_v62 = vmax.f32 %v743_v30, 0.0  ;;  %v6940_v53 = vpop.f32.mrb[20].mxu0  ;;  %7015 = vmatprep.mubr.msk.f32.mxu0 %vm1630_vm2, %v8960_v6 }
 0x113   : > { %v758_v56 = vadd.f32 %v6940_v53, %v8838_v59  ;;  %v752_v41 = vpop.f32.mrb[21].mxu0  ;;  %7016 = vmatmul.mubr.msk.f32.gmra.mrb[70].mxu0 %vm1630_vm2, %v8964_v13  ;;  %v8976_v7 = vmul.f32 %v8831_v1, %v940_v16 }
 0x114   : > { %v8972_v0 = vmul.f32 %v8833_v58, %v939_v62  ;;  %v753_v40 = vadd.f32 %v8838_v59, %v752_v41 }
 0x115   : > { %v942_v10 = vmax.f32 %v758_v56, 0.0 }
 0x116   : > { %v941_v8 = vmax.f32 %v753_v40, 0.0  ;;  %v6943_v28 = vpop.f32.mrb[22].mxu0  ;;  %7018 = vmatprep.mubr.msk.f32.mxu0 %vm1630_vm2, %v8972_v0 }
 0x117   : > { %v768_v30 = vadd.f32 %v6943_v28, %v8838_v59  ;;  %v762_v53 = vpop.f32.mrb[23].mxu0  ;;  %7019 = vmatmul.mubr.msk.f32.gmra.mrb[72].mxu0 %vm1630_vm2, %v8976_v7  ;;  %v8988_v1 = vmul.f32 %v8840_v52, %v942_v10 }
 0x118   : > { %v8984_v58 = vmul.f32 %v8842_v46, %v941_v8  ;;  %v763_v62 = vadd.f32 %v8838_v59, %v762_v53 }
 0x119   : > { %v944_v16 = vmax.f32 %v768_v30, 0.0 }
 0x11a   : > { %v943_v56 = vmax.f32 %v763_v62, 0.0  ;;  %v6946_v41 = vpop.f32.mrb[24].mxu0  ;;  %7021 = vmatprep.mubr.msk.f32.mxu0 %vm1630_vm2, %v8984_v58 }
 0x11b   : > { %v8993_v40 = vmul.f32 %v8731_v45, %v944_v16  ;;  %v778_v28 = vadd.f32 %v6946_v41, %v8838_v59  ;;  %v772_v23 = vpop.f32.mrb[25].mxu0  ;;  %7022 = vmatmul.mubr.msk.f32.gmra.mrb[74].mxu0 %vm1630_vm2, %v8988_v1 }
 0x11c   : > { %v8999_v46 = vmul.f32 %v8727_v31, %v943_v56  ;;  %v773_v52 = vadd.f32 %v8838_v59, %v772_v23 }
 0x11d   : > { %v946_v10 = vmax.f32 %v778_v28, 0.0  ;;  %v1453_v8 = vrot.slane %v8993_v40, 7 }
 0x11e   : > { %v945_v30 = vmax.f32 %v773_v52, 0.0  ;;  %v6949_v53 = vpop.f32.mrb[26].mxu0  ;;  %7024 = vmatprep.mubr.msk.f32.mxu0 %vm1630_vm2, %v8999_v46  ;;  %v11012_v45 = vrot.slane %v8999_v46, 7 }
 0x11f   : > { %v9007_v62 = vmul.f32 %v8729_v55, %v946_v10  ;;  %v788_v16 = vadd.f32 %v6949_v53, %v8838_v59  ;;  %v782_v41 = vpop.f32.mrb[27].mxu0  ;;  %7025 = vmatmul.mubr.msk.f32.gmra.mrb[76].mxu0 %vm1630_vm2, %v8993_v40 }
 0x120   : > { %v9013_v31 = vmul.f32 %v8725_v43, %v945_v30  ;;  %v783_v23 = vadd.f32 %v8838_v59, %v782_v41  ;;  %v9019_v56 = vsel %vm1407_vm3, %v11012_v45, %v1453_v8 }
 0x121   : > { %11212 = vst [vmem:[#allocation59_spill] sm:$0xff] %v9019_v56  ;;  %v948_v28 = vmax.f32 %v788_v16, 0.0  ;;  %7243 = vmatprep.mubr.msk.f32.mxu1 %vm1630_vm2, %v9019_v56  ;;  %v1457_v55 = vrot.slane %v9007_v62, 7 }
 0x122   : > { %v947_v52 = vmax.f32 %v783_v23, 0.0  ;;  %v6952_v10 = vpop.f32.mrb[28].mxu0  ;;  %7027 = vmatprep.mubr.msk.f32.mxu0 %vm1630_vm2, %v9013_v31  ;;  %v1455_v43 = vrot.slane %v9013_v31, 7 }
 0x123   : > { %v9028_v30 = vmul.f32 %v8733_v9, %v948_v28  ;;  %v798_v53 = vadd.f32 %v6952_v10, %v8838_v59  ;;  %v792_v41 = vpop.f32.mrb[29].mxu0  ;;  %7028 = vmatmul.mubr.msk.f32.gmra.mrb[78].mxu0 %vm1630_vm2, %v9007_v62  ;;  %v9049_v28 = vld [vmem:[%s10908_s4 + $0x14] sm:$0xf] }
 0x124   : > { %v9034_v16 = vmul.f32 %v8735_v61, %v947_v52  ;;  %v793_v23 = vadd.f32 %v8838_v59, %v792_v41  ;;  %v9038_v45 = vsel %vm1407_vm3, %v1453_v8, %v1455_v43  ;;  %v9041_v4 = vsel %vm1407_vm3, %v1455_v43, %v1457_v55 }
 0x125   : > { %11213 = vst [vmem:[#allocation60_spill] sm:$0xff] %v9028_v30  ;;  %11215 = vst [vmem:[#allocation62_spill] sm:$0xff] %v9038_v45  ;;  %v950_v29 = vmax.f32 %v798_v53, 0.0  ;;  %7244 = vmatmul.mubr.msk.f32.vlgmr.msra.gmra.mrb[0].mxu1 %vm1630_vm2, %v9038_v45  ;;  %v1461_v9 = vrot.slane %v9028_v30, 7 }
 0x126   : > { %11214 = vst [vmem:[#allocation61_spill] sm:$0xff] %v9034_v16  ;;  %11216 = vst [vmem:[#allocation63_spill] sm:$0xff] %v9041_v4  ;;  %v949_v61 = vmax.f32 %v793_v23, 0.0  ;;  %7286 = vmatpush3.msk.msra.mxu1 %vm1727_vm1, %v8765_v21  ;;  %v6955_v8 = vpop.f32.mrb[30].mxu0  ;;  %7030 = vmatprep.mubr.msk.f32.mxu0 %vm1630_vm2, %v9034_v16  ;;  %v1459_v52 = vrot.slane %v9034_v16, 7 }
 0x127   : > { %v9057_v10 = vmul.f32 %v8737_v37, %v950_v29  ;;  %v808_v43 = vadd.f32 %v6955_v8, %v8838_v59  ;;  %7246 = vmatprep.mubr.msk.f32.mxu1 %vm1630_vm2, %v9041_v4  ;;  %v802_v53 = vpop.f32.mrb[31].mxu0  ;;  %7031 = vmatmul.mubr.msk.f32.gmra.mrb[80].mxu0 %vm1630_vm2, %v9028_v30 }
 0x128   : > { %v9065_v21 = vmul.f32 %v8739_v3, %v949_v61  ;;  %v803_v41 = vadd.f32 %v8838_v59, %v802_v53  ;;  %v9069_v23 = vsel %vm1407_vm3, %v1457_v55, %v1459_v52  ;;  %v9072_v37 = vsel %vm1407_vm3, %v1459_v52, %v1461_v9  ;;  %7359 = vmatprep.subr.msk.mxu1 %vm1727_vm1, %v9049_v28 }
 0x129   : > { %11217 = vst [vmem:[#allocation64_spill] sm:$0xff] %v9057_v10  ;;  %11219 = vst [vmem:[#allocation66_spill] sm:$0xff] %v9069_v23  ;;  %v952_v29 = vmax.f32 %v808_v43, 0.0  ;;  %7247 = vmatmul.mubr.msk.f32.gmra.mrb[2].mxu1 %vm1630_vm2, %v9069_v23  ;;  %v1465_v8 = vrot.slane %v9057_v10, 7 }
 0x12a   : > { %11218 = vst [vmem:[#allocation65_spill] sm:$0xff] %v9065_v21  ;;  %11220 = vst [vmem:[#allocation67_spill] sm:$0xff] %v9072_v37  ;;  %v951_v30 = vmax.f32 %v803_v41, 0.0  ;;  %v6958_v3 = vpop.f32.mrb[32].mxu0  ;;  %7033 = vmatprep.mubr.msk.f32.mxu0 %vm1630_vm2, %v9065_v21  ;;  %7249 = vmatprep.mubr.msk.f32.mxu1 %vm1630_vm2, %v9072_v37  ;;  %v1463_v55 = vrot.slane %v9065_v21, 7 }
 0x12b   : > { %v9085_v61 = vmul.f32 %v8741_v49, %v952_v29  ;;  %v818_v52 = vadd.f32 %v6958_v3, %v8838_v59  ;;  %v812_v43 = vpop.f32.mrb[33].mxu0  ;;  %7034 = vmatmul.mubr.msk.f32.gmra.mrb[82].mxu0 %vm1630_vm2, %v9057_v10 }
 0x12c   : > { %v9091_v53 = vmul.f32 %v8743_v57, %v951_v30  ;;  %v813_v41 = vadd.f32 %v8838_v59, %v812_v43  ;;  %v9095_v16 = vsel %vm1407_vm3, %v1461_v9, %v1463_v55  ;;  %v9098_v37 = vsel %vm1407_vm3, %v1463_v55, %v1465_v8 }
 0x12d   : > { %11221 = vst [vmem:[#allocation68_spill] sm:$0xff] %v9085_v61  ;;  %11223 = vst [vmem:[#allocation70_spill] sm:$0xff] %v9095_v16  ;;  %v954_v21 = vmax.f32 %v818_v52, 0.0  ;;  %7250 = vmatmul.mubr.msk.f32.gmra.mrb[4].mxu1 %vm1630_vm2, %v9095_v16  ;;  %v1469_v49 = vrot.slane %v9085_v61, 7 }
 0x12e   : > { %11222 = vst [vmem:[#allocation69_spill] sm:$0xff] %v9091_v53  ;;  %11224 = vst [vmem:[#allocation71_spill] sm:$0xff] %v9098_v37  ;;  %v953_v29 = vmax.f32 %v813_v41, 0.0  ;;  %v6961_v3 = vpop.f32.mrb[34].mxu0  ;;  %7036 = vmatprep.mubr.msk.f32.mxu0 %vm1630_vm2, %v9091_v53  ;;  %7252 = vmatprep.mubr.msk.f32.mxu1 %vm1630_vm2, %v9098_v37  ;;  %v1467_v57 = vrot.slane %v9091_v53, 7 }
 0x12f   : > { %v9109_v30 = vmul.f32 %v8745_v39, %v954_v21  ;;  %v828_v9 = vadd.f32 %v6961_v3, %v8838_v59  ;;  %v822_v55 = vpop.f32.mrb[35].mxu0  ;;  %7037 = vmatmul.mubr.msk.f32.gmra.mrb[84].mxu0 %vm1630_vm2, %v9085_v61  ;;  %v9127_v39 = vld [vmem:[%s10908_s4 + $0x8] sm:$0xf] }
 0x130   : > { %v9115_v52 = vmul.f32 %v8747_v33, %v953_v29  ;;  %v823_v43 = vadd.f32 %v8838_v59, %v822_v55  ;;  %v9119_v41 = vsel %vm1407_vm3, %v1465_v8, %v1467_v57  ;;  %v9122_v10 = vsel %vm1407_vm3, %v1467_v57, %v1469_v49  ;;  %7137 = vmatprep.subr.msk.mxu0 %vm1727_vm1, %v9127_v39 }
 0x131   : > { %11225 = vst [vmem:[#allocation72_spill] sm:$0xff] %v9109_v30  ;;  %11227 = vst [vmem:[#allocation74_spill] sm:$0xff] %v9119_v41  ;;  %v956_v21 = vmax.f32 %v828_v9, 0.0  ;;  %7253 = vmatmul.mubr.msk.f32.gmra.mrb[6].mxu1 %vm1630_vm2, %v9119_v41  ;;  %v1473_v33 = vrot.slane %v9109_v30, 7 }
 0x132   : > { %11226 = vst [vmem:[#allocation73_spill] sm:$0xff] %v9115_v52  ;;  %11228 = vst [vmem:[#allocation75_spill] sm:$0xff] %v9122_v10  ;;  %v955_v29 = vmax.f32 %v823_v43, 0.0  ;;  %v6964_v8 = vpop.f32.mrb[36].mxu0  ;;  %7039 = vmatprep.mubr.msk.f32.mxu0 %vm1630_vm2, %v9115_v52  ;;  %7255 = vmatprep.mubr.msk.f32.mxu1 %vm1630_vm2, %v9122_v10  ;;  %v1471_v3 = vrot.slane %v9115_v52, 7 }
 0x133   : > { %v9140_v57 = vmul.f32 %v8758_v27, %v956_v21  ;;  %v838_v9 = vadd.f32 %v6964_v8, %v8838_v59  ;;  %v832_v55 = vpop.f32.mrb[37].mxu0  ;;  %7040 = vmatmul.mubr.msk.f32.gmra.mrb[86].mxu0 %vm1630_vm2, %v9109_v30 }
 0x134   : > { %v9146_v43 = vmul.f32 %v8760_v19, %v955_v29  ;;  %v833_v61 = vadd.f32 %v8838_v59, %v832_v55  ;;  %v9150_v53 = vsel %vm1407_vm3, %v1469_v49, %v1471_v3  ;;  %v9153_v10 = vsel %vm1407_vm3, %v1471_v3, %v1473_v33 }
 0x135   : > { %11229 = vst [vmem:[#allocation76_spill] sm:$0xff] %v9140_v57  ;;  %11231 = vst [vmem:[#allocation78_spill] sm:$0xff] %v9150_v53  ;;  %v958_v52 = vmax.f32 %v838_v9, 0.0  ;;  %7256 = vmatmul.mubr.msk.f32.gmra.mrb[8].mxu1 %vm1630_vm2, %v9150_v53  ;;  %v1477_v27 = vrot.slane %v9140_v57, 7 }
 0x136   : > { %11230 = vst [vmem:[#allocation77_spill] sm:$0xff] %v9146_v43  ;;  %11232 = vst [vmem:[#allocation79_spill] sm:$0xff] %v9153_v10  ;;  %v957_v21 = vmax.f32 %v833_v61, 0.0  ;;  %v6967_v8 = vpop.f32.mrb[38].mxu0  ;;  %7042 = vmatprep.mubr.msk.f32.mxu0 %vm1630_vm2, %v9146_v43  ;;  %7258 = vmatprep.mubr.msk.f32.mxu1 %vm1630_vm2, %v9153_v10  ;;  %v1475_v19 = vrot.slane %v9146_v43, 7 }
 0x137   : > { %v9164_v49 = vmul.f32 %v8767_v63, %v958_v52  ;;  %v848_v29 = vadd.f32 %v6967_v8, %v8838_v59  ;;  %v842_v3 = vpop.f32.mrb[39].mxu0  ;;  %7043 = vmatmul.mubr.msk.f32.gmra.mrb[88].mxu0 %vm1630_vm2, %v9140_v57 }
 0x138   : > { %v9170_v61 = vmul.f32 %v8771_v51, %v957_v21  ;;  %v843_v9 = vadd.f32 %v8838_v59, %v842_v3  ;;  %v9174_v55 = vsel %vm1407_vm3, %v1473_v33, %v1475_v19  ;;  %v9177_v30 = vsel %vm1407_vm3, %v1475_v19, %v1477_v27 }
 0x139   : > { %11233 = vst [vmem:[#allocation80_spill] sm:$0xff] %v9164_v49  ;;  %11235 = vst [vmem:[#allocation82_spill] sm:$0xff] %v9174_v55  ;;  %v960_v43 = vmax.f32 %v848_v29, 0.0  ;;  %7259 = vmatmul.mubr.msk.f32.gmra.mrb[10].mxu1 %vm1630_vm2, %v9174_v55  ;;  %v1481_v63 = vrot.slane %v9164_v49, 7 }
 0x13a   : > { %11234 = vst [vmem:[#allocation81_spill] sm:$0xff] %v9170_v61  ;;  %11236 = vst [vmem:[#allocation83_spill] sm:$0xff] %v9177_v30  ;;  %v959_v52 = vmax.f32 %v843_v9, 0.0  ;;  %v6970_v8 = vpop.f32.mrb[40].mxu0  ;;  %7045 = vmatprep.mubr.msk.f32.mxu0 %vm1630_vm2, %v9170_v61  ;;  %7261 = vmatprep.mubr.msk.f32.mxu1 %vm1630_vm2, %v9177_v30  ;;  %v1479_v51 = vrot.slane %v9170_v61, 7 }
 0x13b   : > { %v9188_v33 = vmul.f32 %v8773_v5, %v960_v43  ;;  %v858_v21 = vadd.f32 %v6970_v8, %v8838_v59  ;;  %v852_v19 = vpop.f32.mrb[41].mxu0  ;;  %7046 = vmatmul.mubr.msk.f32.gmra.mrb[90].mxu0 %vm1630_vm2, %v9164_v49 }
 0x13c   : > { %v9194_v29 = vmul.f32 %v8775_v15, %v959_v52  ;;  %v853_v3 = vadd.f32 %v8838_v59, %v852_v19  ;;  %v9198_v9 = vsel %vm1407_vm3, %v1477_v27, %v1479_v51  ;;  %v9201_v57 = vsel %vm1407_vm3, %v1479_v51, %v1481_v63 }
 0x13d   : > { %11237 = vst [vmem:[#allocation84_spill] sm:$0xff] %v9188_v33  ;;  %11239 = vst [vmem:[#allocation86_spill] sm:$0xff] %v9198_v9  ;;  %v962_v61 = vmax.f32 %v858_v21, 0.0  ;;  %7262 = vmatmul.mubr.msk.f32.gmra.mrb[12].mxu1 %vm1630_vm2, %v9198_v9  ;;  %v1485_v5 = vrot.slane %v9188_v33, 7 }
 0x13e   : > { %11238 = vst [vmem:[#allocation85_spill] sm:$0xff] %v9194_v29  ;;  %11240 = vst [vmem:[#allocation87_spill] sm:$0xff] %v9201_v57  ;;  %v961_v43 = vmax.f32 %v853_v3, 0.0  ;;  %v6973_v8 = vpop.f32.mrb[42].mxu0  ;;  %7048 = vmatprep.mubr.msk.f32.mxu0 %vm1630_vm2, %v9194_v29  ;;  %7264 = vmatprep.mubr.msk.f32.mxu1 %vm1630_vm2, %v9201_v57  ;;  %v1483_v15 = vrot.slane %v9194_v29, 7 }
 0x13f   : > { %v9212_v27 = vmul.f32 %v8777_v11, %v962_v61  ;;  %v868_v52 = vadd.f32 %v6973_v8, %v8838_v59  ;;  %v862_v51 = vpop.f32.mrb[43].mxu0  ;;  %7049 = vmatmul.mubr.msk.f32.gmra.mrb[92].mxu0 %vm1630_vm2, %v9188_v33 }
 0x140   : > { %v9218_v21 = vmul.f32 %v8779_v32, %v961_v43  ;;  %v863_v19 = vadd.f32 %v8838_v59, %v862_v51  ;;  %v9222_v3 = vsel %vm1407_vm3, %v1481_v63, %v1483_v15  ;;  %v9225_v49 = vsel %vm1407_vm3, %v1483_v15, %v1485_v5 }
 0x141   : > { %11241 = vst [vmem:[#allocation88_spill] sm:$0xff] %v9212_v27  ;;  %11243 = vst [vmem:[#allocation90_spill] sm:$0xff] %v9222_v3  ;;  %v964_v29 = vmax.f32 %v868_v52, 0.0  ;;  %7265 = vmatmul.mubr.msk.f32.gmra.mrb[14].mxu1 %vm1630_vm2, %v9222_v3  ;;  %v1489_v11 = vrot.slane %v9212_v27, 7 }
 0x142   : > { %11242 = vst [vmem:[#allocation89_spill] sm:$0xff] %v9218_v21  ;;  %11244 = vst [vmem:[#allocation91_spill] sm:$0xff] %v9225_v49  ;;  %v963_v61 = vmax.f32 %v863_v19, 0.0  ;;  %v6976_v8 = vpop.f32.mrb[44].mxu0  ;;  %7051 = vmatprep.mubr.msk.f32.mxu0 %vm1630_vm2, %v9218_v21  ;;  %7267 = vmatprep.mubr.msk.f32.mxu1 %vm1630_vm2, %v9225_v49  ;;  %v1487_v32 = vrot.slane %v9218_v21, 7 }
 0x143   : > { %v9236_v63 = vmul.f32 %v8781_v20, %v964_v29  ;;  %v878_v43 = vadd.f32 %v6976_v8, %v8838_v59  ;;  %v872_v15 = vpop.f32.mrb[45].mxu0  ;;  %7052 = vmatmul.mubr.msk.f32.gmra.mrb[94].mxu0 %vm1630_vm2, %v9212_v27 }
 0x144   : > { %v9242_v52 = vmul.f32 %v8783_v50, %v963_v61  ;;  %v873_v51 = vadd.f32 %v8838_v59, %v872_v15  ;;  %v9246_v19 = vsel %vm1407_vm3, %v1485_v5, %v1487_v32  ;;  %v9249_v33 = vsel %vm1407_vm3, %v1487_v32, %v1489_v11 }
 0x145   : > { %11245 = vst [vmem:[#allocation92_spill] sm:$0xff] %v9236_v63  ;;  %11247 = vst [vmem:[#allocation94_spill] sm:$0xff] %v9246_v19  ;;  %v966_v21 = vmax.f32 %v878_v43, 0.0  ;;  %7268 = vmatmul.mubr.msk.f32.gmra.mrb[16].mxu1 %vm1630_vm2, %v9246_v19  ;;  %v1493_v20 = vrot.slane %v9236_v63, 7 }
 0x146   : > { %11246 = vst [vmem:[#allocation93_spill] sm:$0xff] %v9242_v52  ;;  %11248 = vst [vmem:[#allocation95_spill] sm:$0xff] %v9249_v33  ;;  %v965_v29 = vmax.f32 %v873_v51, 0.0  ;;  %v6979_v8 = vpop.f32.mrb[46].mxu0  ;;  %7054 = vmatprep.mubr.msk.f32.mxu0 %vm1630_vm2, %v9242_v52  ;;  %7270 = vmatprep.mubr.msk.f32.mxu1 %vm1630_vm2, %v9249_v33  ;;  %v1491_v50 = vrot.slane %v9242_v52, 7 }
 0x147   : > { %v9260_v5 = vmul.f32 %v8785_v38, %v966_v21  ;;  %v888_v61 = vadd.f32 %v6979_v8, %v8838_v59  ;;  %v882_v32 = vpop.f32.mrb[47].mxu0  ;;  %7055 = vmatmul.mubr.msk.f32.gmra.mrb[96].mxu0 %vm1630_vm2, %v9236_v63 }
 0x148   : > { %v9266_v43 = vmul.f32 %v8787_v54, %v965_v29  ;;  %v883_v15 = vadd.f32 %v8838_v59, %v882_v32  ;;  %v9270_v51 = vsel %vm1407_vm3, %v1489_v11, %v1491_v50  ;;  %v9273_v27 = vsel %vm1407_vm3, %v1491_v50, %v1493_v20  ;;  %v11253_v11 = vld [vmem:[#allocation51_spill] sm:$0xff]  ;;  %v11255_v32 = vld [vmem:[#allocation52_spill] sm:$0xff] }
 0x149   : > { %11249 = vst [vmem:[#allocation96_spill] sm:$0xff] %v9260_v5  ;;  %11251 = vst [vmem:[#allocation98_spill] sm:$0xff] %v9270_v51  ;;  %v968_v52 = vmax.f32 %v888_v61, 0.0  ;;  %7271 = vmatmul.mubr.msk.f32.gmra.mrb[18].mxu1 %vm1630_vm2, %v9270_v51  ;;  %v1497_v38 = vrot.slane %v9260_v5, 7 }
 0x14a   : > { %11250 = vst [vmem:[#allocation97_spill] sm:$0xff] %v9266_v43  ;;  %11252 = vst [vmem:[#allocation99_spill] sm:$0xff] %v9273_v27  ;;  %v967_v21 = vmax.f32 %v883_v15, 0.0  ;;  %v6982_v8 = vpop.f32.mrb[48].mxu0  ;;  %7057 = vmatprep.mubr.msk.f32.mxu0 %vm1630_vm2, %v9266_v43  ;;  %7273 = vmatprep.mubr.msk.f32.mxu1 %vm1630_vm2, %v9273_v27  ;;  %v1495_v54 = vrot.slane %v9266_v43, 7 }
 0x14b   : > { %v9284_v29 = vmul.f32 %v11253_v11, %v968_v52  ;;  %v898_v50 = vadd.f32 %v6982_v8, %v8838_v59  ;;  %v892_v61 = vpop.f32.mrb[49].mxu0  ;;  %7058 = vmatmul.mubr.msk.f32.gmra.mrb[98].mxu0 %vm1630_vm2, %v9260_v5 }
 0x14c   : > { %v9290_v15 = vmul.f32 %v11255_v32, %v967_v21  ;;  %v893_v63 = vadd.f32 %v8838_v59, %v892_v61  ;;  %v9294_v51 = vsel %vm1407_vm3, %v1493_v20, %v1495_v54  ;;  %v9297_v27 = vsel %vm1407_vm3, %v1495_v54, %v1497_v38  ;;  %v11260_v21 = vld [vmem:[#allocation53_spill] sm:$0xff]  ;;  %v11262_v32 = vld [vmem:[#allocation54_spill] sm:$0xff] }
 0x14d   : > { %11254 = vst [vmem:[#allocation51_spill] sm:$0xff] %v9284_v29  ;;  %11257 = vst [vmem:[#allocation100_spill] sm:$0xff] %v9294_v51  ;;  %v970_v43 = vmax.f32 %v898_v50, 0.0  ;;  %7274 = vmatmul.mubr.msk.f32.gmra.mrb[20].mxu1 %vm1630_vm2, %v9294_v51  ;;  %v1501_v52 = vrot.slane %v9284_v29, 7  ;;  %v11261_v61 = vrot.slane %v8847_v25, 7 }
 0x14e   : > { %11256 = vst [vmem:[#allocation52_spill] sm:$0xff] %v9290_v15  ;;  %11258 = vst [vmem:[#allocation101_spill] sm:$0xff] %v9297_v27  ;;  %v969_v8 = vmax.f32 %v893_v63, 0.0  ;;  %v9302_v11 = vpop.f32.mrb[50].mxu0  ;;  %7060 = vmatprep.mubr.msk.f32.mxu0 %vm1630_vm2, %v9290_v15  ;;  %7276 = vmatprep.mubr.msk.f32.mxu1 %vm1630_vm2, %v9297_v27  ;;  %v1499_v20 = vrot.slane %v9290_v15, 7 }
 0x14f   : > { %11259 = vst [vmem:[#allocation102_spill] sm:$0xff] %v9302_v11  ;;  %v9310_v54 = vmul.f32 %v11260_v21, %v970_v43  ;;  %v902_v50 = vpop.f32.mrb[51].mxu0  ;;  %7061 = vmatmul.mubr.msk.f32.gmra.mrb[100].mxu0 %vm1630_vm2, %v9284_v29  ;;  %v1516_v63 = vsel %vm1407_vm3, 0.0, %v11261_v61 }
 0x150   : > { %v9318_v11 = vmul.f32 %v11262_v32, %v969_v8  ;;  %v903_v5 = vadd.f32 %v8838_v59, %v902_v50  ;;  %7065 = vmatprep.mubr.msk.f32.mxu0 %vm1630_vm2, %v1516_v63  ;;  %v9323_v15 = vsel %vm1407_vm3, %v1497_v38, %v1499_v20  ;;  %v9326_v43 = vsel %vm1407_vm3, %v1499_v20, %v1501_v52  ;;  %v11267_v50 = vld [vmem:[#allocation55_spill] sm:$0xff] }
 0x151   : > { %11263 = vst [vmem:[#allocation53_spill] sm:$0xff] %v9323_v15  ;;  %11264 = vst [vmem:[#allocation54_spill] sm:$0xff] %v9326_v43  ;;  %7277 = vmatmul.mubr.msk.f32.gmra.mrb[22].mxu1 %vm1630_vm2, %v9323_v15  ;;  %v1505_v25 = vrot.slane %v9310_v54, 7  ;;  %v1413_v8 = vrot.slane %v8865_v35, 7  ;;  %v1415_v20 = vrot.slane %v8878_v36, 7 }
 0x152   : > { %v971_v21 = vmax.f32 %v903_v5, 0.0  ;;  %v9331_v61 = vpop.f32.mrb[52].mxu0  ;;  %7279 = vmatprep.mubr.msk.f32.mxu1 %vm1630_vm2, %v9326_v43  ;;  %v1503_v59 = vrot.slane %v9318_v11, 7 }
 0x153   : > { %11265 = vst [vmem:[#allocation103_spill] sm:$0xff] %v9331_v61  ;;  %v9337_v38 = vpop.f32.mrb[53].mxu0  ;;  %7066 = vmatmul.mubr.msk.f32.vlgmr.msra.gmra.mrb[54].mxu0 %vm1630_vm2, %v8863_v34  ;;  %v11270_v34 = vrot.slane %v8856_v17, 7  ;;  %v1431_v61 = vrot.slane %v8936_v24, 7 }
 0x154   : > { %11266 = vst [vmem:[#allocation104_spill] sm:$0xff] %v9337_v38  ;;  %v9343_v63 = vmul.f32 %v11267_v50, %v971_v21  ;;  %7068 = vmatprep.mubr.msk.f32.mxu0 %vm1630_vm2, %v8884_v47  ;;  %v9348_v5 = vsel %vm1407_vm3, %v1501_v52, %v1503_v59  ;;  %v9351_v32 = vsel %vm1407_vm3, %v1503_v59, %v1505_v25  ;;  %v1417_v52 = vrot.slane %v8887_v22, 7  ;;  %v11271_v59 = vld [vmem:[#allocation50_spill] sm:$0xff] }
 0x155   : > { %11268 = vst [vmem:[#allocation55_spill] sm:$0xff] %v9348_v5  ;;  %11269 = vst [vmem:[#allocation105_spill] sm:$0xff] %v9351_v32  ;;  %7280 = vmatmul.mubr.msk.f32.gmra.mrb[24].mxu1 %vm1630_vm2, %v9348_v5  ;;  %7138 = vmatpush3.msk.msra.mxu0 %vm1727_vm1, %v9127_v39  ;;  %v9362_v21 = vsel %vm1407_vm3, %v11270_v34, %v1413_v8  ;;  %v9371_v39 = vsel %vm1407_vm3, %v1413_v8, %v1415_v20  ;;  %v1419_v50 = vrot.slane %v8900_v2, 7 }
 0x156   : > { %7282 = vmatprep.mubr.msk.f32.mxu1 %vm1630_vm2, %v9351_v32  ;;  %v11065_v47 = vrot.slane %v9343_v63, 7  ;;  %7211 = vmatprep.subr.msk.mxu0 %vm1727_vm1, %v11271_v59  ;;  %v9386_v59 = vsel %vm1407_vm3, %v1415_v20, %v1417_v52  ;;  %v1421_v8 = vrot.slane %v8904_v48, 7  ;;  %v1427_v5 = vrot.slane %v8924_v42, 7 }
 0x157   : > { %7069 = vmatmul.mubr.msk.f32.gmra.mrb[56].mxu0 %vm1630_vm2, %v9362_v21  ;;  %v9392_v32 = vsel %vm1407_vm3, %v1417_v52, %v1419_v50  ;;  %v1425_v52 = vrot.slane %v8916_v14, 7  ;;  %v1433_v38 = vrot.slane %v8940_v44, 7 }
 0x158   : > { %7071 = vmatprep.mubr.msk.f32.mxu0 %vm1630_vm2, %v9371_v39  ;;  %v9379_v34 = vsel %vm1407_vm3, %v1505_v25, %v11065_v47  ;;  %v1423_v25 = vrot.slane %v8912_v18, 7  ;;  %v9400_v47 = vld [vmem:[%s10908_s4 + $0x18] sm:$0xf]  ;;  %v9409_v20 = vsel %vm1407_vm3, %v1419_v50, %v1421_v8  ;;  %v1429_v50 = vrot.slane %v8928_v60, 7 }
 0x159   : > { %11272 = vst [vmem:[#allocation50_spill] sm:$0xff] %v9379_v34  ;;  %7283 = vmatmul.mubr.msk.f32.gmra.mrb[26].mxu1 %vm1630_vm2, %v9379_v34 }
 0x15a   : > { %7287 = vmatprep.mubr.msk.f32.mxu1 %vm1630_vm2, %v8865_v35  ;;  %v9415_v34 = vsel %vm1407_vm3, %v1421_v8, %v1423_v25  ;;  %v9433_v8 = vsel %vm1407_vm3, %v1425_v52, %v1427_v5 }
 0x15b   : > { %7072 = vmatmul.mubr.msk.f32.gmra.mrb[58].mxu0 %vm1630_vm2, %v9386_v59  ;;  %11274 = vst [vmem:[#allocation107_spill] sm:$0xff] %v9433_v8 }
 0x15c   : > { %7074 = vmatprep.mubr.msk.f32.mxu0 %vm1630_vm2, %v9392_v32 }
 0x15d   : > { %7288 = vmatmul.mubr.msk.f32.vlgmr.msra.gmra.mrb[28].mxu1 %vm1630_vm2, %v8878_v36 }
 0x15e   : > { %7360 = vmatpush3.msk.msra.mxu1 %vm1727_vm1, %v9049_v28  ;;  %7290 = vmatprep.mubr.msk.f32.mxu1 %vm1630_vm2, %v8887_v22  ;;  %v9427_v28 = vsel %vm1407_vm3, %v1423_v25, %v1425_v52  ;;  %v9443_v25 = vsel %vm1407_vm3, %v1427_v5, %v1429_v50  ;;  %v9449_v52 = vsel %vm1407_vm3, %v1429_v50, %v1431_v61 }
 0x15f   : > { %7075 = vmatmul.mubr.msk.f32.gmra.mrb[60].mxu0 %vm1630_vm2, %v9409_v20  ;;  %7433 = vmatprep.subr.msk.mxu1 %vm1727_vm1, %v9400_v47  ;;  %11273 = vst [vmem:[#allocation106_spill] sm:$0xff] %v9427_v28  ;;  %11275 = vst [vmem:[#allocation108_spill] sm:$0xff] %v9443_v25  ;;  %v9459_v5 = vsel %vm1407_vm3, %v1431_v61, %v1433_v38 }
 0x160   : > { %7077 = vmatprep.mubr.msk.f32.mxu0 %vm1630_vm2, %v9415_v34  ;;  %11276 = vst [vmem:[#allocation109_spill] sm:$0xff] %v9449_v52  ;;  %11277 = vst [vmem:[#allocation110_spill] sm:$0xff] %v9459_v5 }
 0x161   : > { %7291 = vmatmul.mubr.msk.f32.gmra.mrb[30].mxu1 %vm1630_vm2, %v8900_v2 }
 0x162   : > { %7293 = vmatprep.mubr.msk.f32.mxu1 %vm1630_vm2, %v8904_v48 }
 0x163   : > { %7078 = vmatmul.mubr.msk.f32.gmra.mrb[62].mxu0 %vm1630_vm2, %v9427_v28  ;;  %v1435_v28 = vrot.slane %v8948_v12, 7 }
 0x164   : > { %7080 = vmatprep.mubr.msk.f32.mxu0 %vm1630_vm2, %v9433_v8  ;;  %v1437_v8 = vrot.slane %v8952_v26, 7 }
 0x165   : > { %7294 = vmatmul.mubr.msk.f32.gmra.mrb[32].mxu1 %vm1630_vm2, %v8912_v18  ;;  %v9465_v50 = vsel %vm1407_vm3, %v1433_v38, %v1435_v28 }
 0x166   : > { %7296 = vmatprep.mubr.msk.f32.mxu1 %vm1630_vm2, %v8916_v14  ;;  %11278 = vst [vmem:[#allocation111_spill] sm:$0xff] %v9465_v50  ;;  %v9475_v61 = vsel %vm1407_vm3, %v1435_v28, %v1437_v8 }
 0x167   : > { %7081 = vmatmul.mubr.msk.f32.gmra.mrb[64].mxu0 %vm1630_vm2, %v9443_v25  ;;  %v1439_v25 = vrot.slane %v8960_v6, 7  ;;  %11279 = vst [vmem:[#allocation112_spill] sm:$0xff] %v9475_v61 }
 0x168   : > { %7083 = vmatprep.mubr.msk.f32.mxu0 %vm1630_vm2, %v9449_v52  ;;  %v1441_v52 = vrot.slane %v8964_v13, 7 }
 0x169   : > { %7297 = vmatmul.mubr.msk.f32.gmra.mrb[34].mxu1 %vm1630_vm2, %v8924_v42  ;;  %v9481_v38 = vsel %vm1407_vm3, %v1437_v8, %v1439_v25 }
 0x16a   : > { %7299 = vmatprep.mubr.msk.f32.mxu1 %vm1630_vm2, %v8928_v60  ;;  %11280 = vst [vmem:[#allocation113_spill] sm:$0xff] %v9481_v38  ;;  %v9491_v28 = vsel %vm1407_vm3, %v1439_v25, %v1441_v52 }
 0x16b   : > { %7084 = vmatmul.mubr.msk.f32.gmra.mrb[66].mxu0 %vm1630_vm2, %v9459_v5  ;;  %v1443_v5 = vrot.slane %v8972_v0, 7 }
 0x16c   : > { %7086 = vmatprep.mubr.msk.f32.mxu0 %vm1630_vm2, %v9465_v50  ;;  %v1445_v50 = vrot.slane %v8976_v7, 7 }
 0x16d   : > { %7300 = vmatmul.mubr.msk.f32.gmra.mrb[36].mxu1 %vm1630_vm2, %v8936_v24  ;;  %v9497_v8 = vsel %vm1407_vm3, %v1441_v52, %v1443_v5 }
 0x16e   : > { %7302 = vmatprep.mubr.msk.f32.mxu1 %vm1630_vm2, %v8940_v44  ;;  %v9507_v25 = vsel %vm1407_vm3, %v1443_v5, %v1445_v50 }
 0x16f   : > { %7087 = vmatmul.mubr.msk.f32.gmra.mrb[68].mxu0 %vm1630_vm2, %v9475_v61  ;;  %v1447_v61 = vrot.slane %v8984_v58, 7  ;;  %11281 = vst [vmem:[#allocation114_spill] sm:$0xff] %v9507_v25 }
 0x170   : > { %7089 = vmatprep.mubr.msk.f32.mxu0 %vm1630_vm2, %v9481_v38  ;;  %v1449_v38 = vrot.slane %v8988_v1, 7 }
 0x171   : > { %7303 = vmatmul.mubr.msk.f32.gmra.mrb[38].mxu1 %vm1630_vm2, %v8948_v12  ;;  %v9513_v52 = vsel %vm1407_vm3, %v1445_v50, %v1447_v61 }
 0x172   : > { %7305 = vmatprep.mubr.msk.f32.mxu1 %vm1630_vm2, %v8952_v26  ;;  %11282 = vst [vmem:[#allocation115_spill] sm:$0xff] %v9513_v52  ;;  %v9522_v5 = vsel %vm1407_vm3, %v1447_v61, %v1449_v38  ;;  %v11286_v61 = vld [vmem:[#allocation67_spill] sm:$0xff] }
 0x173   : > { %7090 = vmatmul.mubr.msk.f32.gmra.mrb[70].mxu0 %vm1630_vm2, %v9491_v28  ;;  %11283 = vst [vmem:[#allocation116_spill] sm:$0xff] %v9522_v5 }
 0x174   : > { %7092 = vmatprep.mubr.msk.f32.mxu0 %vm1630_vm2, %v9497_v8 }
 0x175   : > { %7306 = vmatmul.mubr.msk.f32.gmra.mrb[40].mxu1 %vm1630_vm2, %v8960_v6 }
 0x176   : > { %7308 = vmatprep.mubr.msk.f32.mxu1 %vm1630_vm2, %v8964_v13 }
 0x177   : > { %7093 = vmatmul.mubr.msk.f32.gmra.mrb[72].mxu0 %vm1630_vm2, %v9507_v25  ;;  %v11284_v25 = vrot.slane %v8999_v46, 7 }
 0x178   : > { %7095 = vmatprep.mubr.msk.f32.mxu0 %vm1630_vm2, %v9513_v52  ;;  %v11313_v52 = vrot.slane %v8856_v17, 1 }
 0x179   : > { %7309 = vmatmul.mubr.msk.f32.gmra.mrb[42].mxu1 %vm1630_vm2, %v8972_v0  ;;  %v9529_v50 = vsel %vm1407_vm3, %v1449_v38, %v11284_v25  ;;  %v11287_v38 = vld [vmem:[#allocation61_spill] sm:$0xff]  ;;  %v11288_v25 = vld [vmem:[#allocation60_spill] sm:$0xff] }
 0x17a   : > { %7311 = vmatprep.mubr.msk.f32.mxu1 %vm1630_vm2, %v8976_v7  ;;  %11285 = vst [vmem:[#allocation117_spill] sm:$0xff] %v9529_v50 }
 0x17b   : > { %7096 = vmatmul.mubr.msk.f32.gmra.mrb[74].mxu0 %vm1630_vm2, %v9522_v5  ;;  %v11311_v5 = vld [vmem:[#allocation52_spill] sm:$0xff] }
 0x17c   : > { %7098 = vmatprep.mubr.msk.f32.mxu0 %vm1630_vm2, %v9529_v50  ;;  %v11307_v50 = vld [vmem:[#allocation92_spill] sm:$0xff] }
 0x17d   : > { %7312 = vmatmul.mubr.msk.f32.gmra.mrb[44].mxu1 %vm1630_vm2, %v8984_v58 }
 0x17e   : > { %7314 = vmatprep.mubr.msk.f32.mxu1 %vm1630_vm2, %v8988_v1 }
 0x17f   : > { %7099 = vmatmul.mubr.msk.f32.gmra.mrb[76].mxu0 %vm1630_vm2, %v9019_v56  ;;  %v11304_v56 = vld [vmem:[#allocation88_spill] sm:$0xff] }
 0x180   : > { %7101 = vmatprep.mubr.msk.f32.mxu0 %vm1630_vm2, %v9038_v45  ;;  %v11293_v45 = vld [vmem:[#allocation68_spill] sm:$0xff] }
 0x181   : > { %7315 = vmatmul.mubr.msk.f32.gmra.mrb[46].mxu1 %vm1630_vm2, %v8999_v46 }
 0x182   : > { %7317 = vmatprep.mubr.msk.f32.mxu1 %vm1630_vm2, %v8993_v40 }
 0x183   : > { %7102 = vmatmul.mubr.msk.f32.gmra.mrb[78].mxu0 %vm1630_vm2, %v9041_v4  ;;  %v11290_v4 = vld [vmem:[#allocation64_spill] sm:$0xff] }
 0x184   : > { %7104 = vmatprep.mubr.msk.f32.mxu0 %vm1630_vm2, %v9069_v23  ;;  %v11289_v23 = vld [vmem:[#allocation65_spill] sm:$0xff] }
 0x185   : > { %7318 = vmatmul.mubr.msk.f32.gmra.mrb[0].mxu1 %vm1630_vm2, %v9013_v31 }
 0x186   : > { %7320 = vmatprep.mubr.msk.f32.mxu1 %vm1630_vm2, %v9007_v62 }
 0x187   : > { %7105 = vmatmul.mubr.msk.f32.gmra.mrb[80].mxu0 %vm1630_vm2, %v11286_v61  ;;  %v11291_v61 = vld [vmem:[#allocation75_spill] sm:$0xff] }
 0x188   : > { %7107 = vmatprep.mubr.msk.f32.mxu0 %vm1630_vm2, %v9095_v16  ;;  %v11292_v16 = vld [vmem:[#allocation69_spill] sm:$0xff] }
 0x189   : > { %7321 = vmatmul.mubr.msk.f32.gmra.mrb[2].mxu1 %vm1630_vm2, %v11287_v38 }
 0x18a   : > { %7323 = vmatprep.mubr.msk.f32.mxu1 %vm1630_vm2, %v11288_v25 }
 0x18b   : > { %7108 = vmatmul.mubr.msk.f32.gmra.mrb[82].mxu0 %vm1630_vm2, %v9098_v37  ;;  %v11295_v37 = vld [vmem:[#allocation72_spill] sm:$0xff] }
 0x18c   : > { %7110 = vmatprep.mubr.msk.f32.mxu0 %vm1630_vm2, %v9119_v41  ;;  %v11294_v41 = vld [vmem:[#allocation73_spill] sm:$0xff] }
 0x18d   : > { %7324 = vmatmul.mubr.msk.f32.gmra.mrb[4].mxu1 %vm1630_vm2, %v11289_v23 }
 0x18e   : > { %7326 = vmatprep.mubr.msk.f32.mxu1 %vm1630_vm2, %v11290_v4 }
 0x18f   : > { %7111 = vmatmul.mubr.msk.f32.gmra.mrb[84].mxu0 %vm1630_vm2, %v11291_v61  ;;  %v11297_v61 = vld [vmem:[#allocation76_spill] sm:$0xff] }
 0x190   : > { %7113 = vmatprep.mubr.msk.f32.mxu0 %vm1630_vm2, %v9150_v53  ;;  %v11296_v53 = vld [vmem:[#allocation77_spill] sm:$0xff] }
 0x191   : > { %7327 = vmatmul.mubr.msk.f32.gmra.mrb[6].mxu1 %vm1630_vm2, %v11292_v16 }
 0x192   : > { %7329 = vmatprep.mubr.msk.f32.mxu1 %vm1630_vm2, %v11293_v45 }
 0x193   : > { %7114 = vmatmul.mubr.msk.f32.gmra.mrb[86].mxu0 %vm1630_vm2, %v9153_v10  ;;  %v11299_v10 = vld [vmem:[#allocation80_spill] sm:$0xff] }
 0x194   : > { %7116 = vmatprep.mubr.msk.f32.mxu0 %vm1630_vm2, %v9174_v55  ;;  %v11298_v55 = vld [vmem:[#allocation81_spill] sm:$0xff] }
 0x195   : > { %7330 = vmatmul.mubr.msk.f32.gmra.mrb[8].mxu1 %vm1630_vm2, %v11294_v41 }
 0x196   : > { %7332 = vmatprep.mubr.msk.f32.mxu1 %vm1630_vm2, %v11295_v37 }
 0x197   : > { %7117 = vmatmul.mubr.msk.f32.gmra.mrb[88].mxu0 %vm1630_vm2, %v9177_v30  ;;  %v11301_v30 = vld [vmem:[#allocation84_spill] sm:$0xff] }
 0x198   : > { %7119 = vmatprep.mubr.msk.f32.mxu0 %vm1630_vm2, %v9198_v9  ;;  %v11300_v9 = vld [vmem:[#allocation85_spill] sm:$0xff] }
 0x199   : > { %7333 = vmatmul.mubr.msk.f32.gmra.mrb[10].mxu1 %vm1630_vm2, %v11296_v53 }
 0x19a   : > { %7335 = vmatprep.mubr.msk.f32.mxu1 %vm1630_vm2, %v11297_v61 }
 0x19b   : > { %7120 = vmatmul.mubr.msk.f32.gmra.mrb[90].mxu0 %vm1630_vm2, %v9201_v57  ;;  %v11303_v57 = vld [vmem:[#allocation89_spill] sm:$0xff] }
 0x19c   : > { %7122 = vmatprep.mubr.msk.f32.mxu0 %vm1630_vm2, %v9222_v3  ;;  %v11302_v3 = vld [vmem:[#allocation98_spill] sm:$0xff] }
 0x19d   : > { %7336 = vmatmul.mubr.msk.f32.gmra.mrb[12].mxu1 %vm1630_vm2, %v11298_v55 }
 0x19e   : > { %7338 = vmatprep.mubr.msk.f32.mxu1 %vm1630_vm2, %v11299_v10 }
 0x19f   : > { %7123 = vmatmul.mubr.msk.f32.gmra.mrb[92].mxu0 %vm1630_vm2, %v9225_v49  ;;  %v11305_v49 = vld [vmem:[#allocation99_spill] sm:$0xff] }
 0x1a0   : > { %7125 = vmatprep.mubr.msk.f32.mxu0 %vm1630_vm2, %v9246_v19  ;;  %v11306_v19 = vld [vmem:[#allocation93_spill] sm:$0xff] }
 0x1a1   : > { %7339 = vmatmul.mubr.msk.f32.gmra.mrb[14].mxu1 %vm1630_vm2, %v11300_v9 }
 0x1a2   : > { %7341 = vmatprep.mubr.msk.f32.mxu1 %vm1630_vm2, %v11301_v30 }
 0x1a3   : > { %7126 = vmatmul.mubr.msk.f32.gmra.mrb[94].mxu0 %vm1630_vm2, %v9249_v33  ;;  %v11309_v33 = vld [vmem:[#allocation96_spill] sm:$0xff] }
 0x1a4   : > { %7128 = vmatprep.mubr.msk.f32.mxu0 %vm1630_vm2, %v11302_v3  ;;  %v11308_v3 = vld [vmem:[#allocation97_spill] sm:$0xff] }
 0x1a5   : > { %7342 = vmatmul.mubr.msk.f32.gmra.mrb[16].mxu1 %vm1630_vm2, %v11303_v57 }
 0x1a6   : > { %7344 = vmatprep.mubr.msk.f32.mxu1 %vm1630_vm2, %v11304_v56 }
 0x1a7   : > { %7129 = vmatmul.mubr.msk.f32.gmra.mrb[96].mxu0 %vm1630_vm2, %v11305_v49  ;;  %v11310_v49 = vld [vmem:[#allocation56_spill] sm:$0xff] }
 0x1a8   : > { %7131 = vmatprep.mubr.msk.f32.mxu0 %vm1630_vm2, %v9294_v51  ;;  %v1523_v51 = vrot.slane %v8865_v35, 1  ;;  %v1527_v35 = vrot.slane %v8887_v22, 1 }
 0x1a9   : > { %7345 = vmatmul.mubr.msk.f32.gmra.mrb[18].mxu1 %vm1630_vm2, %v11306_v19 }
 0x1aa   : > { %7347 = vmatprep.mubr.msk.f32.mxu1 %vm1630_vm2, %v11307_v50 }
 0x1ab   : > { %7132 = vmatmul.mubr.msk.f32.gmra.mrb[98].mxu0 %vm1630_vm2, %v9297_v27  ;;  %v11312_v27 = vld [vmem:[#allocation57_spill] sm:$0xff] }
 0x1ac   : > { %7134 = vmatprep.mubr.msk.f32.mxu0 %vm1630_vm2, %v9323_v15  ;;  %v1525_v15 = vrot.slane %v8878_v36, 1  ;;  %v1529_v36 = vrot.slane %v8900_v2, 1 }
 0x1ad   : > { %7348 = vmatmul.mubr.msk.f32.gmra.mrb[20].mxu1 %vm1630_vm2, %v11308_v3 }
 0x1ae   : > { %7350 = vmatprep.mubr.msk.f32.mxu1 %vm1630_vm2, %v11309_v33  ;;  %v1526_v17 = vsel %vm1517_vm4, %v1523_v51, %v1525_v15  ;;  %v1528_v22 = vsel %vm1517_vm4, %v1525_v15, %v1527_v35  ;;  %v1535_v15 = vrot.slane %v8916_v14, 1  ;;  %v1539_v14 = vrot.slane %v8928_v60, 1 }
 0x1af   : > { %7135 = vmatmul.mubr.msk.f32.gmra.mrb[100].mxu0 %vm1630_vm2, %v9326_v43  ;;  %v1524_v43 = vsel %vm1517_vm4, %v11313_v52, %v1523_v51  ;;  %v1533_v52 = vrot.slane %v8912_v18, 1 }
 0x1b0   : > { %7139 = vmatprep.mubr.msk.f32.mxu0 %vm1630_vm2, %v11310_v49  ;;  %v8132_v49 = vld [vmem:[%s10908_s4 + $0xc] sm:$0xf] }
 0x1b1   : > { %7351 = vmatmul.mubr.msk.f32.gmra.mrb[22].mxu1 %vm1630_vm2, %v11311_v5 }
 0x1b2   : > { %7353 = vmatprep.mubr.msk.f32.mxu1 %vm1630_vm2, %v9284_v29 }
 0x1b3   : > { %7140 = vmatmul.mubr.msk.f32.vlgmr.msra.gmra.mrb[54].mxu0 %vm1630_vm2, %v11312_v27  ;;  %v1531_v27 = vrot.slane %v8904_v48, 1 }
 0x1b4   : > { %7142 = vmatprep.mubr.msk.f32.mxu0 %vm1630_vm2, %v1524_v43  ;;  %7212 = vmatpush3.msk.msra.mxu0 %vm1727_vm1, %v8132_v49  ;;  %v1530_v43 = vsel %vm1517_vm4, %v1527_v35, %v1529_v36  ;;  %v9679_v49 = vld [vmem:[%s10908_s4 + $0x1c] sm:$0xf] }
 0x1b5   : > { %7354 = vmatmul.mubr.msk.f32.gmra.mrb[24].mxu1 %vm1630_vm2, %v9318_v11  ;;  %v9671_v51 = vsel %vm1517_vm4, %v1529_v36, %v1531_v27  ;;  %v9686_v35 = vsel %vm1517_vm4, %v1531_v27, %v1533_v52  ;;  %v9692_v36 = vsel %vm1517_vm4, %v1533_v52, %v1535_v15 }
 0x1b6   : > { %7356 = vmatprep.mubr.msk.f32.mxu1 %vm1630_vm2, %v9310_v54  ;;  %11314 = vst [vmem:[#allocation61_spill] sm:$0xff] %v9671_v51  ;;  %11315 = vst [vmem:[#allocation60_spill] sm:$0xff] %v9686_v35 }
 0x1b7   : > { %7143 = vmatmul.mubr.msk.f32.gmra.mrb[56].mxu0 %vm1630_vm2, %v1526_v17  ;;  %11316 = vst [vmem:[#allocation65_spill] sm:$0xff] %v9692_v36 }
 0x1b8   : > { %7145 = vmatprep.mubr.msk.f32.mxu0 %vm1630_vm2, %v1528_v22 }
 0x1b9   : > { %7357 = vmatmul.mubr.msk.f32.gmra.mrb[26].mxu1 %vm1630_vm2, %v9343_v63 }
 0x1ba   : > { %7361 = vmatprep.mubr.msk.f32.mxu1 %vm1630_vm2, %v1526_v17  ;;  %v1537_v17 = vrot.slane %v8924_v42, 1 }
 0x1bb   : > { %7146 = vmatmul.mubr.msk.f32.gmra.mrb[58].mxu0 %vm1630_vm2, %v1530_v43 }
 0x1bc   : > { %7148 = vmatprep.mubr.msk.f32.mxu0 %vm1630_vm2, %v9671_v51  ;;  %v9710_v27 = vsel %vm1517_vm4, %v1537_v17, %v1539_v14 }
 0x1bd   : > { %7362 = vmatmul.mubr.msk.f32.vlgmr.msra.gmra.mrb[28].mxu1 %vm1630_vm2, %v1528_v22  ;;  %v1541_v22 = vrot.slane %v8936_v24, 1  ;;  %11318 = vst [vmem:[#allocation69_spill] sm:$0xff] %v9710_v27 }
 0x1be   : > { %7434 = vmatpush3.msk.msra.mxu1 %vm1727_vm1, %v9400_v47  ;;  %7364 = vmatprep.mubr.msk.f32.mxu1 %vm1630_vm2, %v1530_v43  ;;  %v9704_v47 = vsel %vm1517_vm4, %v1535_v15, %v1537_v17  ;;  %v1543_v43 = vrot.slane %v8940_v44, 1  ;;  %v1545_v15 = vrot.slane %v8948_v12, 1 }
 0x1bf   : > { %7149 = vmatmul.mubr.msk.f32.gmra.mrb[60].mxu0 %vm1630_vm2, %v9686_v35  ;;  %7507 = vmatprep.subr.msk.mxu1 %vm1727_vm1, %v9679_v49  ;;  %11317 = vst [vmem:[#allocation64_spill] sm:$0xff] %v9704_v47  ;;  %v9720_v52 = vsel %vm1517_vm4, %v1539_v14, %v1541_v22 }
 0x1c0   : > { %7151 = vmatprep.mubr.msk.f32.mxu0 %vm1630_vm2, %v9692_v36  ;;  %11319 = vst [vmem:[#allocation68_spill] sm:$0xff] %v9720_v52  ;;  %v9726_v17 = vsel %vm1517_vm4, %v1541_v22, %v1543_v43  ;;  %v9736_v14 = vsel %vm1517_vm4, %v1543_v43, %v1545_v15 }
 0x1c1   : > { %7365 = vmatmul.mubr.msk.f32.gmra.mrb[30].mxu1 %vm1630_vm2, %v9671_v51  ;;  %11320 = vst [vmem:[#allocation73_spill] sm:$0xff] %v9726_v17  ;;  %11321 = vst [vmem:[#allocation72_spill] sm:$0xff] %v9736_v14  ;;  %v11352_v51 = vld [vmem:[#allocation102_spill] sm:$0xff] }
 0x1c2   : > { %7367 = vmatprep.mubr.msk.f32.mxu1 %vm1630_vm2, %v9686_v35  ;;  %v1547_v35 = vrot.slane %v8952_v26, 1 }
 0x1c3   : > { %7152 = vmatmul.mubr.msk.f32.gmra.mrb[62].mxu0 %vm1630_vm2, %v9704_v47 }
 0x1c4   : > { %7154 = vmatprep.mubr.msk.f32.mxu0 %vm1630_vm2, %v9710_v27  ;;  %v9742_v22 = vsel %vm1517_vm4, %v1545_v15, %v1547_v35 }
 0x1c5   : > { %7368 = vmatmul.mubr.msk.f32.gmra.mrb[32].mxu1 %vm1630_vm2, %v9692_v36  ;;  %11322 = vst [vmem:[#allocation77_spill] sm:$0xff] %v9742_v22  ;;  %v1551_v36 = vrot.slane %v8964_v13, 1 }
 0x1c6   : > { %7370 = vmatprep.mubr.msk.f32.mxu1 %vm1630_vm2, %v9704_v47  ;;  %v1549_v47 = vrot.slane %v8960_v6, 1 }
 0x1c7   : > { %7155 = vmatmul.mubr.msk.f32.gmra.mrb[64].mxu0 %vm1630_vm2, %v9720_v52 }
 0x1c8   : > { %7157 = vmatprep.mubr.msk.f32.mxu0 %vm1630_vm2, %v9726_v17  ;;  %v9752_v43 = vsel %vm1517_vm4, %v1547_v35, %v1549_v47  ;;  %v9758_v15 = vsel %vm1517_vm4, %v1549_v47, %v1551_v36 }
 0x1c9   : > { %7371 = vmatmul.mubr.msk.f32.gmra.mrb[34].mxu1 %vm1630_vm2, %v9710_v27  ;;  %11323 = vst [vmem:[#allocation76_spill] sm:$0xff] %v9752_v43  ;;  %11324 = vst [vmem:[#allocation81_spill] sm:$0xff] %v9758_v15  ;;  %v1555_v27 = vrot.slane %v8976_v7, 1 }
 0x1ca   : > { %7373 = vmatprep.mubr.msk.f32.mxu1 %vm1630_vm2, %v9720_v52  ;;  %v1553_v52 = vrot.slane %v8972_v0, 1 }
 0x1cb   : > { %7158 = vmatmul.mubr.msk.f32.gmra.mrb[66].mxu0 %vm1630_vm2, %v9736_v14 }
 0x1cc   : > { %7160 = vmatprep.mubr.msk.f32.mxu0 %vm1630_vm2, %v9742_v22  ;;  %v9768_v35 = vsel %vm1517_vm4, %v1551_v36, %v1553_v52  ;;  %v9774_v47 = vsel %vm1517_vm4, %v1553_v52, %v1555_v27 }
 0x1cd   : > { %7374 = vmatmul.mubr.msk.f32.gmra.mrb[36].mxu1 %vm1630_vm2, %v9726_v17  ;;  %11325 = vst [vmem:[#allocation80_spill] sm:$0xff] %v9768_v35  ;;  %11326 = vst [vmem:[#allocation85_spill] sm:$0xff] %v9774_v47  ;;  %v1559_v17 = vrot.slane %v8988_v1, 1 }
 0x1ce   : > { %7376 = vmatprep.mubr.msk.f32.mxu1 %vm1630_vm2, %v9736_v14  ;;  %v1557_v14 = vrot.slane %v8984_v58, 1 }
 0x1cf   : > { %7161 = vmatmul.mubr.msk.f32.gmra.mrb[68].mxu0 %vm1630_vm2, %v9752_v43 }
 0x1d0   : > { %7163 = vmatprep.mubr.msk.f32.mxu0 %vm1630_vm2, %v9758_v15  ;;  %v9784_v36 = vsel %vm1517_vm4, %v1555_v27, %v1557_v14  ;;  %v9790_v52 = vsel %vm1517_vm4, %v1557_v14, %v1559_v17 }
 0x1d1   : > { %7377 = vmatmul.mubr.msk.f32.gmra.mrb[38].mxu1 %vm1630_vm2, %v9742_v22  ;;  %11327 = vst [vmem:[#allocation84_spill] sm:$0xff] %v9784_v36  ;;  %11328 = vst [vmem:[#allocation89_spill] sm:$0xff] %v9790_v52  ;;  %v1563_v22 = vrot.slane %v8993_v40, 1 }
 0x1d2   : > { %7379 = vmatprep.mubr.msk.f32.mxu1 %vm1630_vm2, %v9752_v43  ;;  %v1561_v43 = vrot.slane %v8999_v46, 1 }
 0x1d3   : > { %7164 = vmatmul.mubr.msk.f32.gmra.mrb[70].mxu0 %vm1630_vm2, %v9768_v35 }
 0x1d4   : > { %7166 = vmatprep.mubr.msk.f32.mxu0 %vm1630_vm2, %v9774_v47  ;;  %v9800_v27 = vsel %vm1517_vm4, %v1559_v17, %v1561_v43  ;;  %v9806_v14 = vsel %vm1517_vm4, %v1561_v43, %v1563_v22 }
 0x1d5   : > { %7380 = vmatmul.mubr.msk.f32.gmra.mrb[40].mxu1 %vm1630_vm2, %v9758_v15  ;;  %11329 = vst [vmem:[#allocation88_spill] sm:$0xff] %v9800_v27  ;;  %11330 = vst [vmem:[#allocation93_spill] sm:$0xff] %v9806_v14  ;;  %v1567_v15 = vrot.slane %v9007_v62, 1 }
 0x1d6   : > { %7382 = vmatprep.mubr.msk.f32.mxu1 %vm1630_vm2, %v9768_v35  ;;  %v1565_v35 = vrot.slane %v9013_v31, 1 }
 0x1d7   : > { %7167 = vmatmul.mubr.msk.f32.gmra.mrb[72].mxu0 %vm1630_vm2, %v9784_v36 }
 0x1d8   : > { %7169 = vmatprep.mubr.msk.f32.mxu0 %vm1630_vm2, %v9790_v52  ;;  %v9816_v17 = vsel %vm1517_vm4, %v1563_v22, %v1565_v35  ;;  %v9822_v43 = vsel %vm1517_vm4, %v1565_v35, %v1567_v15 }
 0x1d9   : > { %7383 = vmatmul.mubr.msk.f32.gmra.mrb[42].mxu1 %vm1630_vm2, %v9774_v47  ;;  %11331 = vst [vmem:[#allocation92_spill] sm:$0xff] %v9816_v17  ;;  %11332 = vst [vmem:[#allocation97_spill] sm:$0xff] %v9822_v43  ;;  %v1571_v47 = vrot.slane %v11288_v25, 1 }
 0x1da   : > { %7385 = vmatprep.mubr.msk.f32.mxu1 %vm1630_vm2, %v9784_v36  ;;  %v1569_v36 = vrot.slane %v11287_v38, 1 }
 0x1db   : > { %7170 = vmatmul.mubr.msk.f32.gmra.mrb[74].mxu0 %vm1630_vm2, %v9800_v27 }
 0x1dc   : > { %7172 = vmatprep.mubr.msk.f32.mxu0 %vm1630_vm2, %v9806_v14  ;;  %v9832_v22 = vsel %vm1517_vm4, %v1567_v15, %v1569_v36  ;;  %v9838_v35 = vsel %vm1517_vm4, %v1569_v36, %v1571_v47 }
 0x1dd   : > { %7386 = vmatmul.mubr.msk.f32.gmra.mrb[44].mxu1 %vm1630_vm2, %v9790_v52  ;;  %11333 = vst [vmem:[#allocation96_spill] sm:$0xff] %v9832_v22  ;;  %11334 = vst [vmem:[#allocation56_spill] sm:$0xff] %v9838_v35  ;;  %v1575_v52 = vrot.slane %v11290_v4, 1 }
 0x1de   : > { %7388 = vmatprep.mubr.msk.f32.mxu1 %vm1630_vm2, %v9800_v27  ;;  %v1573_v27 = vrot.slane %v11289_v23, 1 }
 0x1df   : > { %7173 = vmatmul.mubr.msk.f32.gmra.mrb[76].mxu0 %vm1630_vm2, %v9816_v17 }
 0x1e0   : > { %7175 = vmatprep.mubr.msk.f32.mxu0 %vm1630_vm2, %v9822_v43  ;;  %v9848_v15 = vsel %vm1517_vm4, %v1571_v47, %v1573_v27  ;;  %v9854_v36 = vsel %vm1517_vm4, %v1573_v27, %v1575_v52 }
 0x1e1   : > { %7389 = vmatmul.mubr.msk.f32.gmra.mrb[46].mxu1 %vm1630_vm2, %v9806_v14  ;;  %11335 = vst [vmem:[#allocation52_spill] sm:$0xff] %v9848_v15  ;;  %11336 = vst [vmem:[#allocation57_spill] sm:$0xff] %v9854_v36  ;;  %v1579_v14 = vrot.slane %v11293_v45, 1 }
 0x1e2   : > { %7391 = vmatprep.mubr.msk.f32.mxu1 %vm1630_vm2, %v9816_v17  ;;  %v1577_v17 = vrot.slane %v11292_v16, 1 }
 0x1e3   : > { %7176 = vmatmul.mubr.msk.f32.gmra.mrb[78].mxu0 %vm1630_vm2, %v9832_v22 }
 0x1e4   : > { %7178 = vmatprep.mubr.msk.f32.mxu0 %vm1630_vm2, %v9838_v35  ;;  %v9864_v47 = vsel %vm1517_vm4, %v1575_v52, %v1577_v17  ;;  %v9870_v27 = vsel %vm1517_vm4, %v1577_v17, %v1579_v14 }
 0x1e5   : > { %7392 = vmatmul.mubr.msk.f32.gmra.mrb[0].mxu1 %vm1630_vm2, %v9822_v43  ;;  %11337 = vst [vmem:[#allocation118_spill] sm:$0xff] %v9864_v47  ;;  %11338 = vst [vmem:[#allocation119_spill] sm:$0xff] %v9870_v27  ;;  %v1583_v43 = vrot.slane %v11295_v37, 1 }
 0x1e6   : > { %7394 = vmatprep.mubr.msk.f32.mxu1 %vm1630_vm2, %v9832_v22  ;;  %v1581_v22 = vrot.slane %v11294_v41, 1 }
 0x1e7   : > { %7179 = vmatmul.mubr.msk.f32.gmra.mrb[80].mxu0 %vm1630_vm2, %v9848_v15 }
 0x1e8   : > { %7181 = vmatprep.mubr.msk.f32.mxu0 %vm1630_vm2, %v9854_v36  ;;  %v9880_v52 = vsel %vm1517_vm4, %v1579_v14, %v1581_v22  ;;  %v9886_v17 = vsel %vm1517_vm4, %v1581_v22, %v1583_v43 }
 0x1e9   : > { %7395 = vmatmul.mubr.msk.f32.gmra.mrb[2].mxu1 %vm1630_vm2, %v9838_v35  ;;  %11339 = vst [vmem:[#allocation120_spill] sm:$0xff] %v9880_v52  ;;  %11340 = vst [vmem:[#allocation121_spill] sm:$0xff] %v9886_v17  ;;  %v1587_v35 = vrot.slane %v11297_v61, 1 }
 0x1ea   : > { %7397 = vmatprep.mubr.msk.f32.mxu1 %vm1630_vm2, %v9848_v15  ;;  %v1585_v15 = vrot.slane %v11296_v53, 1 }
 0x1eb   : > { %7182 = vmatmul.mubr.msk.f32.gmra.mrb[82].mxu0 %vm1630_vm2, %v9864_v47 }
 0x1ec   : > { %7184 = vmatprep.mubr.msk.f32.mxu0 %vm1630_vm2, %v9870_v27  ;;  %v9896_v14 = vsel %vm1517_vm4, %v1583_v43, %v1585_v15  ;;  %v9902_v22 = vsel %vm1517_vm4, %v1585_v15, %v1587_v35 }
 0x1ed   : > { %7398 = vmatmul.mubr.msk.f32.gmra.mrb[4].mxu1 %vm1630_vm2, %v9854_v36  ;;  %11341 = vst [vmem:[#allocation122_spill] sm:$0xff] %v9896_v14  ;;  %11342 = vst [vmem:[#allocation123_spill] sm:$0xff] %v9902_v22  ;;  %v1591_v36 = vrot.slane %v11299_v10, 1 }
 0x1ee   : > { %7400 = vmatprep.mubr.msk.f32.mxu1 %vm1630_vm2, %v9864_v47  ;;  %v1589_v47 = vrot.slane %v11298_v55, 1 }
 0x1ef   : > { %7185 = vmatmul.mubr.msk.f32.gmra.mrb[84].mxu0 %vm1630_vm2, %v9880_v52 }
 0x1f0   : > { %7187 = vmatprep.mubr.msk.f32.mxu0 %vm1630_vm2, %v9886_v17  ;;  %v9912_v43 = vsel %vm1517_vm4, %v1587_v35, %v1589_v47  ;;  %v9918_v15 = vsel %vm1517_vm4, %v1589_v47, %v1591_v36 }
 0x1f1   : > { %7401 = vmatmul.mubr.msk.f32.gmra.mrb[6].mxu1 %vm1630_vm2, %v9870_v27  ;;  %11343 = vst [vmem:[#allocation124_spill] sm:$0xff] %v9912_v43  ;;  %11344 = vst [vmem:[#allocation125_spill] sm:$0xff] %v9918_v15  ;;  %v1595_v27 = vrot.slane %v11301_v30, 1 }
 0x1f2   : > { %7403 = vmatprep.mubr.msk.f32.mxu1 %vm1630_vm2, %v9880_v52  ;;  %v1593_v52 = vrot.slane %v11300_v9, 1 }
 0x1f3   : > { %7188 = vmatmul.mubr.msk.f32.gmra.mrb[86].mxu0 %vm1630_vm2, %v9896_v14 }
 0x1f4   : > { %7190 = vmatprep.mubr.msk.f32.mxu0 %vm1630_vm2, %v9902_v22  ;;  %v9928_v35 = vsel %vm1517_vm4, %v1591_v36, %v1593_v52  ;;  %v9934_v47 = vsel %vm1517_vm4, %v1593_v52, %v1595_v27 }
 0x1f5   : > { %7404 = vmatmul.mubr.msk.f32.gmra.mrb[8].mxu1 %vm1630_vm2, %v9886_v17  ;;  %11345 = vst [vmem:[#allocation126_spill] sm:$0xff] %v9928_v35  ;;  %11346 = vst [vmem:[#allocation127_spill] sm:$0xff] %v9934_v47  ;;  %v1599_v17 = vrot.slane %v11304_v56, 1 }
 0x1f6   : > { %7406 = vmatprep.mubr.msk.f32.mxu1 %vm1630_vm2, %v9896_v14  ;;  %v1597_v14 = vrot.slane %v11303_v57, 1 }
 0x1f7   : > { %7191 = vmatmul.mubr.msk.f32.gmra.mrb[88].mxu0 %vm1630_vm2, %v9912_v43 }
 0x1f8   : > { %7193 = vmatprep.mubr.msk.f32.mxu0 %vm1630_vm2, %v9918_v15  ;;  %v9944_v36 = vsel %vm1517_vm4, %v1595_v27, %v1597_v14  ;;  %v9950_v52 = vsel %vm1517_vm4, %v1597_v14, %v1599_v17 }
 0x1f9   : > { %7407 = vmatmul.mubr.msk.f32.gmra.mrb[10].mxu1 %vm1630_vm2, %v9902_v22  ;;  %11347 = vst [vmem:[#allocation128_spill] sm:$0xff] %v9944_v36  ;;  %11348 = vst [vmem:[#allocation129_spill] sm:$0xff] %v9950_v52  ;;  %v1603_v22 = vrot.slane %v11307_v50, 1 }
 0x1fa   : > { %7409 = vmatprep.mubr.msk.f32.mxu1 %vm1630_vm2, %v9912_v43  ;;  %v1601_v43 = vrot.slane %v11306_v19, 1 }
 0x1fb   : > { %7194 = vmatmul.mubr.msk.f32.gmra.mrb[90].mxu0 %vm1630_vm2, %v9928_v35 }
 0x1fc   : > { %7196 = vmatprep.mubr.msk.f32.mxu0 %vm1630_vm2, %v9934_v47  ;;  %v9960_v27 = vsel %vm1517_vm4, %v1599_v17, %v1601_v43  ;;  %v9966_v14 = vsel %vm1517_vm4, %v1601_v43, %v1603_v22 }
 0x1fd   : > { %7410 = vmatmul.mubr.msk.f32.gmra.mrb[12].mxu1 %vm1630_vm2, %v9918_v15  ;;  %11349 = vst [vmem:[#allocation130_spill] sm:$0xff] %v9960_v27  ;;  %11350 = vst [vmem:[#allocation131_spill] sm:$0xff] %v9966_v14  ;;  %v1607_v15 = vrot.slane %v11309_v33, 1 }
 0x1fe   : > { %7412 = vmatprep.mubr.msk.f32.mxu1 %vm1630_vm2, %v9928_v35  ;;  %v1605_v35 = vrot.slane %v11308_v3, 1 }
 0x1ff   : > { %7197 = vmatmul.mubr.msk.f32.gmra.mrb[92].mxu0 %vm1630_vm2, %v9944_v36 }
 0x200   : > { %7199 = vmatprep.mubr.msk.f32.mxu0 %vm1630_vm2, %v9950_v52  ;;  %v9976_v17 = vsel %vm1517_vm4, %v1603_v22, %v1605_v35  ;;  %v9982_v43 = vsel %vm1517_vm4, %v1605_v35, %v1607_v15  ;;  %v1613_v35 = vrot.slane %v9318_v11, 1 }
 0x201   : > { %7413 = vmatmul.mubr.msk.f32.gmra.mrb[14].mxu1 %vm1630_vm2, %v9934_v47  ;;  %11351 = vst [vmem:[#allocation132_spill] sm:$0xff] %v9976_v17  ;;  %v1611_v47 = vrot.slane %v9284_v29, 1 }
 0x202   : > { %7415 = vmatprep.mubr.msk.f32.mxu1 %vm1630_vm2, %v9944_v36  ;;  %v1609_v36 = vrot.slane %v11311_v5, 1 }
 0x203   : > { %7200 = vmatmul.mubr.msk.f32.gmra.mrb[94].mxu0 %vm1630_vm2, %v9960_v27 }
 0x204   : > { %7202 = vmatprep.mubr.msk.f32.mxu0 %vm1630_vm2, %v9966_v14  ;;  %v9999_v22 = vsel %vm1517_vm4, %v1607_v15, %v1609_v36  ;;  %v10005_v29 = vsel %vm1517_vm4, %v1609_v36, %v1611_v47  ;;  %v10014_v15 = vsel %vm1517_vm4, %v1611_v47, %v1613_v35  ;;  %v1615_v36 = vrot.slane %v9310_v54, 1 }
 0x205   : > { %7416 = vmatmul.mubr.msk.f32.gmra.mrb[16].mxu1 %vm1630_vm2, %v9950_v52  ;;  %v9988_v52 = vld [vmem:[%s10907_s3] ss:$0 sm:$0xff] }
 0x206   : > { %7418 = vmatprep.mubr.msk.f32.mxu1 %vm1630_vm2, %v9960_v27  ;;  %v908_v27 = vadd.f32 %v9988_v52, %v11352_v51 }
 0x207   : > { %7203 = vmatmul.mubr.msk.f32.gmra.mrb[96].mxu0 %vm1630_vm2, %v9976_v17 }
 0x208   : > { %7205 = vmatprep.mubr.msk.f32.mxu0 %vm1630_vm2, %v9982_v43  ;;  %v972_v51 = vmax.f32 %v908_v27, 0.0  ;;  %v1617_v27 = vrot.slane %v9343_v63, 1 }
 0x209   : > { %7419 = vmatmul.mubr.msk.f32.gmra.mrb[18].mxu1 %vm1630_vm2, %v9966_v14 }
 0x20a   : > { %7421 = vmatprep.mubr.msk.f32.mxu1 %vm1630_vm2, %v9976_v17  ;;  %v1287_v17 = vpop.permute.xlu1 %1286 }
 0x20b   : > { %7206 = vmatmul.mubr.msk.f32.gmra.mrb[98].mxu0 %vm1630_vm2, %v9999_v22  ;;  %v10018_v14 = vmul.f32 %v1287_v17, %v972_v51  ;;  %v10039_v17 = vsel %vm1517_vm4, %v1615_v36, %v1617_v27  ;;  %v11356_v51 = vld [vmem:[#allocation108_spill] sm:$0xff] }
 0x20c   : > { %7208 = vmatprep.mubr.msk.f32.mxu0 %vm1630_vm2, %v10005_v29 }
 0x20d   : > { %7422 = vmatmul.mubr.msk.f32.gmra.mrb[20].mxu1 %vm1630_vm2, %v9982_v43  ;;  %v11153_v47 = vrot.slane %v10018_v14, 1 }
 0x20e   : > { %7424 = vmatprep.mubr.msk.f32.mxu1 %vm1630_vm2, %v9999_v22 }
 0x20f   : > { %7209 = vmatmul.mubr.msk.f32.gmra.mrb[100].mxu0 %vm1630_vm2, %v10014_v15 }
 0x210   : > { %7213 = vmatprep.mubr.msk.f32.mxu0 %vm1630_vm2, %v9362_v21  ;;  %v10034_v21 = vsel %vm1517_vm4, %v1613_v35, %v1615_v36  ;;  %v10063_v35 = vld [vmem:[%s10908_s4 + $0x20] sm:$0xf]  ;;  %v11360_v36 = vld [vmem:[#allocation112_spill] sm:$0xff] }
 0x211   : > { %7425 = vmatmul.mubr.msk.f32.gmra.mrb[22].mxu1 %vm1630_vm2, %v10005_v29 }
 0x212   : > { %7427 = vmatprep.mubr.msk.f32.mxu1 %vm1630_vm2, %v10014_v15 }
 0x213   : > { %7214 = vmatmul.mubr.msk.f32.vlgmr.msra.gmra.mrb[54].mxu0 %vm1630_vm2, %v9371_v39  ;;  %v10050_v39 = vsel %vm1517_vm4, %v1617_v27, %v11153_v47  ;;  %v11361_v27 = vld [vmem:[#allocation113_spill] sm:$0xff] }
 0x214   : > { %7216 = vmatprep.mubr.msk.f32.mxu0 %vm1630_vm2, %v9386_v59  ;;  %11353 = vst [vmem:[#allocation102_spill] sm:$0xff] %v10050_v39  ;;  %v11354_v59 = vld [vmem:[#allocation106_spill] sm:$0xff] }
 0x215   : > { %7428 = vmatmul.mubr.msk.f32.gmra.mrb[24].mxu1 %vm1630_vm2, %v10034_v21 }
 0x216   : > { %7430 = vmatprep.mubr.msk.f32.mxu1 %vm1630_vm2, %v10039_v17 }
 0x217   : > { %7217 = vmatmul.mubr.msk.f32.gmra.mrb[56].mxu0 %vm1630_vm2, %v9392_v32 }
 0x218   : > { %7219 = vmatprep.mubr.msk.f32.mxu0 %vm1630_vm2, %v9409_v20 }
 0x219   : > { %7431 = vmatmul.mubr.msk.f32.gmra.mrb[26].mxu1 %vm1630_vm2, %v10050_v39 }
 0x21a   : > { %7435 = vmatprep.mubr.msk.f32.mxu1 %vm1630_vm2, %v9392_v32  ;;  %v11355_v32 = vld [vmem:[#allocation107_spill] sm:$0xff] }
 0x21b   : > { %7220 = vmatmul.mubr.msk.f32.gmra.mrb[58].mxu0 %vm1630_vm2, %v9415_v34 }
 0x21c   : > { %7222 = vmatprep.mubr.msk.f32.mxu0 %vm1630_vm2, %v11354_v59 }
 0x21d   : > { %7436 = vmatmul.mubr.msk.f32.vlgmr.msra.gmra.mrb[28].mxu1 %vm1630_vm2, %v9409_v20  ;;  %v11357_v20 = vld [vmem:[#allocation109_spill] sm:$0xff] }
 0x21e   : > { %7508 = vmatpush3.msk.msra.mxu1 %vm1727_vm1, %v9679_v49  ;;  %7438 = vmatprep.mubr.msk.f32.mxu1 %vm1630_vm2, %v9415_v34  ;;  %v11358_v49 = vld [vmem:[#allocation110_spill] sm:$0xff]  ;;  %v11359_v34 = vld [vmem:[#allocation111_spill] sm:$0xff] }
 0x21f   : > { %7223 = vmatmul.mubr.msk.f32.gmra.mrb[60].mxu0 %vm1630_vm2, %v11355_v32  ;;  %7581 = vmatprep.subr.msk.mxu1 %vm1727_vm1, %v10063_v35 }
 0x220   : > { %7225 = vmatprep.mubr.msk.f32.mxu0 %vm1630_vm2, %v11356_v51 }
 0x221   : > { %7439 = vmatmul.mubr.msk.f32.gmra.mrb[30].mxu1 %vm1630_vm2, %v11354_v59  ;;  %v11362_v59 = vld [vmem:[#allocation114_spill] sm:$0xff] }
 0x222   : > { %7441 = vmatprep.mubr.msk.f32.mxu1 %vm1630_vm2, %v11355_v32  ;;  %v11363_v32 = vld [vmem:[#allocation115_spill] sm:$0xff] }
 0x223   : > { %7226 = vmatmul.mubr.msk.f32.gmra.mrb[62].mxu0 %vm1630_vm2, %v11357_v20 }
 0x224   : > { %7228 = vmatprep.mubr.msk.f32.mxu0 %vm1630_vm2, %v11358_v49 }
 0x225   : > { %7442 = vmatmul.mubr.msk.f32.gmra.mrb[32].mxu1 %vm1630_vm2, %v11356_v51  ;;  %v11364_v51 = vld [vmem:[#allocation116_spill] sm:$0xff] }
 0x226   : > { %7444 = vmatprep.mubr.msk.f32.mxu1 %vm1630_vm2, %v11357_v20  ;;  %v11365_v20 = vld [vmem:[#allocation117_spill] sm:$0xff] }
 0x227   : > { %7229 = vmatmul.mubr.msk.f32.gmra.mrb[64].mxu0 %vm1630_vm2, %v11359_v34 }
 0x228   : > { %7231 = vmatprep.mubr.msk.f32.mxu0 %vm1630_vm2, %v11360_v36 }
 0x229   : > { %7445 = vmatmul.mubr.msk.f32.gmra.mrb[34].mxu1 %vm1630_vm2, %v11358_v49  ;;  %v11368_v49 = vld [vmem:[#allocation63_spill] sm:$0xff] }
 0x22a   : > { %7447 = vmatprep.mubr.msk.f32.mxu1 %vm1630_vm2, %v11359_v34  ;;  %v11369_v34 = vld [vmem:[#allocation66_spill] sm:$0xff] }
 0x22b   : > { %7232 = vmatmul.mubr.msk.f32.gmra.mrb[66].mxu0 %vm1630_vm2, %v11361_v27 }
 0x22c   : > { %7234 = vmatprep.mubr.msk.f32.mxu0 %vm1630_vm2, %v9491_v28 }
 0x22d   : > { %7448 = vmatmul.mubr.msk.f32.gmra.mrb[36].mxu1 %vm1630_vm2, %v11360_v36  ;;  %v11370_v36 = vld [vmem:[#allocation67_spill] sm:$0xff] }
 0x22e   : > { %7450 = vmatprep.mubr.msk.f32.mxu1 %vm1630_vm2, %v11361_v27  ;;  %v11371_v27 = vld [vmem:[#allocation70_spill] sm:$0xff] }
 0x22f   : > { %7235 = vmatmul.mubr.msk.f32.gmra.mrb[68].mxu0 %vm1630_vm2, %v9497_v8 }
 0x230   : > { %7237 = vmatprep.mubr.msk.f32.mxu0 %vm1630_vm2, %v11362_v59 }
 0x231   : > { %7451 = vmatmul.mubr.msk.f32.gmra.mrb[38].mxu1 %vm1630_vm2, %v9491_v28  ;;  %v11366_v28 = vld [vmem:[#allocation59_spill] sm:$0xff] }
 0x232   : > { %7453 = vmatprep.mubr.msk.f32.mxu1 %vm1630_vm2, %v9497_v8  ;;  %v11367_v8 = vld [vmem:[#allocation62_spill] sm:$0xff] }
 0x233   : > { %7238 = vmatmul.mubr.msk.f32.gmra.mrb[70].mxu0 %vm1630_vm2, %v11363_v32 }
 0x234   : > { %7240 = vmatprep.mubr.msk.f32.mxu0 %vm1630_vm2, %v11364_v51 }
 0x235   : > { %7454 = vmatmul.mubr.msk.f32.gmra.mrb[40].mxu1 %vm1630_vm2, %v11362_v59  ;;  %v11372_v59 = vld [vmem:[#allocation71_spill] sm:$0xff] }
 0x236   : > { %7456 = vmatprep.mubr.msk.f32.mxu1 %vm1630_vm2, %v11363_v32  ;;  %v11373_v32 = vld [vmem:[#allocation74_spill] sm:$0xff] }
 0x237   : > { %7241 = vmatmul.mubr.msk.f32.gmra.mrb[72].mxu0 %vm1630_vm2, %v11365_v20 }
 0x239   : > { %7457 = vmatmul.mubr.msk.f32.gmra.mrb[42].mxu1 %vm1630_vm2, %v11364_v51  ;;  %v11374_v51 = vld [vmem:[#allocation75_spill] sm:$0xff] }
 0x23a   : > { %7459 = vmatprep.mubr.msk.f32.mxu1 %vm1630_vm2, %v11365_v20  ;;  %v11375_v20 = vld [vmem:[#allocation78_spill] sm:$0xff] }
 0x23d   : > { %7460 = vmatmul.mubr.msk.f32.gmra.mrb[44].mxu1 %vm1630_vm2, %v11366_v28  ;;  %v11376_v28 = vld [vmem:[#allocation79_spill] sm:$0xff] }
 0x23e   : > { %7462 = vmatprep.mubr.msk.f32.mxu1 %vm1630_vm2, %v11367_v8  ;;  %v11377_v8 = vld [vmem:[#allocation82_spill] sm:$0xff] }
 0x241   : > { %7463 = vmatmul.mubr.msk.f32.gmra.mrb[46].mxu1 %vm1630_vm2, %v11368_v49  ;;  %v11378_v49 = vld [vmem:[#allocation83_spill] sm:$0xff] }
 0x242   : > { %7465 = vmatprep.mubr.msk.f32.mxu1 %vm1630_vm2, %v11369_v34  ;;  %v11379_v34 = vld [vmem:[#allocation86_spill] sm:$0xff] }
 0x245   : > { %7466 = vmatmul.mubr.msk.f32.gmra.mrb[0].mxu1 %vm1630_vm2, %v11370_v36  ;;  %v11380_v36 = vld [vmem:[#allocation87_spill] sm:$0xff] }
 0x246   : > { %7468 = vmatprep.mubr.msk.f32.mxu1 %vm1630_vm2, %v11371_v27  ;;  %v11381_v27 = vld [vmem:[#allocation90_spill] sm:$0xff] }
 0x249   : > { %7469 = vmatmul.mubr.msk.f32.gmra.mrb[2].mxu1 %vm1630_vm2, %v11372_v59  ;;  %v11382_v59 = vld [vmem:[#allocation91_spill] sm:$0xff] }
 0x24a   : > { %7471 = vmatprep.mubr.msk.f32.mxu1 %vm1630_vm2, %v11373_v32  ;;  %v11383_v32 = vld [vmem:[#allocation94_spill] sm:$0xff] }
 0x24d   : > { %7472 = vmatmul.mubr.msk.f32.gmra.mrb[4].mxu1 %vm1630_vm2, %v11374_v51  ;;  %v11384_v51 = vld [vmem:[#allocation95_spill] sm:$0xff] }
 0x24e   : > { %7474 = vmatprep.mubr.msk.f32.mxu1 %vm1630_vm2, %v11375_v20  ;;  %v11385_v20 = vld [vmem:[#allocation98_spill] sm:$0xff] }
 0x251   : > { %7475 = vmatmul.mubr.msk.f32.gmra.mrb[6].mxu1 %vm1630_vm2, %v11376_v28  ;;  %v11386_v28 = vld [vmem:[#allocation104_spill] sm:$0xff] }
 0x252   : > { %7477 = vmatprep.mubr.msk.f32.mxu1 %vm1630_vm2, %v11377_v8  ;;  %v913_v8 = vadd.f32 %v9988_v52, %v11386_v28  ;;  %v11392_v28 = vld [vmem:[#allocation54_spill] sm:$0xff] }
 0x255   : > { %7478 = vmatmul.mubr.msk.f32.gmra.mrb[8].mxu1 %vm1630_vm2, %v11378_v49  ;;  %v11387_v49 = vld [vmem:[#allocation99_spill] sm:$0xff] }
 0x256   : > { %7480 = vmatprep.mubr.msk.f32.mxu1 %vm1630_vm2, %v11379_v34  ;;  %v11388_v34 = vld [vmem:[#allocation100_spill] sm:$0xff] }
 0x259   : > { %7481 = vmatmul.mubr.msk.f32.gmra.mrb[10].mxu1 %vm1630_vm2, %v11380_v36  ;;  %v11389_v36 = vld [vmem:[#allocation103_spill] sm:$0xff] }
 0x25a   : > { %7483 = vmatprep.mubr.msk.f32.mxu1 %vm1630_vm2, %v11381_v27  ;;  %v918_v27 = vadd.f32 %v9988_v52, %v11389_v36  ;;  %v1509_v52 = vrot.slane %v10018_v14, 7 }
 0x25c   : > { %v974_v47 = vmax.f32 %v918_v27, 0.0 }
 0x25d   : > { %7484 = vmatmul.mubr.msk.f32.gmra.mrb[12].mxu1 %vm1630_vm2, %v11382_v59  ;;  %v973_v59 = vmax.f32 %v913_v8, 0.0 }
 0x25e   : > { %7486 = vmatprep.mubr.msk.f32.mxu1 %vm1630_vm2, %v11383_v32  ;;  %v11390_v32 = vld [vmem:[#allocation101_spill] sm:$0xff] }
 0x261   : > { %7487 = vmatmul.mubr.msk.f32.gmra.mrb[14].mxu1 %vm1630_vm2, %v11384_v51  ;;  %v11391_v51 = vld [vmem:[#allocation53_spill] sm:$0xff] }
 0x262   : > { %7489 = vmatprep.mubr.msk.f32.mxu1 %vm1630_vm2, %v11385_v20  ;;  %v1292_v20 = vpop.permute.xlu0 %1291 }
 0x263   : > { %v10179_v39 = vmul.f32 %v1292_v20, %v973_v59  ;;  %v11396_v59 = vrot.slane %v9343_v63, 7 }
 0x265   : > { %7490 = vmatmul.mubr.msk.f32.gmra.mrb[16].mxu1 %vm1630_vm2, %v11387_v49  ;;  %v11393_v49 = vld [vmem:[#allocation55_spill] sm:$0xff]  ;;  %v1511_v36 = vrot.slane %v10179_v39, 7  ;;  %v1510_v20 = vsel %vm1407_vm3, %v11396_v59, %v1509_v52 }
 0x266   : > { %7492 = vmatprep.mubr.msk.f32.mxu1 %vm1630_vm2, %v11388_v34  ;;  %v1297_v34 = vpop.permute.xlu1 %1296 }
 0x267   : > { %v10186_v8 = vmul.f32 %v1297_v34, %v974_v47 }
 0x269   : > { %7493 = vmatmul.mubr.msk.f32.gmra.mrb[18].mxu1 %vm1630_vm2, %v11390_v32  ;;  %v11394_v32 = vld [vmem:[#allocation105_spill] sm:$0xff]  ;;  %v1513_v27 = vrot.slane %v10186_v8, 7 }
 0x26a   : > { %7495 = vmatprep.mubr.msk.f32.mxu1 %vm1630_vm2, %v11391_v51  ;;  %v11395_v51 = vld [vmem:[#allocation50_spill] sm:$0xff] }
 0x26b   : > { %v1514_v47 = vsel %vm1407_vm3, %v1511_v36, %v1513_v27  ;;  %v11412_v27 = vld [vmem:[#allocation85_spill] sm:$0xff] }
 0x26d   : > { %7496 = vmatmul.mubr.msk.f32.gmra.mrb[20].mxu1 %vm1630_vm2, %v11392_v28  ;;  %v1512_v28 = vsel %vm1407_vm3, %v1509_v52, %v1511_v36  ;;  %v11410_v52 = vld [vmem:[#allocation81_spill] sm:$0xff] }
 0x26e   : > { %7498 = vmatprep.mubr.msk.f32.mxu1 %vm1630_vm2, %v11393_v49  ;;  %v11397_v49 = vld [vmem:[#allocation58_spill] sm:$0xff] }
 0x271   : > { %7499 = vmatmul.mubr.msk.f32.gmra.mrb[22].mxu1 %vm1630_vm2, %v11394_v32  ;;  %v11411_v32 = vld [vmem:[#allocation80_spill] sm:$0xff] }
 0x272   : > { %7501 = vmatprep.mubr.msk.f32.mxu1 %vm1630_vm2, %v11395_v51 }
 0x275   : > { %7502 = vmatmul.mubr.msk.f32.gmra.mrb[24].mxu1 %vm1630_vm2, %v1510_v20  ;;  %v11413_v20 = vld [vmem:[#allocation84_spill] sm:$0xff] }
 0x276   : > { %7504 = vmatprep.mubr.msk.f32.mxu1 %vm1630_vm2, %v1512_v28 }
 0x279   : > { %7505 = vmatmul.mubr.msk.f32.gmra.mrb[26].mxu1 %vm1630_vm2, %v1514_v47  ;;  %v11414_v47 = vld [vmem:[#allocation89_spill] sm:$0xff] }
 0x27a   : > { %7509 = vmatprep.mubr.msk.f32.mxu1 %vm1630_vm2, %v8900_v2 }
 0x27d   : > { %7510 = vmatmul.mubr.msk.f32.vlgmr.msra.gmra.mrb[28].mxu1 %vm1630_vm2, %v8904_v48 }
 0x27e   : > { %7582 = vmatpush3.msk.msra.mxu1 %vm1727_vm1, %v10063_v35  ;;  %7512 = vmatprep.mubr.msk.f32.mxu1 %vm1630_vm2, %v8912_v18  ;;  %v11409_v35 = vld [vmem:[#allocation76_spill] sm:$0xff] }
 0x281   : > { %7513 = vmatmul.mubr.msk.f32.gmra.mrb[30].mxu1 %vm1630_vm2, %v11397_v49 }
 0x282   : > { %7515 = vmatprep.mubr.msk.f32.mxu1 %vm1630_vm2, %v8924_v42 }
 0x285   : > { %7516 = vmatmul.mubr.msk.f32.gmra.mrb[32].mxu1 %vm1630_vm2, %v8928_v60 }
 0x286   : > { %7518 = vmatprep.mubr.msk.f32.mxu1 %vm1630_vm2, %v8936_v24  ;;  %v5183_v24 = vld [vmem:[%s10910_s6] sm:$0xf] }
 0x287   : > { %7655 = vmatprep.subr.msk.mxu0 %vm1727_vm1, %v5183_v24 }
 0x288   : > { %7656 = vmatpush3.msk.msra.mxu0 %vm1727_vm1, %v5183_v24  ;;  %v11415_v24 = vld [vmem:[#allocation88_spill] sm:$0xff] }
 0x289   : > { %7519 = vmatmul.mubr.msk.f32.gmra.mrb[34].mxu1 %vm1630_vm2, %v8940_v44 }
 0x28a   : > { %7521 = vmatprep.mubr.msk.f32.mxu1 %vm1630_vm2, %v8948_v12 }
 0x28d   : > { %7522 = vmatmul.mubr.msk.f32.gmra.mrb[36].mxu1 %vm1630_vm2, %v8952_v26 }
 0x28e   : > { %7524 = vmatprep.mubr.msk.f32.mxu1 %vm1630_vm2, %v8960_v6 }
 0x291   : > { %7525 = vmatmul.mubr.msk.f32.gmra.mrb[38].mxu1 %vm1630_vm2, %v8964_v13 }
 0x292   : > { %7527 = vmatprep.mubr.msk.f32.mxu1 %vm1630_vm2, %v8972_v0 }
 0x295   : > { %7528 = vmatmul.mubr.msk.f32.gmra.mrb[40].mxu1 %vm1630_vm2, %v8976_v7 }
 0x296   : > { %7530 = vmatprep.mubr.msk.f32.mxu1 %vm1630_vm2, %v8984_v58 }
 0x299   : > { %7531 = vmatmul.mubr.msk.f32.gmra.mrb[42].mxu1 %vm1630_vm2, %v8988_v1 }
 0x29a   : > { %7533 = vmatprep.mubr.msk.f32.mxu1 %vm1630_vm2, %v8999_v46  ;;  %v11398_v46 = vld [vmem:[#allocation51_spill] sm:$0xff] }
 0x29d   : > { %7534 = vmatmul.mubr.msk.f32.gmra.mrb[44].mxu1 %vm1630_vm2, %v8993_v40 }
 0x29e   : > { %7536 = vmatprep.mubr.msk.f32.mxu1 %vm1630_vm2, %v9013_v31 }
 0x2a1   : > { %7537 = vmatmul.mubr.msk.f32.gmra.mrb[46].mxu1 %vm1630_vm2, %v9007_v62 }
 0x2a2   : > { %7539 = vmatprep.mubr.msk.f32.mxu1 %vm1630_vm2, %v11287_v38  ;;  %v11408_v38 = vld [vmem:[#allocation77_spill] sm:$0xff] }
 0x2a5   : > { %7540 = vmatmul.mubr.msk.f32.gmra.mrb[0].mxu1 %vm1630_vm2, %v11288_v25 }
 0x2a6   : > { %7542 = vmatprep.mubr.msk.f32.mxu1 %vm1630_vm2, %v11289_v23 }
 0x2a9   : > { %7543 = vmatmul.mubr.msk.f32.gmra.mrb[2].mxu1 %vm1630_vm2, %v11290_v4 }
 0x2aa   : > { %7545 = vmatprep.mubr.msk.f32.mxu1 %vm1630_vm2, %v11292_v16 }
 0x2ad   : > { %7546 = vmatmul.mubr.msk.f32.gmra.mrb[4].mxu1 %vm1630_vm2, %v11293_v45 }
 0x2ae   : > { %v10256_v2 = vpop.f32.mrb[74].mxu0  ;;  %7548 = vmatprep.mubr.msk.f32.mxu1 %vm1630_vm2, %v11294_v41 }
 0x2af   : > { %v10260_v48 = vpop.f32.mrb[75].mxu0 }
 0x2b1   : > { %7549 = vmatmul.mubr.msk.f32.gmra.mrb[6].mxu1 %vm1630_vm2, %v11295_v37  ;;  %v11399_v37 = vld [vmem:[#allocation61_spill] sm:$0xff] }
 0x2b2   : > { %v10264_v18 = vpop.f32.mrb[76].mxu0  ;;  %7551 = vmatprep.mubr.msk.f32.mxu1 %vm1630_vm2, %v11296_v53 }
 0x2b3   : > { %v10268_v4 = vpop.f32.mrb[77].mxu0 }
 0x2b5   : > { %7552 = vmatmul.mubr.msk.f32.gmra.mrb[8].mxu1 %vm1630_vm2, %v11297_v61 }
 0x2b6   : > { %v10272_v42 = vpop.f32.mrb[78].mxu0  ;;  %7554 = vmatprep.mubr.msk.f32.mxu1 %vm1630_vm2, %v11298_v55 }
 0x2b7   : > { %v10276_v60 = vpop.f32.mrb[79].mxu0 }
 0x2b9   : > { %7555 = vmatmul.mubr.msk.f32.gmra.mrb[10].mxu1 %vm1630_vm2, %v11299_v10 }
 0x2ba   : > { %v10283_v44 = vpop.f32.mrb[80].mxu0  ;;  %7557 = vmatprep.mubr.msk.f32.mxu1 %vm1630_vm2, %v11300_v9 }
 0x2bb   : > { %v10288_v12 = vpop.f32.mrb[81].mxu0 }
 0x2bd   : > { %7558 = vmatmul.mubr.msk.f32.gmra.mrb[12].mxu1 %vm1630_vm2, %v11301_v30  ;;  %v11400_v30 = vld [vmem:[#allocation60_spill] sm:$0xff] }
 0x2be   : > { %v10293_v26 = vpop.f32.mrb[82].mxu0  ;;  %7560 = vmatprep.mubr.msk.f32.mxu1 %vm1630_vm2, %v11303_v57  ;;  %v11401_v57 = vld [vmem:[#allocation65_spill] sm:$0xff] }
 0x2bf   : > { %v10297_v6 = vpop.f32.mrb[83].mxu0 }
 0x2c1   : > { %7561 = vmatmul.mubr.msk.f32.gmra.mrb[14].mxu1 %vm1630_vm2, %v11304_v56 }
 0x2c2   : > { %v10301_v13 = vpop.f32.mrb[84].mxu0  ;;  %7563 = vmatprep.mubr.msk.f32.mxu1 %vm1630_vm2, %v11306_v19 }
 0x2c3   : > { %v10305_v0 = vpop.f32.mrb[85].mxu0 }
 0x2c5   : > { %7564 = vmatmul.mubr.msk.f32.gmra.mrb[16].mxu1 %vm1630_vm2, %v11307_v50  ;;  %v11407_v50 = vld [vmem:[#allocation72_spill] sm:$0xff] }
 0x2c6   : > { %v10309_v7 = vpop.f32.mrb[86].mxu0  ;;  %7566 = vmatprep.mubr.msk.f32.mxu1 %vm1630_vm2, %v11308_v3  ;;  %v11403_v3 = vld [vmem:[#allocation69_spill] sm:$0xff] }
 0x2c7   : > { %v10313_v58 = vpop.f32.mrb[87].mxu0 }
 0x2c9   : > { %7567 = vmatmul.mubr.msk.f32.gmra.mrb[18].mxu1 %vm1630_vm2, %v11309_v33  ;;  %v11402_v33 = vld [vmem:[#allocation64_spill] sm:$0xff] }
 0x2ca   : > { %v10317_v1 = vpop.f32.mrb[88].mxu0  ;;  %7569 = vmatprep.mubr.msk.f32.mxu1 %vm1630_vm2, %v11311_v5 }
 0x2cb   : > { %v10321_v40 = vpop.f32.mrb[89].mxu0 }
 0x2cd   : > { %7570 = vmatmul.mubr.msk.f32.gmra.mrb[20].mxu1 %vm1630_vm2, %v11398_v46 }
 0x2ce   : > { %v10325_v45 = vpop.f32.mrb[90].mxu0  ;;  %7572 = vmatprep.mubr.msk.f32.mxu1 %vm1630_vm2, %v9318_v11  ;;  %v11405_v11 = vld [vmem:[#allocation68_spill] sm:$0xff] }
 0x2cf   : > { %v10329_v62 = vpop.f32.mrb[91].mxu0 }
 0x2d1   : > { %7573 = vmatmul.mubr.msk.f32.gmra.mrb[22].mxu1 %vm1630_vm2, %v9310_v54 }
 0x2d2   : > { %v10333_v31 = vpop.f32.mrb[92].mxu0  ;;  %7575 = vmatprep.mubr.msk.f32.mxu1 %vm1630_vm2, %v9343_v63  ;;  %v11406_v63 = vld [vmem:[#allocation73_spill] sm:$0xff] }
 0x2d3   : > { %v10337_v56 = vpop.f32.mrb[93].mxu0 }
 0x2d5   : > { %7576 = vmatmul.mubr.msk.f32.gmra.mrb[24].mxu1 %vm1630_vm2, %v10018_v14 }
 0x2d6   : > { %v10341_v16 = vpop.f32.mrb[94].mxu0  ;;  %7578 = vmatprep.mubr.msk.f32.mxu1 %vm1630_vm2, %v10179_v39 }
 0x2d7   : > { %v10345_v10 = vpop.f32.mrb[95].mxu0 }
 0x2d9   : > { %7579 = vmatmul.mubr.msk.f32.gmra.mrb[26].mxu1 %vm1630_vm2, %v10186_v8 }
 0x2da   : > { %v10349_v23 = vpop.f32.mrb[96].mxu0  ;;  %7583 = vmatprep.mubr.msk.f32.mxu1 %vm1630_vm2, %v11399_v37  ;;  %v11416_v37 = vld [vmem:[#allocation93_spill] sm:$0xff] }
 0x2db   : > { %v10353_v53 = vpop.f32.mrb[97].mxu0 }
 0x2dd   : > { %7584 = vmatmul.mubr.msk.f32.vlgmr.msra.gmra.mrb[28].mxu1 %vm1630_vm2, %v11400_v30 }
 0x2de   : > { %v10357_v41 = vpop.f32.mrb[98].mxu0  ;;  %7586 = vmatprep.mubr.msk.f32.mxu1 %vm1630_vm2, %v11401_v57  ;;  %v11417_v57 = vld [vmem:[#allocation92_spill] sm:$0xff] }
 0x2df   : > { %v10361_v55 = vpop.f32.mrb[99].mxu0 }
 0x2e1   : > { %7587 = vmatmul.mubr.msk.f32.gmra.mrb[30].mxu1 %vm1630_vm2, %v11402_v33 }
 0x2e2   : > { %v10365_v9 = vpop.f32.mrb[100].mxu0  ;;  %7589 = vmatprep.mubr.msk.f32.mxu1 %vm1630_vm2, %v11403_v3  ;;  %v11418_v3 = vld [vmem:[#allocation97_spill] sm:$0xff] }
 0x2e3   : > { %v10369_v19 = vpop.f32.mrb[101].mxu0 }
 0x2e4   : > { %11404 = vst [vmem:[#allocation106_spill] sm:$0xff] %v10369_v19  ;;  %v11432_v19 = vld [vmem:[#allocation127_spill] sm:$0xff] }
 0x2e5   : > { %7590 = vmatmul.mubr.msk.f32.gmra.mrb[32].mxu1 %vm1630_vm2, %v11405_v11 }
 0x2e6   : > { %v10373_v54 = vpop.f32.mrb[54].mxu0  ;;  %7592 = vmatprep.mubr.msk.f32.mxu1 %vm1630_vm2, %v11406_v63  ;;  %v11419_v63 = vld [vmem:[#allocation96_spill] sm:$0xff] }
 0x2e7   : > { %v10377_v5 = vpop.f32.mrb[55].mxu0 }
 0x2e9   : > { %7593 = vmatmul.mubr.msk.f32.gmra.mrb[34].mxu1 %vm1630_vm2, %v11407_v50 }
 0x2ea   : > { %v10381_v61 = vpop.f32.mrb[56].mxu0  ;;  %7595 = vmatprep.mubr.msk.f32.mxu1 %vm1630_vm2, %v11408_v38  ;;  %v11420_v38 = vld [vmem:[#allocation56_spill] sm:$0xff] }
 0x2eb   : > { %v10385_v25 = vpop.f32.mrb[57].mxu0 }
 0x2ed   : > { %7596 = vmatmul.mubr.msk.f32.gmra.mrb[36].mxu1 %vm1630_vm2, %v11409_v35 }
 0x2ee   : > { %v10389_v34 = vpop.f32.mrb[58].mxu0  ;;  %7598 = vmatprep.mubr.msk.f32.mxu1 %vm1630_vm2, %v11410_v52  ;;  %v11421_v52 = vld [vmem:[#allocation52_spill] sm:$0xff] }
 0x2ef   : > { %v10393_v36 = vpop.f32.mrb[59].mxu0 }
 0x2f1   : > { %7599 = vmatmul.mubr.msk.f32.gmra.mrb[38].mxu1 %vm1630_vm2, %v11411_v32 }
 0x2f2   : > { %v10397_v51 = vpop.f32.mrb[60].mxu0  ;;  %7601 = vmatprep.mubr.msk.f32.mxu1 %vm1630_vm2, %v11412_v27  ;;  %v11422_v27 = vld [vmem:[#allocation57_spill] sm:$0xff] }
 0x2f3   : > { %v10401_v59 = vpop.f32.mrb[61].mxu0 }
 0x2f5   : > { %7602 = vmatmul.mubr.msk.f32.gmra.mrb[40].mxu1 %vm1630_vm2, %v11413_v20 }
 0x2f6   : > { %v10405_v28 = vpop.f32.mrb[62].mxu0  ;;  %7604 = vmatprep.mubr.msk.f32.mxu1 %vm1630_vm2, %v11414_v47  ;;  %v11423_v47 = vld [vmem:[#allocation118_spill] sm:$0xff] }
 0x2f7   : > { %v10409_v49 = vpop.f32.mrb[63].mxu0 }
 0x2f9   : > { %7605 = vmatmul.mubr.msk.f32.gmra.mrb[42].mxu1 %vm1630_vm2, %v11415_v24 }
 0x2fa   : > { %v10413_v46 = vpop.f32.mrb[64].mxu0  ;;  %7607 = vmatprep.mubr.msk.f32.mxu1 %vm1630_vm2, %v11416_v37  ;;  %v11424_v37 = vld [vmem:[#allocation119_spill] sm:$0xff] }
 0x2fb   : > { %v10417_v30 = vpop.f32.mrb[65].mxu0 }
 0x2fd   : > { %7608 = vmatmul.mubr.msk.f32.gmra.mrb[44].mxu1 %vm1630_vm2, %v11417_v57 }
 0x2fe   : > { %v10421_v33 = vpop.f32.mrb[66].mxu0  ;;  %7610 = vmatprep.mubr.msk.f32.mxu1 %vm1630_vm2, %v11418_v3  ;;  %v11425_v3 = vld [vmem:[#allocation120_spill] sm:$0xff] }
 0x2ff   : > { %v10425_v11 = vpop.f32.mrb[67].mxu0 }
 0x301   : > { %7611 = vmatmul.mubr.msk.f32.gmra.mrb[46].mxu1 %vm1630_vm2, %v11419_v63  ;;  %v11426_v63 = vld [vmem:[#allocation121_spill] sm:$0xff] }
 0x302   : > { %v10429_v50 = vpop.f32.mrb[68].mxu0  ;;  %7613 = vmatprep.mubr.msk.f32.mxu1 %vm1630_vm2, %v11420_v38  ;;  %v11427_v38 = vld [vmem:[#allocation122_spill] sm:$0xff] }
 0x303   : > { %v10433_v35 = vpop.f32.mrb[69].mxu0 }
 0x305   : > { %7614 = vmatmul.mubr.msk.f32.gmra.mrb[0].mxu1 %vm1630_vm2, %v11421_v52  ;;  %v11428_v52 = vld [vmem:[#allocation123_spill] sm:$0xff] }
 0x306   : > { %v10437_v32 = vpop.f32.mrb[70].mxu0  ;;  %7616 = vmatprep.mubr.msk.f32.mxu1 %vm1630_vm2, %v11422_v27  ;;  %v11429_v27 = vld [vmem:[#allocation124_spill] sm:$0xff] }
 0x307   : > { %v10441_v20 = vpop.f32.mrb[71].mxu0 }
 0x309   : > { %7617 = vmatmul.mubr.msk.f32.gmra.mrb[2].mxu1 %vm1630_vm2, %v11423_v47  ;;  %v11430_v47 = vld [vmem:[#allocation125_spill] sm:$0xff] }
 0x30a   : > { %v10445_v24 = vpop.f32.mrb[72].mxu0  ;;  %7619 = vmatprep.mubr.msk.f32.mxu1 %vm1630_vm2, %v11424_v37  ;;  %v11431_v37 = vld [vmem:[#allocation126_spill] sm:$0xff] }
 0x30b   : > { %v10449_v57 = vpop.f32.mrb[73].mxu0 }
 0x30d   : > { %7620 = vmatmul.mubr.msk.f32.gmra.mrb[4].mxu1 %vm1630_vm2, %v11425_v3  ;;  %v11433_v3 = vld [vmem:[#allocation128_spill] sm:$0xff] }
 0x30e   : > { %7622 = vmatprep.mubr.msk.f32.mxu1 %vm1630_vm2, %v11426_v63  ;;  %v11434_v63 = vld [vmem:[#allocation129_spill] sm:$0xff] }
 0x311   : > { %7623 = vmatmul.mubr.msk.f32.gmra.mrb[6].mxu1 %vm1630_vm2, %v11427_v38  ;;  %v11435_v38 = vld [vmem:[#allocation130_spill] sm:$0xff] }
 0x312   : > { %7625 = vmatprep.mubr.msk.f32.mxu1 %vm1630_vm2, %v11428_v52  ;;  %v11436_v52 = vld [vmem:[#allocation131_spill] sm:$0xff] }
 0x315   : > { %7626 = vmatmul.mubr.msk.f32.gmra.mrb[8].mxu1 %vm1630_vm2, %v11429_v27  ;;  %v11437_v27 = vld [vmem:[#allocation132_spill] sm:$0xff] }
 0x316   : > { %7628 = vmatprep.mubr.msk.f32.mxu1 %vm1630_vm2, %v11430_v47  ;;  %v1623_v47 = vrot.slane %v10186_v8, 1 }
 0x319   : > { %7629 = vmatmul.mubr.msk.f32.gmra.mrb[10].mxu1 %vm1630_vm2, %v11431_v37 }
 0x31a   : > { %7631 = vmatprep.mubr.msk.f32.mxu1 %vm1630_vm2, %v11432_v19  ;;  %v1621_v19 = vrot.slane %v10179_v39, 1 }
 0x31d   : > { %7632 = vmatmul.mubr.msk.f32.gmra.mrb[12].mxu1 %vm1630_vm2, %v11433_v3 }
 0x31e   : > { %7634 = vmatprep.mubr.msk.f32.mxu1 %vm1630_vm2, %v11434_v63 }
 0x321   : > { %7635 = vmatmul.mubr.msk.f32.gmra.mrb[14].mxu1 %vm1630_vm2, %v11435_v38 }
 0x322   : > { %7637 = vmatprep.mubr.msk.f32.mxu1 %vm1630_vm2, %v11436_v52 }
 0x325   : > { %7638 = vmatmul.mubr.msk.f32.gmra.mrb[16].mxu1 %vm1630_vm2, %v11437_v27 }
 0x326   : > { %7640 = vmatprep.mubr.msk.f32.mxu1 %vm1630_vm2, %v9982_v43  ;;  %v11438_v43 = vld [vmem:[#allocation102_spill] sm:$0xff] }
 0x329   : > { %7641 = vmatmul.mubr.msk.f32.gmra.mrb[18].mxu1 %vm1630_vm2, %v9999_v22  ;;  %v11439_v22 = vrot.slane %v10018_v14, 1 }
 0x32a   : > { %7643 = vmatprep.mubr.msk.f32.mxu1 %vm1630_vm2, %v10005_v29 }
 0x32b   : > { %v1622_v29 = vsel %vm1517_vm4, %v11439_v22, %v1621_v19 }
 0x32d   : > { %7644 = vmatmul.mubr.msk.f32.gmra.mrb[20].mxu1 %vm1630_vm2, %v10014_v15  ;;  %v1624_v15 = vsel %vm1517_vm4, %v1621_v19, %v1623_v47 }
 0x32e   : > { %7646 = vmatprep.mubr.msk.f32.mxu1 %vm1630_vm2, %v10034_v21  ;;  %v1626_v21 = vsel %vm1517_vm4, %v1623_v47, 0.0 }
 0x331   : > { %7647 = vmatmul.mubr.msk.f32.gmra.mrb[22].mxu1 %vm1630_vm2, %v10039_v17  ;;  %v10504_v17 = vld [vmem:[%s10909_s5] ss:$0 sm:$0xff] }
 0x332   : > { %7649 = vmatprep.mubr.msk.f32.mxu1 %vm1630_vm2, %v11438_v43 }
 0x335   : > { %7650 = vmatmul.mubr.msk.f32.gmra.mrb[24].mxu1 %vm1630_vm2, %v1622_v29 }
 0x336   : > { %7652 = vmatprep.mubr.msk.f32.mxu1 %vm1630_vm2, %v1624_v15 }
 0x339   : > { %7653 = vmatmul.mubr.msk.f32.gmra.mrb[26].mxu1 %vm1630_vm2, %v1626_v21 }
 0x3b0   : > { %v7585_v39 = vpop.f32.mrb[28].mxu1 }
 0x3b1   : > { %v7735_v14 = vadd.f32 %v7585_v39, %v10373_v54  ;;  %v4793_v8 = vpop.f32.mrb[29].mxu1 }
 0x3b2   : > { %v7736_v37 = vadd.f32 %v4793_v8, %v10377_v5 }
 0x3b3   : > { %v5088_v3 = vadd.f32 %v7735_v14, %v10504_v17 }
 0x3b4   : > { %v5087_v63 = vadd.f32 %v7736_v37, %v10504_v17  ;;  %v7588_v38 = vpop.f32.mrb[30].mxu1 }
 0x3b5   : > { %v7737_v52 = vadd.f32 %v7588_v38, %v10381_v61  ;;  %v4803_v27 = vpop.f32.mrb[31].mxu1  ;;  %v5136_v43 = vmax.f32 %v5088_v3, 0.0 }
 0x3b6   : > { %v5135_v19 = vmax.f32 %v5087_v63, 0.0  ;;  %v7738_v47 = vadd.f32 %v4803_v27, %v10385_v25 }
 0x3b7   : > { %v5090_v22 = vadd.f32 %v7737_v52, %v10504_v17 }
 0x3b8   : > { %v5089_v29 = vadd.f32 %v7738_v47, %v10504_v17  ;;  %v7591_v54 = vpop.f32.mrb[32].mxu1  ;;  %7657 = vmatprep.mubr.msk.f32.mxu0 %vm1630_vm2, %v5135_v19 }
 0x3b9   : > { %v7739_v5 = vadd.f32 %v7591_v54, %v10389_v34  ;;  %v4813_v15 = vpop.f32.mrb[33].mxu1  ;;  %7658 = vmatmul.mubr.msk.f32.vlgmr.msra.gmra.mrb[102].mxu0 %vm1630_vm2, %v5136_v43  ;;  %v5138_v39 = vmax.f32 %v5090_v22, 0.0 }
 0x3ba   : > { %v5137_v21 = vmax.f32 %v5089_v29, 0.0  ;;  %v7740_v61 = vadd.f32 %v4813_v15, %v10393_v36 }
 0x3bb   : > { %v5092_v14 = vadd.f32 %v7739_v5, %v10504_v17 }
 0x3bc   : > { %v5091_v25 = vadd.f32 %v7740_v61, %v10504_v17  ;;  %v7594_v8 = vpop.f32.mrb[34].mxu1  ;;  %7660 = vmatprep.mubr.msk.f32.mxu0 %vm1630_vm2, %v5137_v21 }
 0x3bd   : > { %v7741_v37 = vadd.f32 %v7594_v8, %v10397_v51  ;;  %v4823_v3 = vpop.f32.mrb[35].mxu1  ;;  %7661 = vmatmul.mubr.msk.f32.gmra.mrb[104].mxu0 %vm1630_vm2, %v5138_v39  ;;  %v5140_v38 = vmax.f32 %v5092_v14, 0.0 }
 0x3be   : > { %v5139_v34 = vmax.f32 %v5091_v25, 0.0  ;;  %v7742_v63 = vadd.f32 %v4823_v3, %v10401_v59 }
 0x3bf   : > { %v5094_v52 = vadd.f32 %v7741_v37, %v10504_v17 }
 0x3c0   : > { %v5093_v36 = vadd.f32 %v7742_v63, %v10504_v17  ;;  %v7597_v27 = vpop.f32.mrb[36].mxu1  ;;  %7663 = vmatprep.mubr.msk.f32.mxu0 %vm1630_vm2, %v5139_v34 }
 0x3c1   : > { %v7743_v19 = vadd.f32 %v7597_v27, %v10405_v28  ;;  %v4833_v47 = vpop.f32.mrb[37].mxu1  ;;  %7664 = vmatmul.mubr.msk.f32.gmra.mrb[106].mxu0 %vm1630_vm2, %v5140_v38  ;;  %v5142_v22 = vmax.f32 %v5094_v52, 0.0 }
 0x3c2   : > { %v5141_v51 = vmax.f32 %v5093_v36, 0.0  ;;  %v7744_v43 = vadd.f32 %v4833_v47, %v10409_v49 }
 0x3c3   : > { %v5096_v29 = vadd.f32 %v7743_v19, %v10504_v17 }
 0x3c4   : > { %v5095_v59 = vadd.f32 %v7744_v43, %v10504_v17  ;;  %v7600_v54 = vpop.f32.mrb[38].mxu1  ;;  %7666 = vmatprep.mubr.msk.f32.mxu0 %vm1630_vm2, %v5141_v51 }
 0x3c5   : > { %v7745_v5 = vadd.f32 %v7600_v54, %v10413_v46  ;;  %v4843_v15 = vpop.f32.mrb[39].mxu1  ;;  %7667 = vmatmul.mubr.msk.f32.gmra.mrb[108].mxu0 %vm1630_vm2, %v5142_v22  ;;  %v5144_v61 = vmax.f32 %v5096_v29, 0.0 }
 0x3c6   : > { %v5143_v28 = vmax.f32 %v5095_v59, 0.0  ;;  %v7746_v21 = vadd.f32 %v4843_v15, %v10417_v30 }
 0x3c7   : > { %v5098_v39 = vadd.f32 %v7745_v5, %v10504_v17 }
 0x3c8   : > { %v5097_v49 = vadd.f32 %v7746_v21, %v10504_v17  ;;  %v7603_v14 = vpop.f32.mrb[40].mxu1  ;;  %7669 = vmatprep.mubr.msk.f32.mxu0 %vm1630_vm2, %v5143_v28 }
 0x3c9   : > { %v7747_v25 = vadd.f32 %v7603_v14, %v10421_v33  ;;  %v4853_v8 = vpop.f32.mrb[41].mxu1  ;;  %7670 = vmatmul.mubr.msk.f32.gmra.mrb[110].mxu0 %vm1630_vm2, %v5144_v61  ;;  %v5146_v3 = vmax.f32 %v5098_v39, 0.0 }
 0x3ca   : > { %v5145_v46 = vmax.f32 %v5097_v49, 0.0  ;;  %v7748_v37 = vadd.f32 %v4853_v8, %v10425_v11 }
 0x3cb   : > { %v5100_v34 = vadd.f32 %v7747_v25, %v10504_v17 }
 0x3cc   : > { %v5099_v30 = vadd.f32 %v7748_v37, %v10504_v17  ;;  %v7606_v63 = vpop.f32.mrb[42].mxu1  ;;  %7672 = vmatprep.mubr.msk.f32.mxu0 %vm1630_vm2, %v5145_v46 }
 0x3cd   : > { %v7749_v38 = vadd.f32 %v7606_v63, %v10429_v50  ;;  %v4863_v52 = vpop.f32.mrb[43].mxu1  ;;  %7673 = vmatmul.mubr.msk.f32.gmra.mrb[112].mxu0 %vm1630_vm2, %v5146_v3  ;;  %v5148_v27 = vmax.f32 %v5100_v34, 0.0 }
 0x3ce   : > { %v5147_v33 = vmax.f32 %v5099_v30, 0.0  ;;  %v7750_v36 = vadd.f32 %v4863_v52, %v10433_v35 }
 0x3cf   : > { %v5102_v19 = vadd.f32 %v7749_v38, %v10504_v17 }
 0x3d0   : > { %v5101_v11 = vadd.f32 %v7750_v36, %v10504_v17  ;;  %v7609_v47 = vpop.f32.mrb[44].mxu1  ;;  %7675 = vmatprep.mubr.msk.f32.mxu0 %vm1630_vm2, %v5147_v33 }
 0x3d1   : > { %v7751_v51 = vadd.f32 %v7609_v47, %v10437_v32  ;;  %v4873_v43 = vpop.f32.mrb[45].mxu1  ;;  %7676 = vmatmul.mubr.msk.f32.gmra.mrb[114].mxu0 %vm1630_vm2, %v5148_v27  ;;  %v5150_v29 = vmax.f32 %v5102_v19, 0.0 }
 0x3d2   : > { %v5149_v50 = vmax.f32 %v5101_v11, 0.0  ;;  %v7752_v22 = vadd.f32 %v4873_v43, %v10441_v20 }
 0x3d3   : > { %v5104_v59 = vadd.f32 %v7751_v51, %v10504_v17 }
 0x3d4   : > { %v5103_v35 = vadd.f32 %v7752_v22, %v10504_v17  ;;  %v7612_v54 = vpop.f32.mrb[46].mxu1  ;;  %7678 = vmatprep.mubr.msk.f32.mxu0 %vm1630_vm2, %v5149_v50 }
 0x3d5   : > { %v7753_v5 = vadd.f32 %v7612_v54, %v10445_v24  ;;  %v4883_v15 = vpop.f32.mrb[47].mxu1  ;;  %7679 = vmatmul.mubr.msk.f32.gmra.mrb[116].mxu0 %vm1630_vm2, %v5150_v29  ;;  %v5152_v21 = vmax.f32 %v5104_v59, 0.0 }
 0x3d6   : > { %v5151_v32 = vmax.f32 %v5103_v35, 0.0  ;;  %v7754_v28 = vadd.f32 %v4883_v15, %v10449_v57 }
 0x3d7   : > { %v5106_v61 = vadd.f32 %v7753_v5, %v10504_v17 }
 0x3d8   : > { %v5105_v20 = vadd.f32 %v7754_v28, %v10504_v17  ;;  %v7615_v39 = vpop.f32.mrb[0].mxu1  ;;  %7681 = vmatprep.mubr.msk.f32.mxu0 %vm1630_vm2, %v5151_v32 }
 0x3d9   : > { %v7755_v49 = vadd.f32 %v7615_v39, %v10256_v2  ;;  %v4893_v14 = vpop.f32.mrb[1].mxu1  ;;  %7682 = vmatmul.mubr.msk.f32.gmra.mrb[118].mxu0 %vm1630_vm2, %v5152_v21  ;;  %v5154_v8 = vmax.f32 %v5106_v61, 0.0 }
 0x3da   : > { %v5153_v24 = vmax.f32 %v5105_v20, 0.0  ;;  %v7756_v25 = vadd.f32 %v4893_v14, %v10260_v48 }
 0x3db   : > { %v5108_v46 = vadd.f32 %v7755_v49, %v10504_v17 }
 0x3dc   : > { %v5107_v57 = vadd.f32 %v7756_v25, %v10504_v17  ;;  %v7618_v37 = vpop.f32.mrb[2].mxu1  ;;  %7684 = vmatprep.mubr.msk.f32.mxu0 %vm1630_vm2, %v5153_v24 }
 0x3dd   : > { %v7757_v3 = vadd.f32 %v7618_v37, %v10264_v18  ;;  %v4903_v34 = vpop.f32.mrb[3].mxu1  ;;  %7685 = vmatmul.mubr.msk.f32.gmra.mrb[120].mxu0 %vm1630_vm2, %v5154_v8  ;;  %v5156_v63 = vmax.f32 %v5108_v46, 0.0 }
 0x3de   : > { %v5155_v2 = vmax.f32 %v5107_v57, 0.0  ;;  %v7758_v30 = vadd.f32 %v4903_v34, %v10268_v4 }
 0x3df   : > { %v5110_v38 = vadd.f32 %v7757_v3, %v10504_v17 }
 0x3e0   : > { %v5109_v48 = vadd.f32 %v7758_v30, %v10504_v17  ;;  %v7621_v52 = vpop.f32.mrb[4].mxu1  ;;  %7687 = vmatprep.mubr.msk.f32.mxu0 %vm1630_vm2, %v5155_v2 }
 0x3e1   : > { %v7759_v33 = vadd.f32 %v7621_v52, %v10272_v42  ;;  %v4913_v36 = vpop.f32.mrb[5].mxu1  ;;  %7688 = vmatmul.mubr.msk.f32.gmra.mrb[122].mxu0 %vm1630_vm2, %v5156_v63  ;;  %v5158_v19 = vmax.f32 %v5110_v38, 0.0 }
 0x3e2   : > { %v5157_v18 = vmax.f32 %v5109_v48, 0.0  ;;  %v7760_v27 = vadd.f32 %v4913_v36, %v10276_v60 }
 0x3e3   : > { %v5112_v11 = vadd.f32 %v7759_v33, %v10504_v17 }
 0x3e4   : > { %v5111_v4 = vadd.f32 %v7760_v27, %v10504_v17  ;;  %v7624_v47 = vpop.f32.mrb[6].mxu1  ;;  %7690 = vmatprep.mubr.msk.f32.mxu0 %vm1630_vm2, %v5157_v18 }
 0x3e5   : > { %v7761_v51 = vadd.f32 %v7624_v47, %v10283_v44  ;;  %v4923_v43 = vpop.f32.mrb[7].mxu1  ;;  %7691 = vmatmul.mubr.msk.f32.gmra.mrb[124].mxu0 %vm1630_vm2, %v5158_v19  ;;  %v5160_v22 = vmax.f32 %v5112_v11, 0.0 }
 0x3e6   : > { %v5159_v42 = vmax.f32 %v5111_v4, 0.0  ;;  %v7762_v50 = vadd.f32 %v4923_v43, %v10288_v12 }
 0x3e7   : > { %v5114_v29 = vadd.f32 %v7761_v51, %v10504_v17 }
 0x3e8   : > { %v5113_v60 = vadd.f32 %v7762_v50, %v10504_v17  ;;  %v7627_v59 = vpop.f32.mrb[8].mxu1  ;;  %7693 = vmatprep.mubr.msk.f32.mxu0 %vm1630_vm2, %v5159_v42 }
 0x3e9   : > { %v7763_v35 = vadd.f32 %v7627_v59, %v10293_v26  ;;  %v4933_v54 = vpop.f32.mrb[9].mxu1  ;;  %7694 = vmatmul.mubr.msk.f32.gmra.mrb[126].mxu0 %vm1630_vm2, %v5160_v22  ;;  %v5162_v15 = vmax.f32 %v5114_v29, 0.0 }
 0x3ea   : > { %v5161_v44 = vmax.f32 %v5113_v60, 0.0  ;;  %v7764_v5 = vadd.f32 %v4933_v54, %v10297_v6 }
 0x3eb   : > { %v5116_v32 = vadd.f32 %v7763_v35, %v10504_v17 }
 0x3ec   : > { %v5115_v12 = vadd.f32 %v7764_v5, %v10504_v17  ;;  %v7630_v28 = vpop.f32.mrb[10].mxu1  ;;  %7696 = vmatprep.mubr.msk.f32.mxu0 %vm1630_vm2, %v5161_v44 }
 0x3ed   : > { %v7765_v21 = vadd.f32 %v7630_v28, %v10301_v13  ;;  %v4943_v61 = vpop.f32.mrb[11].mxu1  ;;  %7697 = vmatmul.mubr.msk.f32.gmra.mrb[128].mxu0 %vm1630_vm2, %v5162_v15  ;;  %v5164_v39 = vmax.f32 %v5116_v32, 0.0 }
 0x3ee   : > { %v5163_v26 = vmax.f32 %v5115_v12, 0.0  ;;  %v7766_v20 = vadd.f32 %v4943_v61, %v10305_v0 }
 0x3ef   : > { %v5118_v49 = vadd.f32 %v7765_v21, %v10504_v17 }
 0x3f0   : > { %v5117_v6 = vadd.f32 %v7766_v20, %v10504_v17  ;;  %v7633_v14 = vpop.f32.mrb[12].mxu1  ;;  %7699 = vmatprep.mubr.msk.f32.mxu0 %vm1630_vm2, %v5163_v26 }
 0x3f1   : > { %v7767_v24 = vadd.f32 %v7633_v14, %v10309_v7  ;;  %v4953_v25 = vpop.f32.mrb[13].mxu1  ;;  %7700 = vmatmul.mubr.msk.f32.gmra.mrb[130].mxu0 %vm1630_vm2, %v5164_v39  ;;  %v5166_v46 = vmax.f32 %v5118_v49, 0.0 }
 0x3f2   : > { %v5165_v13 = vmax.f32 %v5117_v6, 0.0  ;;  %v7768_v8 = vadd.f32 %v4953_v25, %v10313_v58  ;;  %v11440_v6 = vld [vmem:[#allocation106_spill] sm:$0xff] }
 0x3f3   : > { %v5120_v57 = vadd.f32 %v7767_v24, %v10504_v17 }
 0x3f4   : > { %v5119_v0 = vadd.f32 %v7768_v8, %v10504_v17  ;;  %v7636_v37 = vpop.f32.mrb[14].mxu1  ;;  %7702 = vmatprep.mubr.msk.f32.mxu0 %vm1630_vm2, %v5165_v13 }
 0x3f5   : > { %v7769_v3 = vadd.f32 %v7636_v37, %v10317_v1  ;;  %v4963_v34 = vpop.f32.mrb[15].mxu1  ;;  %7703 = vmatmul.mubr.msk.f32.gmra.mrb[132].mxu0 %vm1630_vm2, %v5166_v46  ;;  %v5168_v30 = vmax.f32 %v5120_v57, 0.0  ;;  %v11441_v37 = vld [vmem:[#allocation3_spill] sm:$0xff] }
 0x3f6   : > { %v5167_v7 = vmax.f32 %v5119_v0, 0.0  ;;  %v7770_v2 = vadd.f32 %v4963_v34, %v10321_v40 }
 0x3f7   : > { %v5122_v63 = vadd.f32 %v7769_v3, %v10504_v17  ;;  %v11442_v3 = vmax.f32 %v11441_v37, 0.0  ;;  %v11467_v37 = vld [vmem:[#allocation14_spill] sm:$0xff] }
 0x3f8   : > { %v5121_v58 = vadd.f32 %v7770_v2, %v10504_v17  ;;  %v7639_v38 = vpop.f32.mrb[16].mxu1  ;;  %7705 = vmatprep.mubr.msk.f32.mxu0 %vm1630_vm2, %v5167_v7  ;;  %v11443_v7 = vld [vmem:[#allocation2_spill] sm:$0xff] }
 0x3f9   : > { %v7771_v48 = vadd.f32 %v7639_v38, %v10325_v45  ;;  %v4973_v52 = vpop.f32.mrb[17].mxu1  ;;  %7706 = vmatmul.mubr.msk.f32.gmra.mrb[134].mxu0 %vm1630_vm2, %v5168_v30  ;;  %v5170_v36 = vmax.f32 %v5122_v63, 0.0  ;;  %v11444_v2 = vmax.f32 %v11443_v7, 0.0 }
 0x3fa   : > { %v5169_v1 = vmax.f32 %v5121_v58, 0.0  ;;  %v7772_v33 = vadd.f32 %v4973_v52, %v10329_v62  ;;  %v11445_v52 = vld [vmem:[#allocation5_spill] sm:$0xff] }
 0x3fb   : > { %v5124_v18 = vadd.f32 %v7771_v48, %v10504_v17 }
 0x3fc   : > { %v5123_v40 = vadd.f32 %v7772_v33, %v10504_v17  ;;  %v7642_v27 = vpop.f32.mrb[18].mxu1  ;;  %7708 = vmatprep.mubr.msk.f32.mxu0 %vm1630_vm2, %v5169_v1  ;;  %v11446_v1 = vmax.f32 %v11445_v52, 0.0  ;;  %v11471_v52 = vld [vmem:[#allocation16_spill] sm:$0xff] }
 0x3fd   : > { %v7773_v19 = vadd.f32 %v7642_v27, %v10333_v31  ;;  %v4983_v11 = vpop.f32.mrb[19].mxu1  ;;  %7709 = vmatmul.mubr.msk.f32.gmra.mrb[136].mxu0 %vm1630_vm2, %v5170_v36  ;;  %v5172_v47 = vmax.f32 %v5124_v18, 0.0  ;;  %v11447_v36 = vld [vmem:[#allocation4_spill] sm:$0xff] }
 0x3fe   : > { %v5171_v45 = vmax.f32 %v5123_v40, 0.0  ;;  %v7774_v4 = vadd.f32 %v4983_v11, %v10337_v56  ;;  %v11448_v18 = vmax.f32 %v11447_v36, 0.0 }
 0x3ff   : > { %v5126_v51 = vadd.f32 %v7773_v19, %v10504_v17 }
 0x400   : > { %v5125_v62 = vadd.f32 %v7774_v4, %v10504_v17  ;;  %v7645_v43 = vpop.f32.mrb[20].mxu1  ;;  %7711 = vmatprep.mubr.msk.f32.mxu0 %vm1630_vm2, %v5171_v45  ;;  %v11449_v4 = vld [vmem:[#allocation7_spill] sm:$0xff] }
 0x401   : > { %v7775_v42 = vadd.f32 %v7645_v43, %v10341_v16  ;;  %v4993_v50 = vpop.f32.mrb[21].mxu1  ;;  %7712 = vmatmul.mubr.msk.f32.gmra.mrb[138].mxu0 %vm1630_vm2, %v5172_v47  ;;  %v5174_v29 = vmax.f32 %v5126_v51, 0.0  ;;  %v11450_v47 = vmax.f32 %v11449_v4, 0.0  ;;  %v11475_v4 = vld [vmem:[#allocation18_spill] sm:$0xff] }
 0x402   : > { %v5173_v31 = vmax.f32 %v5125_v62, 0.0  ;;  %v7776_v22 = vadd.f32 %v4993_v50, %v10345_v10  ;;  %v11451_v62 = vld [vmem:[#allocation6_spill] sm:$0xff] }
 0x403   : > { %v5128_v60 = vadd.f32 %v7775_v42, %v10504_v17  ;;  %v11452_v43 = vmax.f32 %v11451_v62, 0.0 }
 0x404   : > { %v5127_v56 = vadd.f32 %v7776_v22, %v10504_v17  ;;  %v7648_v59 = vpop.f32.mrb[22].mxu1  ;;  %7714 = vmatprep.mubr.msk.f32.mxu0 %vm1630_vm2, %v5173_v31 }
 0x405   : > { %v7777_v35 = vadd.f32 %v7648_v59, %v10349_v23  ;;  %v5003_v54 = vpop.f32.mrb[23].mxu1  ;;  %7715 = vmatmul.mubr.msk.f32.gmra.mrb[140].mxu0 %vm1630_vm2, %v5174_v29  ;;  %v5176_v5 = vmax.f32 %v5128_v60, 0.0  ;;  %v11453_v60 = vld [vmem:[#allocation9_spill] sm:$0xff] }
 0x406   : > { %v5175_v16 = vmax.f32 %v5127_v56, 0.0  ;;  %v7778_v44 = vadd.f32 %v5003_v54, %v10353_v53  ;;  %v11454_v56 = vmax.f32 %v11453_v60, 0.0  ;;  %v11479_v60 = vld [vmem:[#allocation20_spill] sm:$0xff] }
 0x407   : > { %v5130_v15 = vadd.f32 %v7777_v35, %v10504_v17  ;;  %v11455_v35 = vld [vmem:[#allocation8_spill] sm:$0xff] }
 0x408   : > { %v5129_v10 = vadd.f32 %v7778_v44, %v10504_v17  ;;  %v7651_v32 = vpop.f32.mrb[24].mxu1  ;;  %7717 = vmatprep.mubr.msk.f32.mxu0 %vm1630_vm2, %v5175_v16  ;;  %v11456_v54 = vmax.f32 %v11455_v35, 0.0 }
 0x409   : > { %v7779_v12 = vadd.f32 %v7651_v32, %v10357_v41  ;;  %v5013_v28 = vpop.f32.mrb[25].mxu1  ;;  %7718 = vmatmul.mubr.msk.f32.gmra.mrb[142].mxu0 %vm1630_vm2, %v5176_v5  ;;  %v5178_v61 = vmax.f32 %v5130_v15, 0.0  ;;  %v11457_v32 = vld [vmem:[#allocation11_spill] sm:$0xff] }
 0x40a   : > { %v5177_v23 = vmax.f32 %v5129_v10, 0.0  ;;  %v7780_v21 = vadd.f32 %v5013_v28, %v10361_v55 }
 0x40b   : > { %v5132_v26 = vadd.f32 %v7779_v12, %v10504_v17  ;;  %v11458_v12 = vmax.f32 %v11457_v32, 0.0  ;;  %v11483_v32 = vld [vmem:[#allocation22_spill] sm:$0xff] }
 0x40c   : > { %v5131_v53 = vadd.f32 %v7780_v21, %v10504_v17  ;;  %v7654_v20 = vpop.f32.mrb[26].mxu1  ;;  %7720 = vmatprep.mubr.msk.f32.mxu0 %vm1630_vm2, %v5177_v23  ;;  %v11459_v23 = vld [vmem:[#allocation10_spill] sm:$0xff] }
 0x40d   : > { %v7781_v39 = vadd.f32 %v7654_v20, %v10365_v9  ;;  %v5023_v49 = vpop.f32.mrb[27].mxu1  ;;  %7721 = vmatmul.mubr.msk.f32.gmra.mrb[144].mxu0 %vm1630_vm2, %v5178_v61  ;;  %v5180_v24 = vmax.f32 %v5132_v26, 0.0  ;;  %v10654_v9 = vld [vmem:[%s10911_s7] ss:$0 sm:$0xff]  ;;  %v11460_v21 = vmax.f32 %v11459_v23, 0.0 }
 0x40e   : > { %v5179_v41 = vmax.f32 %v5131_v53, 0.0  ;;  %v7782_v14 = vadd.f32 %v5023_v49, %v11440_v6  ;;  %v11461_v49 = vld [vmem:[#allocation13_spill] sm:$0xff] }
 0x40f   : > { %v5134_v55 = vadd.f32 %v7781_v39, %v10504_v17 }
 0x410   : > { %v5133_v25 = vadd.f32 %v7782_v14, %v10504_v17  ;;  %7723 = vmatprep.mubr.msk.f32.mxu0 %vm1630_vm2, %v5179_v41  ;;  %v11462_v41 = vmax.f32 %v11461_v49, 0.0  ;;  %v11463_v14 = vld [vmem:[#allocation12_spill] sm:$0xff] }
 0x411   : > { %7724 = vmatmul.mubr.msk.f32.gmra.mrb[146].mxu0 %vm1630_vm2, %v5180_v24  ;;  %v5182_v8 = vmax.f32 %v5134_v55, 0.0  ;;  %v11464_v24 = vmax.f32 %v11463_v14, 0.0  ;;  %v11487_v49 = vld [vmem:[#allocation24_spill] sm:$0xff] }
 0x412   : > { %v5181_v13 = vmax.f32 %v5133_v25, 0.0 }
 0x414   : > { %7726 = vmatprep.mubr.msk.f32.mxu0 %vm1630_vm2, %v5181_v13 }
 0x415   : > { %7727 = vmatmul.mubr.msk.f32.gmra.mrb[148].mxu0 %vm1630_vm2, %v5182_v8 }
 0x48c   : > { %v7659_v46 = vpop.f32.mrb[102].mxu0 }
 0x48d   : > { %v5410_v57 = vadd.f32 %v7659_v46, %v10654_v9  ;;  %v5404_v17 = vpop.f32.mrb[103].mxu0 }
 0x48e   : > { %v5405_v0 = vadd.f32 %v10654_v9, %v5404_v17 }
 0x48f   : > { %v5644_v34 = vadd.f32 %v5410_v57, %v11442_v3  ;;  %v11465_v57 = vld [vmem:[#allocation15_spill] sm:$0xff]  ;;  %v11468_v3 = vmax.f32 %v11467_v37, 0.0 }
 0x490   : > { %v5643_v30 = vadd.f32 %v5405_v0, %v11444_v2  ;;  %v7662_v63 = vpop.f32.mrb[104].mxu0  ;;  %v11466_v17 = vmax.f32 %v11465_v57, 0.0  ;;  %v11491_v57 = vld [vmem:[#allocation26_spill] sm:$0xff] }
 0x491   : > { %5692 = vst.msk [vmem:[%s10660_s20 + $0x8] sm:$0xff] %vm423_vm0, %v5644_v34  ;;  %v5420_v58 = vadd.f32 %v7662_v63, %v10654_v9  ;;  %v5414_v38 = vpop.f32.mrb[105].mxu0 }
 0x492   : > { %5691 = vst.msk [vmem:[%s10660_s20] sm:$0xff] %vm423_vm0, %v5643_v30  ;;  %v5415_v48 = vadd.f32 %v10654_v9, %v5414_v38 }
 0x493   : > { %v5646_v33 = vadd.f32 %v5420_v58, %v11446_v1  ;;  %v11469_v58 = vld [vmem:[#allocation17_spill] sm:$0xff]  ;;  %v11472_v1 = vmax.f32 %v11471_v52, 0.0 }
 0x494   : > { %v5645_v40 = vadd.f32 %v5415_v48, %v11448_v18  ;;  %v7665_v27 = vpop.f32.mrb[106].mxu0  ;;  %v11470_v38 = vmax.f32 %v11469_v58, 0.0  ;;  %v11495_v58 = vld [vmem:[#allocation28_spill] sm:$0xff] }
 0x495   : > { %5694 = vst.msk [vmem:[%s10660_s20 + $0x18] sm:$0xff] %vm423_vm0, %v5646_v33  ;;  %v5430_v19 = vadd.f32 %v7665_v27, %v10654_v9  ;;  %v5424_v11 = vpop.f32.mrb[107].mxu0 }
 0x496   : > { %5693 = vst.msk [vmem:[%s10660_s20 + $0x10] sm:$0xff] %vm423_vm0, %v5645_v40  ;;  %v5425_v45 = vadd.f32 %v10654_v9, %v5424_v11 }
 0x497   : > { %v5648_v51 = vadd.f32 %v5430_v19, %v11450_v47  ;;  %v11473_v19 = vld [vmem:[#allocation19_spill] sm:$0xff]  ;;  %v11476_v47 = vmax.f32 %v11475_v4, 0.0 }
 0x498   : > { %v5647_v42 = vadd.f32 %v5425_v45, %v11452_v43  ;;  %v7668_v50 = vpop.f32.mrb[108].mxu0  ;;  %v11474_v11 = vmax.f32 %v11473_v19, 0.0  ;;  %v11499_v19 = vld [vmem:[#allocation30_spill] sm:$0xff] }
 0x499   : > { %5696 = vst.msk [vmem:[%s10660_s20 + $0x28] sm:$0xff] %vm423_vm0, %v5648_v51  ;;  %v5440_v31 = vadd.f32 %v7668_v50, %v10654_v9  ;;  %v5434_v22 = vpop.f32.mrb[109].mxu0 }
 0x49a   : > { %5695 = vst.msk [vmem:[%s10660_s20 + $0x20] sm:$0xff] %vm423_vm0, %v5647_v42  ;;  %v5435_v29 = vadd.f32 %v10654_v9, %v5434_v22 }
 0x49b   : > { %v5650_v59 = vadd.f32 %v5440_v31, %v11454_v56  ;;  %v11477_v31 = vld [vmem:[#allocation21_spill] sm:$0xff]  ;;  %v11480_v56 = vmax.f32 %v11479_v60, 0.0 }
 0x49c   : > { %v5649_v16 = vadd.f32 %v5435_v29, %v11456_v54  ;;  %v7671_v44 = vpop.f32.mrb[110].mxu0  ;;  %v11478_v22 = vmax.f32 %v11477_v31, 0.0  ;;  %v11503_v31 = vld [vmem:[#allocation32_spill] sm:$0xff] }
 0x49d   : > { %5698 = vst.msk [vmem:[%s10660_s20 + $0x38] sm:$0xff] %vm423_vm0, %v5650_v59  ;;  %v5450_v5 = vadd.f32 %v7671_v44, %v10654_v9  ;;  %v5444_v15 = vpop.f32.mrb[111].mxu0 }
 0x49e   : > { %5697 = vst.msk [vmem:[%s10660_s20 + $0x30] sm:$0xff] %vm423_vm0, %v5649_v16  ;;  %v5445_v10 = vadd.f32 %v10654_v9, %v5444_v15 }
 0x49f   : > { %v5652_v28 = vadd.f32 %v5450_v5, %v11458_v12  ;;  %v11481_v5 = vld [vmem:[#allocation23_spill] sm:$0xff]  ;;  %v11484_v12 = vmax.f32 %v11483_v32, 0.0 }
 0x4a0   : > { %v5651_v61 = vadd.f32 %v5445_v10, %v11460_v21  ;;  %v7674_v26 = vpop.f32.mrb[112].mxu0  ;;  %v11482_v15 = vmax.f32 %v11481_v5, 0.0  ;;  %v11507_v5 = vld [vmem:[#allocation34_spill] sm:$0xff] }
 0x4a1   : > { %5700 = vst.msk [vmem:[%s10660_s20 + $0x48] sm:$0xff] %vm423_vm0, %v5652_v28  ;;  %v5460_v53 = vadd.f32 %v7674_v26, %v10654_v9  ;;  %v5454_v20 = vpop.f32.mrb[113].mxu0 }
 0x4a2   : > { %5699 = vst.msk [vmem:[%s10660_s20 + $0x40] sm:$0xff] %vm423_vm0, %v5651_v61  ;;  %v5455_v39 = vadd.f32 %v10654_v9, %v5454_v20 }
 0x4a3   : > { %v5654_v6 = vadd.f32 %v5460_v53, %v11462_v41  ;;  %v11485_v53 = vld [vmem:[#allocation25_spill] sm:$0xff]  ;;  %v11488_v41 = vmax.f32 %v11487_v49, 0.0 }
 0x4a4   : > { %v5653_v55 = vadd.f32 %v5455_v39, %v11464_v24  ;;  %v7677_v25 = vpop.f32.mrb[114].mxu0  ;;  %v11486_v20 = vmax.f32 %v11485_v53, 0.0  ;;  %v11511_v53 = vld [vmem:[#allocation36_spill] sm:$0xff] }
 0x4a5   : > { %5702 = vst.msk [vmem:[%s10660_s20 + $0x58] sm:$0xff] %vm423_vm0, %v5654_v6  ;;  %v5470_v13 = vadd.f32 %v7677_v25, %v10654_v9  ;;  %v5464_v8 = vpop.f32.mrb[115].mxu0 }
 0x4a6   : > { %5701 = vst.msk [vmem:[%s10660_s20 + $0x50] sm:$0xff] %vm423_vm0, %v5653_v55  ;;  %v5465_v46 = vadd.f32 %v10654_v9, %v5464_v8 }
 0x4a7   : > { %v5656_v0 = vadd.f32 %v5470_v13, %v11466_v17  ;;  %v11489_v13 = vld [vmem:[#allocation27_spill] sm:$0xff]  ;;  %v11492_v17 = vmax.f32 %v11491_v57, 0.0 }
 0x4a8   : > { %v5655_v34 = vadd.f32 %v5465_v46, %v11468_v3  ;;  %v7680_v7 = vpop.f32.mrb[116].mxu0  ;;  %v11490_v8 = vmax.f32 %v11489_v13, 0.0  ;;  %v11515_v13 = vld [vmem:[#allocation38_spill] sm:$0xff] }
 0x4a9   : > { %5704 = vst.msk [vmem:[%s10660_s20 + $0x68] sm:$0xff] %vm423_vm0, %v5656_v0  ;;  %v5480_v2 = vadd.f32 %v7680_v7, %v10654_v9  ;;  %v5474_v30 = vpop.f32.mrb[117].mxu0 }
 0x4aa   : > { %5703 = vst.msk [vmem:[%s10660_s20 + $0x60] sm:$0xff] %vm423_vm0, %v5655_v34  ;;  %v5475_v63 = vadd.f32 %v10654_v9, %v5474_v30 }
 0x4ab   : > { %v5658_v48 = vadd.f32 %v5480_v2, %v11470_v38  ;;  %v11493_v2 = vld [vmem:[#allocation29_spill] sm:$0xff]  ;;  %v11496_v38 = vmax.f32 %v11495_v58, 0.0 }
 0x4ac   : > { %v5657_v33 = vadd.f32 %v5475_v63, %v11472_v1  ;;  %v7683_v36 = vpop.f32.mrb[118].mxu0  ;;  %v11494_v30 = vmax.f32 %v11493_v2, 0.0  ;;  %v11519_v2 = vld [vmem:[#allocation40_spill] sm:$0xff] }
 0x4ad   : > { %5706 = vst.msk [vmem:[%s10660_s20 + $0x78] sm:$0xff] %vm423_vm0, %v5658_v48  ;;  %v5490_v18 = vadd.f32 %v7683_v36, %v10654_v9  ;;  %v5484_v40 = vpop.f32.mrb[119].mxu0 }
 0x4ae   : > { %5705 = vst.msk [vmem:[%s10660_s20 + $0x70] sm:$0xff] %vm423_vm0, %v5657_v33  ;;  %v5485_v27 = vadd.f32 %v10654_v9, %v5484_v40 }
 0x4af   : > { %v5660_v45 = vadd.f32 %v5490_v18, %v11474_v11  ;;  %v11497_v18 = vld [vmem:[#allocation31_spill] sm:$0xff]  ;;  %v11500_v11 = vmax.f32 %v11499_v19, 0.0 }
 0x4b0   : > { %v5659_v51 = vadd.f32 %v5485_v27, %v11476_v47  ;;  %v7686_v62 = vpop.f32.mrb[120].mxu0  ;;  %v11498_v40 = vmax.f32 %v11497_v18, 0.0  ;;  %v11523_v18 = vld [vmem:[#allocation42_spill] sm:$0xff] }
 0x4b1   : > { %5708 = vst.msk [vmem:[%s10660_s20 + $0x88] sm:$0xff] %vm423_vm0, %v5660_v45  ;;  %v5500_v43 = vadd.f32 %v7686_v62, %v10654_v9  ;;  %v5494_v42 = vpop.f32.mrb[121].mxu0 }
 0x4b2   : > { %5707 = vst.msk [vmem:[%s10660_s20 + $0x80] sm:$0xff] %vm423_vm0, %v5659_v51  ;;  %v5495_v50 = vadd.f32 %v10654_v9, %v5494_v42 }
 0x4b3   : > { %v5662_v29 = vadd.f32 %v5500_v43, %v11478_v22  ;;  %v11501_v43 = vld [vmem:[#allocation33_spill] sm:$0xff]  ;;  %v11504_v22 = vmax.f32 %v11503_v31, 0.0 }
 0x4b4   : > { %v5661_v59 = vadd.f32 %v5495_v50, %v11480_v56  ;;  %v7689_v35 = vpop.f32.mrb[122].mxu0  ;;  %v11502_v42 = vmax.f32 %v11501_v43, 0.0  ;;  %v11527_v43 = vld [vmem:[#allocation44_spill] sm:$0xff] }
 0x4b5   : > { %5710 = vst.msk [vmem:[%s10660_s20 + $0x98] sm:$0xff] %vm423_vm0, %v5662_v29  ;;  %v5510_v54 = vadd.f32 %v7689_v35, %v10654_v9  ;;  %v5504_v16 = vpop.f32.mrb[123].mxu0 }
 0x4b6   : > { %5709 = vst.msk [vmem:[%s10660_s20 + $0x90] sm:$0xff] %vm423_vm0, %v5661_v59  ;;  %v5505_v44 = vadd.f32 %v10654_v9, %v5504_v16 }
 0x4b7   : > { %v5664_v10 = vadd.f32 %v5510_v54, %v11482_v15  ;;  %v11505_v54 = vld [vmem:[#allocation35_spill] sm:$0xff]  ;;  %v11508_v15 = vmax.f32 %v11507_v5, 0.0 }
 0x4b8   : > { %v5663_v28 = vadd.f32 %v5505_v44, %v11484_v12  ;;  %v7692_v23 = vpop.f32.mrb[124].mxu0  ;;  %v11506_v16 = vmax.f32 %v11505_v54, 0.0  ;;  %v11531_v54 = vld [vmem:[#allocation46_spill] sm:$0xff] }
 0x4b9   : > { %5712 = vst.msk [vmem:[%s10660_s20 + $0xa8] sm:$0xff] %vm423_vm0, %v5664_v10  ;;  %v5520_v21 = vadd.f32 %v7692_v23, %v10654_v9  ;;  %v5514_v61 = vpop.f32.mrb[125].mxu0 }
 0x4ba   : > { %5711 = vst.msk [vmem:[%s10660_s20 + $0xa0] sm:$0xff] %vm423_vm0, %v5663_v28  ;;  %v5515_v26 = vadd.f32 %v10654_v9, %v5514_v61 }
 0x4bb   : > { %v5666_v39 = vadd.f32 %v5520_v21, %v11486_v20  ;;  %v11509_v21 = vld [vmem:[#allocation37_spill] sm:$0xff]  ;;  %v11512_v20 = vmax.f32 %v11511_v53, 0.0 }
 0x4bc   : > { %v5665_v6 = vadd.f32 %v5515_v26, %v11488_v41  ;;  %v7695_v14 = vpop.f32.mrb[126].mxu0  ;;  %v11510_v61 = vmax.f32 %v11509_v21, 0.0  ;;  %v11535_v21 = vld [vmem:[#allocation48_spill] sm:$0xff] }
 0x4bd   : > { %5714 = vst.msk [vmem:[%s10660_s20 + $0xb8] sm:$0xff] %vm423_vm0, %v5666_v39  ;;  %v5530_v24 = vadd.f32 %v7695_v14, %v10654_v9  ;;  %v5524_v55 = vpop.f32.mrb[127].mxu0 }
 0x4be   : > { %5713 = vst.msk [vmem:[%s10660_s20 + $0xb0] sm:$0xff] %vm423_vm0, %v5665_v6  ;;  %v5525_v25 = vadd.f32 %v10654_v9, %v5524_v55 }
 0x4bf   : > { %v5668_v46 = vadd.f32 %v5530_v24, %v11490_v8  ;;  %v11513_v24 = vld [vmem:[#allocation39_spill] sm:$0xff]  ;;  %v11516_v8 = vmax.f32 %v11515_v13, 0.0 }
 0x4c0   : > { %v5667_v0 = vadd.f32 %v5525_v25, %v11492_v17  ;;  %v7698_v37 = vpop.f32.mrb[128].mxu0  ;;  %v11514_v55 = vmax.f32 %v11513_v24, 0.0 }
 0x4c1   : > { %5716 = vst.msk [vmem:[%s10660_s20 + $0xc8] sm:$0xff] %vm423_vm0, %v5668_v46  ;;  %v5540_v3 = vadd.f32 %v7698_v37, %v10654_v9  ;;  %v5534_v34 = vpop.f32.mrb[129].mxu0 }
 0x4c2   : > { %5715 = vst.msk [vmem:[%s10660_s20 + $0xc0] sm:$0xff] %vm423_vm0, %v5667_v0  ;;  %v5535_v7 = vadd.f32 %v10654_v9, %v5534_v34 }
 0x4c3   : > { %v5670_v63 = vadd.f32 %v5540_v3, %v11494_v30  ;;  %v11517_v3 = vld [vmem:[#allocation41_spill] sm:$0xff]  ;;  %v11520_v30 = vmax.f32 %v11519_v2, 0.0 }
 0x4c4   : > { %v5669_v48 = vadd.f32 %v5535_v7, %v11496_v38  ;;  %v7701_v52 = vpop.f32.mrb[130].mxu0  ;;  %v11518_v34 = vmax.f32 %v11517_v3, 0.0 }
 0x4c5   : > { %5718 = vst.msk [vmem:[%s10660_s20 + $0xd8] sm:$0xff] %vm423_vm0, %v5670_v63  ;;  %v5550_v1 = vadd.f32 %v7701_v52, %v10654_v9  ;;  %v5544_v33 = vpop.f32.mrb[131].mxu0 }
 0x4c6   : > { %5717 = vst.msk [vmem:[%s10660_s20 + $0xd0] sm:$0xff] %vm423_vm0, %v5669_v48  ;;  %v5545_v36 = vadd.f32 %v10654_v9, %v5544_v33 }
 0x4c7   : > { %v5672_v27 = vadd.f32 %v5550_v1, %v11498_v40  ;;  %v11521_v1 = vld [vmem:[#allocation43_spill] sm:$0xff]  ;;  %v11524_v40 = vmax.f32 %v11523_v18, 0.0 }
 0x4c8   : > { %v5671_v45 = vadd.f32 %v5545_v36, %v11500_v11  ;;  %v7704_v4 = vpop.f32.mrb[132].mxu0  ;;  %v11522_v33 = vmax.f32 %v11521_v1, 0.0 }
 0x4c9   : > { %5720 = vst.msk [vmem:[%s10660_s20 + $0xe8] sm:$0xff] %vm423_vm0, %v5672_v27  ;;  %v5560_v47 = vadd.f32 %v7704_v4, %v10654_v9  ;;  %v5554_v51 = vpop.f32.mrb[133].mxu0 }
 0x4ca   : > { %5719 = vst.msk [vmem:[%s10660_s20 + $0xe0] sm:$0xff] %vm423_vm0, %v5671_v45  ;;  %v5555_v62 = vadd.f32 %v10654_v9, %v5554_v51 }
 0x4cb   : > { %v5674_v50 = vadd.f32 %v5560_v47, %v11502_v42  ;;  %v11525_v47 = vld [vmem:[#allocation45_spill] sm:$0xff]  ;;  %v11528_v42 = vmax.f32 %v11527_v43, 0.0 }
 0x4cc   : > { %v5673_v29 = vadd.f32 %v5555_v62, %v11504_v22  ;;  %v7707_v60 = vpop.f32.mrb[134].mxu0  ;;  %v11526_v51 = vmax.f32 %v11525_v47, 0.0 }
 0x4cd   : > { %5722 = vst.msk [vmem:[%s10660_s20 + $0xf8] sm:$0xff] %vm423_vm0, %v5674_v50  ;;  %v5570_v56 = vadd.f32 %v7707_v60, %v10654_v9  ;;  %v5564_v59 = vpop.f32.mrb[135].mxu0 }
 0x4ce   : > { %5721 = vst.msk [vmem:[%s10660_s20 + $0xf0] sm:$0xff] %vm423_vm0, %v5673_v29  ;;  %v5565_v35 = vadd.f32 %v10654_v9, %v5564_v59 }
 0x4cf   : > { %v5676_v44 = vadd.f32 %v5570_v56, %v11506_v16  ;;  %v11529_v56 = vld [vmem:[#allocation47_spill] sm:$0xff]  ;;  %v11532_v16 = vmax.f32 %v11531_v54, 0.0 }
 0x4d0   : > { %v5675_v10 = vadd.f32 %v5565_v35, %v11508_v15  ;;  %v7710_v32 = vpop.f32.mrb[136].mxu0  ;;  %v11530_v59 = vmax.f32 %v11529_v56, 0.0 }
 0x4d1   : > { %5724 = vst.msk [vmem:[%s10660_s20 + $0x108] sm:$0xff] %vm423_vm0, %v5676_v44  ;;  %v5580_v12 = vadd.f32 %v7710_v32, %v10654_v9  ;;  %v5574_v28 = vpop.f32.mrb[137].mxu0 }
 0x4d2   : > { %5723 = vst.msk [vmem:[%s10660_s20 + $0x100] sm:$0xff] %vm423_vm0, %v5675_v10  ;;  %v5575_v23 = vadd.f32 %v10654_v9, %v5574_v28 }
 0x4d3   : > { %v5678_v26 = vadd.f32 %v5580_v12, %v11510_v61  ;;  %v11533_v12 = vld [vmem:[#allocation49_spill] sm:$0xff]  ;;  %v11536_v61 = vmax.f32 %v11535_v21, 0.0 }
 0x4d4   : > { %v5677_v39 = vadd.f32 %v5575_v23, %v11512_v20  ;;  %v7713_v49 = vpop.f32.mrb[138].mxu0  ;;  %v11534_v28 = vmax.f32 %v11533_v12, 0.0 }
 0x4d5   : > { %5726 = vst.msk [vmem:[%s10660_s20 + $0x118] sm:$0xff] %vm423_vm0, %v5678_v26  ;;  %v5590_v41 = vadd.f32 %v7713_v49, %v10654_v9  ;;  %v5584_v6 = vpop.f32.mrb[139].mxu0 }
 0x4d6   : > { %5725 = vst.msk [vmem:[%s10660_s20 + $0x110] sm:$0xff] %vm423_vm0, %v5677_v39  ;;  %v5585_v14 = vadd.f32 %v10654_v9, %v5584_v6 }
 0x4d7   : > { %v5680_v25 = vadd.f32 %v5590_v41, %v11514_v55 }
 0x4d8   : > { %v5679_v46 = vadd.f32 %v5585_v14, %v11516_v8  ;;  %v7716_v57 = vpop.f32.mrb[140].mxu0 }
 0x4d9   : > { %5728 = vst.msk [vmem:[%s10660_s20 + $0x128] sm:$0xff] %vm423_vm0, %v5680_v25  ;;  %v5600_v17 = vadd.f32 %v7716_v57, %v10654_v9  ;;  %v5594_v0 = vpop.f32.mrb[141].mxu0 }
 0x4da   : > { %5727 = vst.msk [vmem:[%s10660_s20 + $0x120] sm:$0xff] %vm423_vm0, %v5679_v46  ;;  %v5595_v37 = vadd.f32 %v10654_v9, %v5594_v0 }
 0x4db   : > { %v5682_v7 = vadd.f32 %v5600_v17, %v11518_v34 }
 0x4dc   : > { %v5681_v63 = vadd.f32 %v5595_v37, %v11520_v30  ;;  %v7719_v58 = vpop.f32.mrb[142].mxu0 }
 0x4dd   : > { %5730 = vst.msk [vmem:[%s10660_s20 + $0x138] sm:$0xff] %vm423_vm0, %v5682_v7  ;;  %v5610_v38 = vadd.f32 %v7719_v58, %v10654_v9  ;;  %v5604_v48 = vpop.f32.mrb[143].mxu0 }
 0x4de   : > { %5729 = vst.msk [vmem:[%s10660_s20 + $0x130] sm:$0xff] %vm423_vm0, %v5681_v63  ;;  %v5605_v52 = vadd.f32 %v10654_v9, %v5604_v48 }
 0x4df   : > { %v5684_v36 = vadd.f32 %v5610_v38, %v11522_v33 }
 0x4e0   : > { %v5683_v27 = vadd.f32 %v5605_v52, %v11524_v40  ;;  %v7722_v19 = vpop.f32.mrb[144].mxu0 }
 0x4e1   : > { %5732 = vst.msk [vmem:[%s10660_s20 + $0x148] sm:$0xff] %vm423_vm0, %v5684_v36  ;;  %v5620_v11 = vadd.f32 %v7722_v19, %v10654_v9  ;;  %v5614_v45 = vpop.f32.mrb[145].mxu0 }
 0x4e2   : > { %5731 = vst.msk [vmem:[%s10660_s20 + $0x140] sm:$0xff] %vm423_vm0, %v5683_v27  ;;  %v5615_v4 = vadd.f32 %v10654_v9, %v5614_v45 }
 0x4e3   : > { %v5686_v62 = vadd.f32 %v5620_v11, %v11526_v51 }
 0x4e4   : > { %v5685_v50 = vadd.f32 %v5615_v4, %v11528_v42  ;;  %v7725_v31 = vpop.f32.mrb[146].mxu0 }
 0x4e5   : > { %5734 = vst.msk [vmem:[%s10660_s20 + $0x158] sm:$0xff] %vm423_vm0, %v5686_v62  ;;  %v5630_v22 = vadd.f32 %v7725_v31, %v10654_v9  ;;  %v5624_v29 = vpop.f32.mrb[147].mxu0 }
 0x4e6   : > { %5733 = vst.msk [vmem:[%s10660_s20 + $0x150] sm:$0xff] %vm423_vm0, %v5685_v50  ;;  %v5625_v60 = vadd.f32 %v10654_v9, %v5624_v29 }
 0x4e7   : > { %v5688_v35 = vadd.f32 %v5630_v22, %v11530_v59 }
 0x4e8   : > { %v5687_v44 = vadd.f32 %v5625_v60, %v11532_v16  ;;  %v7728_v5 = vpop.f32.mrb[148].mxu0 }
 0x4e9   : > { %5736 = vst.msk [vmem:[%s10660_s20 + $0x168] sm:$0xff] %vm423_vm0, %v5688_v35  ;;  %v5640_v15 = vadd.f32 %v7728_v5, %v10654_v9  ;;  %v5634_v10 = vpop.f32.mrb[149].mxu0 }
 0x4ea   : > { %5735 = vst.msk [vmem:[%s10660_s20 + $0x160] sm:$0xff] %vm423_vm0, %v5687_v44  ;;  %v5635_v32 = vadd.f32 %v10654_v9, %v5634_v10 }
 0x4eb   : > { %v5690_v23 = vadd.f32 %v5640_v15, %v11534_v28 }
 0x4ec   : > { %v5689_v26 = vadd.f32 %v5635_v32, %v11536_v61 }
 0x4ed   : > { %5738 = vst.msk [vmem:[%s10660_s20 + $0x178] sm:$0xff] %vm423_vm0, %v5690_v23 }
 0x4ee   : > { %5737 = vst.msk [vmem:[%s10660_s20 + $0x170] sm:$0xff] %vm423_vm0, %v5689_v26 }
 0x4ef PF: > { %s18_s27 = sadd.s32 1, %s8140_s27  }
 0x4f0   : > { %p15_p4 = scmp.ge.s32.totalorder %s18_s27, 4  }
 0x4f2   :  { %17 = sbr.rel (!%p15_p4) target bundleno = 1 (0x1), region = 90 }

</bundles_post_ra>
